<compile_context>
chip_gen: v5e
topology: v5e:2x2
jax: 0.10.0
libtpu: 0.0.40
codegen_flags: <defaults>
</compile_context>

<pallas_src>
import jax
import jax.numpy as jnp
from jax.experimental import pallas as pl
from jax.experimental.pallas import tpu as pltpu


def _ar_head_kernel(x_ref, w_ref, b_ref, o_ref):
    # x_ref: (tn, S*F)  feature block (each row = one sample's whole sequence)
    # w_ref: (S*F, Cp)  fc weight, replicated S times, pre-scaled by 1/S
    # b_ref: (1, Cp)    f32 bias, classes padded to Cp
    # o_ref: (tn, Cp)   f32 output block
    logits = jnp.dot(x_ref[...], w_ref[...],
                     preferred_element_type=jnp.float32)      # MXU, f32 acc
    o_ref[...] = (logits + b_ref[...]).astype(o_ref.dtype)


def model_ar_head(x_feat, fc_w, fc_b, *, block_n=128):
    """Fused (Linear + sequence-mean) head: returns (N, num_class) float32.

    x_feat: (N, S, 1600) features (Model_FP output); dtype f32 or bf16 --
            no cast or pad of x is performed here (feed bf16 straight from
            the producer to halve the dominant HBM traffic).
    fc_w  : (1600, num_class)  nn.Linear weight, stored transposed
    fc_b  : (num_class,)
    """
    N, S, F = x_feat.shape
    C = fc_w.shape[1]

    # Lane-dense class dimension (multiple of 128).
    Cp = max(((C + 127) // 128) * 128, 128)

    # Fold the 1/S of the sequence-mean into the weight, replicate S times so
    # the S-reduction happens inside the MXU contraction, zero-pad classes.
    # Small host op on the (tiny) weight only; x itself is untouched.
    w = fc_w.astype(jnp.float32) * jnp.float32(1.0 / S)
    w = jnp.pad(w, ((0, 0), (0, Cp - C)))                      # (F, Cp)
    w = jnp.tile(w, (S, 1))                                    # (S*F, Cp)
    if x_feat.dtype != jnp.float32:
        # bf16 x feeds the MXU directly (f32 accumulation); match the weight
        # dtype so no whole-block widen/cast of x is ever needed.
        w = w.astype(x_feat.dtype)
    b = jnp.pad(fc_b.astype(jnp.float32), (0, Cp - C)).reshape(1, Cp)

    # Free view: (N, S, F) is contiguous as (N, S*F).
    x2d = x_feat.reshape(N, S * F)

    # Sample-block size: <=block_n rows, multiple of 8, and at least two grid
    # blocks when N > 8 so the "parallel" axis shards across v7x's 2 TCs.
    if N <= 8:
        tn = N
    else:
        half = ((-(-N // 2)) + 7) // 8 * 8                     # round_up(cdiv(N,2), 8)
        tn = min(block_n, half)
    n_blocks = pl.cdiv(N, tn)   # ragged last block handled by Pallas masking

    out = pl.pallas_call(
        _ar_head_kernel,
        out_shape=jax.ShapeDtypeStruct((N, Cp), jnp.float32),
        grid_spec=pltpu.PrefetchScalarGridSpec(
            num_scalar_prefetch=0,
            grid=(n_blocks,),
            in_specs=[
                pl.BlockSpec((tn, S * F), lambda n: (n, 0)),
                pl.BlockSpec((S * F, Cp), lambda n: (0, 0)),
                pl.BlockSpec((1, Cp), lambda n: (0, 0)),
            ],
            out_specs=pl.BlockSpec((tn, Cp), lambda n: (n, 0)),
        ),
        compiler_params=pltpu.CompilerParams(
            dimension_semantics=("parallel",),
            # ~27 MiB worst case at tn=128 f32 (x block + replicated W, both
            # double-buffered); 48 MiB leaves headroom on every generation
            # (v7x: 64 MiB physical; v5e/v6e: 128 MiB).
            vmem_limit_bytes=48 * 1024 * 1024,
        ),
    )(x2d, w, b)

    return out[:, :C]


def model_ar_forward(x_feat, fc_w, fc_b, pose=False, *, block_n=128):
    """Replicates Model_AR.forward given Model_FP's output `x_feat`."""
    if pose:
        return x_feat
    return model_ar_head(x_feat, fc_w, fc_b, block_n=block_n)


def _reference(x_feat, fc_w, fc_b):
    N, S, F = x_feat.shape
    C = fc_w.shape[1]
    flat = x_feat.astype(jnp.float32).reshape(-1, F)
    pred = flat @ fc_w + fc_b
    pred = pred.reshape(N, S, C)
    return pred.mean(axis=1)


if __name__ == "__main__":
    key = jax.random.PRNGKey(0)
    N, S, F, C = 2, 8, 1600, 16   # batch, seq_len, fc in-features, num_class

    k_x, k_w, k_b = jax.random.split(key, 3)
    # Deterministic synthetic "Model_FP output" features + fc parameters.
    x_feat = jax.random.normal(k_x, (N, S, F), dtype=jnp.float32)
    fc_w = (jax.random.normal(k_w, (F, C), dtype=jnp.float32)
            * (1.0 / jnp.sqrt(F)))
    fc_b = jax.random.normal(k_b, (C,), dtype=jnp.float32) * 0.01

    ref = _reference(x_feat, fc_w, fc_b)

    # f32 path: algebraically identical to the reference (mean commuted
    # through the linear; the exact power-of-two 1/S folded into the weight).
    out = model_ar_forward(x_feat, fc_w, fc_b, pose=False)
    out = jax.block_until_ready(out)
    assert out.shape == (N, C), out.shape
    assert jnp.allclose(out, ref, atol=1e-4, rtol=1e-4), (
        float(jnp.max(jnp.abs(out - ref))))

    # bf16-x path: stands in for a producer (Model_FP) that already emits
    # bf16 features; the kernel streams them straight into the MXU with f32
    # accumulation (no host cast, no in-kernel widen).
    x_bf16 = x_feat.astype(jnp.bfloat16)
    out_bf16 = model_ar_forward(x_bf16, fc_w, fc_b, pose=False)
    out_bf16 = jax.block_until_ready(out_bf16)
    assert out_bf16.shape == (N, C), out_bf16.shape
    assert jnp.allclose(out_bf16, ref, atol=5e-2, rtol=5e-2), (
        float(jnp.max(jnp.abs(out_bf16 - ref))))

    print("KERNEL_OK")
</pallas_src>

<mosaic_0001>
module attributes {stable_mosaic.version = 11 : i64} {
  func.func @_ar_head_kernel(%arg0: i32, %arg1: memref<2x12800xf32, #tpu.memory_space<vmem>>, %arg2: memref<12800x128xf32, #tpu.memory_space<vmem>>, %arg3: memref<1x128xf32, #tpu.memory_space<vmem>>, %arg4: memref<2x128xf32, #tpu.memory_space<vmem>>) attributes {dimension_semantics = [#tpu.dimension_semantics<parallel>], iteration_bounds = array<i64: 1>, scalar_prefetch = 0 : i64, scratch_operands = 0 : i64, tpu.core_type = #tpu.core_type<tc>, window_params = [{transform_indices = @transform_0, window_bounds = array<i64: 2, 12800>}, {pipeline_mode = #tpu.pipeline_mode<synchronous>, transform_indices = @transform_1, window_bounds = array<i64: 12800, 128>}, {pipeline_mode = #tpu.pipeline_mode<synchronous>, transform_indices = @transform_2, window_bounds = array<i64: 1, 128>}, {transform_indices = @transform_3, window_bounds = array<i64: 2, 128>}]} {
    %c0 = arith.constant 0 : index
    %c0_0 = arith.constant 0 : index
    %0 = vector.load %arg1[%c0, %c0_0] : memref<2x12800xf32, #tpu.memory_space<vmem>>, vector<2x12800xf32>
    %c0_1 = arith.constant 0 : index
    %c0_2 = arith.constant 0 : index
    %1 = vector.load %arg2[%c0_1, %c0_2] : memref<12800x128xf32, #tpu.memory_space<vmem>>, vector<12800x128xf32>
    %cst = arith.constant dense<0.000000e+00> : vector<2x128xf32>
    %2 = tpu.matmul %0, %1, %cst {dimension_numbers = #tpu.dot_dimension_numbers<[1], [0], [0], [1], [0, 0, 1, 1], [], []>} : vector<2x12800xf32>, vector<12800x128xf32>, vector<2x128xf32> -> vector<2x128xf32>
    %c0_3 = arith.constant 0 : index
    %c0_4 = arith.constant 0 : index
    %3 = vector.load %arg3[%c0_3, %c0_4] : memref<1x128xf32, #tpu.memory_space<vmem>>, vector<1x128xf32>
    %4 = vector.broadcast %3 : vector<1x128xf32> to vector<2x128xf32>
    %5 = arith.addf %2, %4 : vector<2x128xf32>
    %c0_5 = arith.constant 0 : index
    %c0_6 = arith.constant 0 : index
    %6 = vector.load %arg4[%c0_5, %c0_6] : memref<2x128xf32, #tpu.memory_space<vmem>>, vector<2x128xf32>
    tpu.vector_store %arg4[%c0_5, %c0_6], %5 {strides = array<i32>} : memref<2x128xf32, #tpu.memory_space<vmem>>, vector<2x128xf32>,
    return
  }
  func.func @transform_0(%arg0: i32) -> (i32, i32) {
    %c0_i32 = arith.constant 0 : i32
    %c0_i32_0 = arith.constant 0 : i32
    return %arg0, %c0_i32 : i32, i32
  }
  func.func @transform_1(%arg0: i32) -> (i32, i32) {
    %c0_i32 = arith.constant 0 : i32
    %c0_i32_0 = arith.constant 0 : i32
    %c0_i32_1 = arith.constant 0 : i32
    return %c0_i32, %c0_i32_0 : i32, i32
  }
  func.func @transform_2(%arg0: i32) -> (i32, i32) {
    %c0_i32 = arith.constant 0 : i32
    %c0_i32_0 = arith.constant 0 : i32
    %c0_i32_1 = arith.constant 0 : i32
    return %c0_i32, %c0_i32_0 : i32, i32
  }
  func.func @transform_3(%arg0: i32) -> (i32, i32) {
    %c0_i32 = arith.constant 0 : i32
    %c0_i32_0 = arith.constant 0 : i32
    return %arg0, %c0_i32 : i32, i32
  }
}

</mosaic_0001>

<bundles_post_ra>
// kernel: tpu_custom_call.1
= control target key start
LH: loop header
LB: loop body
LE: loop exit
PB: predicated region body
PF: predicated region fallthrough
CT: control target
= control target key end

     0   :  { %8 = vsyncpa [#allocation3], 0  ;;  %s4104_s0 = inlined_call_operand.hbm [shape: f32[2,12800], index: 0, kind: input, shape index: {}]   ;;  %s4105_s1 = inlined_call_operand.hbm [shape: f32[12800,128], index: 1, kind: input, shape index: {}]   ;;  %s4106_s2 = inlined_call_operand.hbm [shape: f32[1,128], index: 2, kind: input, shape index: {}]   ;;  %s4107_s3 = inlined_call_operand.hbm [shape: f32[2,128], index: 3, kind: output, shape index: {}]  }
   0x1   :  { %9 = vsyncpa [#allocation6], 0  ;;  %s26_s14 = sshll.u32 %s4105_s1, 4  ;;  %s27_s14 = int_to_ptr.hbm [resolvable:$true] %s26_s14 }
   0x2   :  { %10 = vsyncpa [#allocation4], 0  ;;  %s4066_s15 = smov [#allocation5]   ;;  %s16_s19 = sshll.u32 %s4104_s0, 4  ;;  %s17_s19 = int_to_ptr.hbm [resolvable:$true] %s16_s19 }
   0x3   :  { %s28_s16 = sshll.u32 %s4066_s15, 4  ;;  %s4067_s20 = smov 128   ;;  %s29_s16 = int_to_ptr.vmem [resolvable:$true] %s28_s16 }
   0x4   :  { %s4068_s21 = smov 8   ;;  %s4069_s22 = smov [#allocation2]  }
   0x5   :  { %34 = dma.hbm_to_vmem [thread:$0]  %s27_s14, 204800, %s29_s16, [#allocation6], %s4067_s20, %s4067_s20, %s4068_s21  }
   0x6   :  { %s18_s23 = sshll.u32 %s4069_s22, 4  ;;  %s40_s26 = sshll.u32 %s4106_s2, 4  ;;  %s19_s23 = int_to_ptr.vmem [resolvable:$true] %s18_s23  ;;  %s41_s26 = int_to_ptr.hbm [resolvable:$true] %s40_s26 }
   0x7   :  { %21 = dma.hbm_to_vmem [thread:$0]  %s17_s19, 3200, %s19_s23, [#allocation3]  }
   0x8   :  { %s4070_s1 = smov [#allocation7]  }
   0x9   :  { %s42_s27 = sshll.u32 %s4070_s1, 4  ;;  %s43_s27 = int_to_ptr.vmem [resolvable:$true] %s42_s27 }
   0xa   :  { %45 = dma.hbm_to_vmem [thread:$0]  %s41_s26, 16, %s43_s27, [#allocation6]  }
   0xb   :  { %4060 = dma.done.wait [#allocation3], 3200  }
   0xc   :  { %4061 = vsyncadd [#allocation3], 4294964096 }
   0xd   :  { %4062 = dma.done.wait [#allocation6], 204816  }
   0xe   :  { %4063 = vsyncadd [#allocation6], 4294762480  ;;  %v98_v0 = vld [vmem:[#allocation5 + $0x78] sm:$0xff]  ;;  %v97_v2 = vld [vmem:[#allocation5 + $0x70] sm:$0xff]  ;;  %s4071_s0 = smov [#allocation8]   ;;  %s3946_s30 = sshll.u32 %s4107_s3, 4  ;;  %s3947_s30 = int_to_ptr.hbm [resolvable:$true] %s3946_s30 }
   0xf   :  { %v130_v1 = vld [vmem:[#allocation5 + $0x178] sm:$0xff]  ;;  %1938 = vmatpush.msra.mxu0 %v98_v0  ;;  %v129_v4 = vld [vmem:[#allocation5 + $0x170] sm:$0xff]  ;;  %v96_v6 = vld [vmem:[#allocation5 + $0x68] sm:$0xff]  ;;  %s3944_s2 = sshll.u32 %s4071_s0, 4  ;;  %s3945_s2 = int_to_ptr.vmem [resolvable:$true] %s3944_s2 }
  0x10   :  { %1978 = vmatpush.msra.mxu2 %v130_v1  ;;  %v114_v3 = vld [vmem:[#allocation5 + $0xf8] sm:$0xff]  ;;  %v113_v7 = vld [vmem:[#allocation5 + $0xf0] sm:$0xff]  ;;  %v128_v8 = vld [vmem:[#allocation5 + $0x168] sm:$0xff] }
  0x11   :  { %v146_v5 = vld [vmem:[#allocation5 + $0x1f8] sm:$0xff]  ;;  %1958 = vmatpush.msra.mxu1 %v114_v3  ;;  %1939 = vmatpush.msra.mxu0 %v97_v2  ;;  %v145_v9 = vld [vmem:[#allocation5 + $0x1f0] sm:$0xff]  ;;  %v112_v10 = vld [vmem:[#allocation5 + $0xe8] sm:$0xff] }
  0x12   :  { %1998 = vmatpush.msra.mxu3 %v146_v5  ;;  %1979 = vmatpush.msra.mxu2 %v129_v4  ;;  %v95_v11 = vld [vmem:[#allocation5 + $0x60] sm:$0xff]  ;;  %v144_v13 = vld [vmem:[#allocation5 + $0x1e8] sm:$0xff]  ;;  %v94_v16 = vld [vmem:[#allocation5 + $0x58] sm:$0xff] }
  0x13   :  { %1959 = vmatpush.msra.mxu1 %v113_v7  ;;  %v127_v12 = vld [vmem:[#allocation5 + $0x160] sm:$0xff]  ;;  %1940 = vmatpush.msra.mxu0 %v96_v6  ;;  %v126_v17 = vld [vmem:[#allocation5 + $0x158] sm:$0xff]  ;;  %v93_v20 = vld [vmem:[#allocation5 + $0x50] sm:$0xff] }
  0x14   :  { %1999 = vmatpush.msra.mxu3 %v145_v9  ;;  %1980 = vmatpush.msra.mxu2 %v128_v8  ;;  %v111_v14 = vld [vmem:[#allocation5 + $0xe0] sm:$0xff]  ;;  %v110_v18 = vld [vmem:[#allocation5 + $0xd8] sm:$0xff]  ;;  %v125_v21 = vld [vmem:[#allocation5 + $0x150] sm:$0xff] }
  0x15   :  { %v143_v15 = vld [vmem:[#allocation5 + $0x1e0] sm:$0xff]  ;;  %1960 = vmatpush.msra.mxu1 %v112_v10  ;;  %1941 = vmatpush.msra.mxu0 %v95_v11  ;;  %v142_v19 = vld [vmem:[#allocation5 + $0x1d8] sm:$0xff]  ;;  %v109_v22 = vld [vmem:[#allocation5 + $0xd0] sm:$0xff] }
  0x16   :  { %2000 = vmatpush.msra.mxu3 %v144_v13  ;;  %1981 = vmatpush.msra.mxu2 %v127_v12  ;;  %v141_v23 = vld [vmem:[#allocation5 + $0x1d0] sm:$0xff]  ;;  %v92_v24 = vld [vmem:[#allocation5 + $0x48] sm:$0xff]  ;;  %v91_v28 = vld [vmem:[#allocation5 + $0x40] sm:$0xff] }
  0x17   :  { %1961 = vmatpush.msra.mxu1 %v111_v14  ;;  %1942 = vmatpush.msra.mxu0 %v94_v16  ;;  %v124_v25 = vld [vmem:[#allocation5 + $0x148] sm:$0xff]  ;;  %v123_v29 = vld [vmem:[#allocation5 + $0x140] sm:$0xff]  ;;  %v90_v32 = vld [vmem:[#allocation5 + $0x38] sm:$0xff] }
  0x18   :  { %2001 = vmatpush.msra.mxu3 %v143_v15  ;;  %1982 = vmatpush.msra.mxu2 %v126_v17  ;;  %v108_v26 = vld [vmem:[#allocation5 + $0xc8] sm:$0xff]  ;;  %v107_v30 = vld [vmem:[#allocation5 + $0xc0] sm:$0xff]  ;;  %v122_v33 = vld [vmem:[#allocation5 + $0x138] sm:$0xff] }
  0x19   :  { %1962 = vmatpush.msra.mxu1 %v110_v18  ;;  %1943 = vmatpush.msra.mxu0 %v93_v20  ;;  %v140_v27 = vld [vmem:[#allocation5 + $0x1c8] sm:$0xff]  ;;  %v139_v31 = vld [vmem:[#allocation5 + $0x1c0] sm:$0xff]  ;;  %v106_v34 = vld [vmem:[#allocation5 + $0xb8] sm:$0xff] }
  0x1a   :  { %2002 = vmatpush.msra.mxu3 %v142_v19  ;;  %1983 = vmatpush.msra.mxu2 %v125_v21  ;;  %v138_v35 = vld [vmem:[#allocation5 + $0x1b8] sm:$0xff]  ;;  %v89_v36 = vld [vmem:[#allocation5 + $0x30] sm:$0xff]  ;;  %v88_v40 = vld [vmem:[#allocation5 + $0x28] sm:$0xff] }
  0x1b   :  { %1963 = vmatpush.msra.mxu1 %v109_v22  ;;  %1944 = vmatpush.msra.mxu0 %v92_v24  ;;  %v121_v37 = vld [vmem:[#allocation5 + $0x130] sm:$0xff]  ;;  %v120_v41 = vld [vmem:[#allocation5 + $0x128] sm:$0xff]  ;;  %v87_v44 = vld [vmem:[#allocation5 + $0x20] sm:$0xff] }
  0x1c   :  { %2003 = vmatpush.msra.mxu3 %v141_v23  ;;  %1984 = vmatpush.msra.mxu2 %v124_v25  ;;  %v105_v38 = vld [vmem:[#allocation5 + $0xb0] sm:$0xff]  ;;  %v104_v42 = vld [vmem:[#allocation5 + $0xa8] sm:$0xff]  ;;  %v119_v45 = vld [vmem:[#allocation5 + $0x120] sm:$0xff] }
  0x1d   :  { %1964 = vmatpush.msra.mxu1 %v108_v26  ;;  %1945 = vmatpush.msra.mxu0 %v91_v28  ;;  %v137_v39 = vld [vmem:[#allocation5 + $0x1b0] sm:$0xff]  ;;  %v136_v43 = vld [vmem:[#allocation5 + $0x1a8] sm:$0xff]  ;;  %v103_v46 = vld [vmem:[#allocation5 + $0xa0] sm:$0xff] }
  0x1e   :  { %2004 = vmatpush.msra.mxu3 %v140_v27  ;;  %1985 = vmatpush.msra.mxu2 %v123_v29  ;;  %v135_v47 = vld [vmem:[#allocation5 + $0x1a0] sm:$0xff]  ;;  %v86_v48 = vld [vmem:[#allocation5 + $0x18] sm:$0xff]  ;;  %v85_v52 = vld [vmem:[#allocation5 + $0x10] sm:$0xff] }
  0x1f   :  { %1965 = vmatpush.msra.mxu1 %v107_v30  ;;  %1946 = vmatpush.msra.mxu0 %v90_v32  ;;  %v118_v49 = vld [vmem:[#allocation5 + $0x118] sm:$0xff]  ;;  %v117_v53 = vld [vmem:[#allocation5 + $0x110] sm:$0xff]  ;;  %v84_v56 = vld [vmem:[#allocation5 + $0x8] sm:$0xff] }
  0x20   :  { %2005 = vmatpush.msra.mxu3 %v139_v31  ;;  %1986 = vmatpush.msra.mxu2 %v122_v33  ;;  %v102_v50 = vld [vmem:[#allocation5 + $0x98] sm:$0xff]  ;;  %v101_v54 = vld [vmem:[#allocation5 + $0x90] sm:$0xff]  ;;  %v116_v57 = vld [vmem:[#allocation5 + $0x108] sm:$0xff] }
  0x21   :  { %1966 = vmatpush.msra.mxu1 %v106_v34  ;;  %1947 = vmatpush.msra.mxu0 %v89_v36  ;;  %v134_v51 = vld [vmem:[#allocation5 + $0x198] sm:$0xff]  ;;  %v133_v55 = vld [vmem:[#allocation5 + $0x190] sm:$0xff]  ;;  %v100_v58 = vld [vmem:[#allocation5 + $0x88] sm:$0xff] }
  0x22   :  { %2006 = vmatpush.msra.mxu3 %v138_v35  ;;  %1987 = vmatpush.msra.mxu2 %v121_v37  ;;  %v132_v59 = vld [vmem:[#allocation5 + $0x188] sm:$0xff]  ;;  %v83_v60 = vld [vmem:[#allocation5] sm:$0xff]  ;;  %v162_v62 = vld [vmem:[#allocation5 + $0x278] sm:$0xff] }
  0x23   :  { %1967 = vmatpush.msra.mxu1 %v105_v38  ;;  %1948 = vmatpush.msra.mxu0 %v88_v40  ;;  %v115_v61 = vld [vmem:[#allocation5 + $0x100] sm:$0xff]  ;;  %v194_v63 = vld [vmem:[#allocation5 + $0x378] sm:$0xff]  ;;  %v161_v2 = vld [vmem:[#allocation5 + $0x270] sm:$0xff] }
  0x24   :  { %2007 = vmatpush.msra.mxu3 %v137_v39  ;;  %1988 = vmatpush.msra.mxu2 %v120_v41  ;;  %v99_v0 = vld [vmem:[#allocation5 + $0x80] sm:$0xff]  ;;  %v178_v3 = vld [vmem:[#allocation5 + $0x2f8] sm:$0xff]  ;;  %v193_v4 = vld [vmem:[#allocation5 + $0x370] sm:$0xff] }
  0x25   :  { %1968 = vmatpush.msra.mxu1 %v104_v42  ;;  %1949 = vmatpush.msra.mxu0 %v87_v44  ;;  %v131_v1 = vld [vmem:[#allocation5 + $0x180] sm:$0xff]  ;;  %v210_v5 = vld [vmem:[#allocation5 + $0x3f8] sm:$0xff]  ;;  %v160_v6 = vld [vmem:[#allocation5 + $0x268] sm:$0xff] }
  0x26   :  { %2008 = vmatpush.msra.mxu3 %v136_v43  ;;  %1989 = vmatpush.msra.mxu2 %v119_v45  ;;  %v177_v7 = vld [vmem:[#allocation5 + $0x2f0] sm:$0xff]  ;;  %v192_v8 = vld [vmem:[#allocation5 + $0x368] sm:$0xff]  ;;  %v159_v10 = vld [vmem:[#allocation5 + $0x260] sm:$0xff] }
  0x27   :  { %1969 = vmatpush.msra.mxu1 %v103_v46  ;;  %1950 = vmatpush.msra.mxu0 %v86_v48  ;;  %v209_v9 = vld [vmem:[#allocation5 + $0x3f0] sm:$0xff]  ;;  %v176_v11 = vld [vmem:[#allocation5 + $0x2e8] sm:$0xff]  ;;  %v191_v12 = vld [vmem:[#allocation5 + $0x360] sm:$0xff] }
  0x28   :  { %2009 = vmatpush.msra.mxu3 %v135_v47  ;;  %1990 = vmatpush.msra.mxu2 %v118_v49  ;;  %v208_v13 = vld [vmem:[#allocation5 + $0x3e8] sm:$0xff]  ;;  %v158_v14 = vld [vmem:[#allocation5 + $0x258] sm:$0xff]  ;;  %v175_v15 = vld [vmem:[#allocation5 + $0x2e0] sm:$0xff] }
  0x29   :  { %1970 = vmatpush.msra.mxu1 %v102_v50  ;;  %1951 = vmatpush.msra.mxu0 %v85_v52  ;;  %v190_v16 = vld [vmem:[#allocation5 + $0x358] sm:$0xff]  ;;  %v207_v17 = vld [vmem:[#allocation5 + $0x3e0] sm:$0xff]  ;;  %v157_v18 = vld [vmem:[#allocation5 + $0x250] sm:$0xff] }
  0x2a   :  { %2010 = vmatpush.msra.mxu3 %v134_v51  ;;  %1991 = vmatpush.msra.mxu2 %v117_v53  ;;  %v174_v19 = vld [vmem:[#allocation5 + $0x2d8] sm:$0xff]  ;;  %v189_v20 = vld [vmem:[#allocation5 + $0x350] sm:$0xff]  ;;  %v156_v22 = vld [vmem:[#allocation5 + $0x248] sm:$0xff] }
  0x2b   :  { %1971 = vmatpush.msra.mxu1 %v101_v54  ;;  %1952 = vmatpush.msra.mxu0 %v84_v56  ;;  %v206_v21 = vld [vmem:[#allocation5 + $0x3d8] sm:$0xff]  ;;  %v173_v23 = vld [vmem:[#allocation5 + $0x2d0] sm:$0xff]  ;;  %v188_v24 = vld [vmem:[#allocation5 + $0x348] sm:$0xff] }
  0x2c   :  { %2011 = vmatpush.msra.mxu3 %v133_v55  ;;  %1992 = vmatpush.msra.mxu2 %v116_v57  ;;  %v205_v25 = vld [vmem:[#allocation5 + $0x3d0] sm:$0xff]  ;;  %v58_v26 = vld [vmem:[#allocation2] sm:$0xff]  ;;  %v155_v27 = vld [vmem:[#allocation5 + $0x240] sm:$0xff] }
  0x2d   :  { %1972 = vmatpush.msra.mxu1 %v100_v58  ;;  %1953 = vmatpush.msra.mxu0 %v83_v60  ;;  %v172_v28 = vld [vmem:[#allocation5 + $0x2c8] sm:$0xff]  ;;  %1712 = vst [vmem:[#allocation1] ss:$4 sm:$0xff] %v58_v26  ;;  %v187_v29 = vld [vmem:[#allocation5 + $0x340] sm:$0xff]  ;;  %v154_v31 = vld [vmem:[#allocation5 + $0x238] sm:$0xff] }
  0x2e   :  { %2012 = vmatpush.msra.mxu3 %v132_v59  ;;  %1993 = vmatpush.msra.mxu2 %v115_v61  ;;  %v204_v30 = vld [vmem:[#allocation5 + $0x3c8] sm:$0xff]  ;;  %v171_v32 = vld [vmem:[#allocation5 + $0x2c0] sm:$0xff]  ;;  %v186_v33 = vld [vmem:[#allocation5 + $0x338] sm:$0xff] }
  0x2f   :  { %2018 = vmatpush.msrb.mxu0 %v162_v62  ;;  %1973 = vmatpush.msra.mxu1 %v99_v0  ;;  %v203_v34 = vld [vmem:[#allocation5 + $0x3c0] sm:$0xff]  ;;  %v153_v35 = vld [vmem:[#allocation5 + $0x230] sm:$0xff]  ;;  %v170_v36 = vld [vmem:[#allocation5 + $0x2b8] sm:$0xff] }
  0x30   :  { %2058 = vmatpush.msrb.mxu2 %v194_v63  ;;  %2013 = vmatpush.msra.mxu3 %v131_v1  ;;  %v59_v37 = vld [vmem:[#allocation2 + $0x8] sm:$0xff]  ;;  %v185_v38 = vld [vmem:[#allocation5 + $0x330] sm:$0xff]  ;;  %v202_v39 = vld [vmem:[#allocation5 + $0x3b8] sm:$0xff] }
  0x31   :  { %2019 = vmatpush.msrb.mxu0 %v161_v2  ;;  %2038 = vmatpush.msrb.mxu1 %v178_v3  ;;  %1714 = vst [vmem:[#allocation1 + $0x20] ss:$4 sm:$0xff] %v59_v37  ;;  %v152_v40 = vld [vmem:[#allocation5 + $0x228] sm:$0xff]  ;;  %v169_v41 = vld [vmem:[#allocation5 + $0x2b0] sm:$0xff]  ;;  %v151_v44 = vld [vmem:[#allocation5 + $0x220] sm:$0xff] }
  0x32   :  { %2059 = vmatpush.msrb.mxu2 %v193_v4  ;;  %2078 = vmatpush.msrb.mxu3 %v210_v5  ;;  %v184_v42 = vld [vmem:[#allocation5 + $0x328] sm:$0xff]  ;;  %v201_v43 = vld [vmem:[#allocation5 + $0x3b0] sm:$0xff]  ;;  %v183_v46 = vld [vmem:[#allocation5 + $0x320] sm:$0xff] }
  0x33   :  { %2020 = vmatpush.msrb.mxu0 %v160_v6  ;;  %2039 = vmatpush.msrb.mxu1 %v177_v7  ;;  %v168_v45 = vld [vmem:[#allocation5 + $0x2a8] sm:$0xff]  ;;  %v150_v48 = vld [vmem:[#allocation5 + $0x218] sm:$0xff]  ;;  %v167_v49 = vld [vmem:[#allocation5 + $0x2a0] sm:$0xff] }
  0x34   :  { %2060 = vmatpush.msrb.mxu2 %v192_v8  ;;  %2079 = vmatpush.msrb.mxu3 %v209_v9  ;;  %v200_v47 = vld [vmem:[#allocation5 + $0x3a8] sm:$0xff]  ;;  %v182_v50 = vld [vmem:[#allocation5 + $0x318] sm:$0xff]  ;;  %v199_v51 = vld [vmem:[#allocation5 + $0x3a0] sm:$0xff] }
  0x35   :  { %2021 = vmatpush.msrb.mxu0 %v159_v10  ;;  %2040 = vmatpush.msrb.mxu1 %v176_v11  ;;  %v149_v52 = vld [vmem:[#allocation5 + $0x210] sm:$0xff]  ;;  %v166_v53 = vld [vmem:[#allocation5 + $0x298] sm:$0xff]  ;;  %v148_v56 = vld [vmem:[#allocation5 + $0x208] sm:$0xff] }
  0x36   :  { %2061 = vmatpush.msrb.mxu2 %v191_v12  ;;  %2080 = vmatpush.msrb.mxu3 %v208_v13  ;;  %v181_v54 = vld [vmem:[#allocation5 + $0x310] sm:$0xff]  ;;  %v198_v55 = vld [vmem:[#allocation5 + $0x398] sm:$0xff]  ;;  %v180_v58 = vld [vmem:[#allocation5 + $0x308] sm:$0xff] }
  0x37   :  { %2022 = vmatpush.msrb.mxu0 %v158_v14  ;;  %2041 = vmatpush.msrb.mxu1 %v175_v15  ;;  %v165_v57 = vld [vmem:[#allocation5 + $0x290] sm:$0xff]  ;;  %v147_v60 = vld [vmem:[#allocation5 + $0x200] sm:$0xff]  ;;  %v164_v61 = vld [vmem:[#allocation5 + $0x288] sm:$0xff] }
  0x38   :  { %2062 = vmatpush.msrb.mxu2 %v190_v16  ;;  %2081 = vmatpush.msrb.mxu3 %v207_v17  ;;  %v197_v59 = vld [vmem:[#allocation5 + $0x390] sm:$0xff]  ;;  %v179_v62 = vld [vmem:[#allocation5 + $0x300] sm:$0xff]  ;;  %v196_v63 = vld [vmem:[#allocation5 + $0x388] sm:$0xff] }
  0x39   :  { %2023 = vmatpush.msrb.mxu0 %v157_v18  ;;  %2042 = vmatpush.msrb.mxu1 %v174_v19  ;;  %v1715_v0 = vld.sshfl [vmem:[#allocation1] sm:$0xff pattern:$0x73625140]  ;;  %v1717_v1 = vld.sshfl [vmem:[#allocation1 + $0x10] sm:$0xff pattern:$0x73625140] }
  0x3a   :  { %2063 = vmatpush.msrb.mxu2 %v189_v20  ;;  %2082 = vmatpush.msrb.mxu3 %v206_v21  ;;  %v226_v2 = vld [vmem:[#allocation5 + $0x478] sm:$0xff]  ;;  %v163_v4 = vld [vmem:[#allocation5 + $0x280] sm:$0xff]  ;;  %v1718_v7 = vld.sshfl [vmem:[#allocation1 + $0x18] sm:$0xff pattern:$0x73625140] }
  0x3b   :  { %2024 = vmatpush.msrb.mxu0 %v156_v22  ;;  %2043 = vmatpush.msrb.mxu1 %v173_v23  ;;  %v258_v3 = vld [vmem:[#allocation5 + $0x578] sm:$0xff]  ;;  %v195_v5 = vld [vmem:[#allocation5 + $0x380] sm:$0xff]  ;;  %v225_v8 = vld [vmem:[#allocation5 + $0x470] sm:$0xff] }
  0x3c   :  { %2064 = vmatpush.msrb.mxu2 %v188_v24  ;;  %2083 = vmatpush.msrb.mxu3 %v205_v25  ;;  %v1716_v6 = vld.sshfl [vmem:[#allocation1 + $0x8] sm:$0xff pattern:$0x73625140]  ;;  %v257_v10 = vld [vmem:[#allocation5 + $0x570] sm:$0xff]  ;;  %v224_v12 = vld [vmem:[#allocation5 + $0x468] sm:$0xff] }
  0x3d   :  { %2025 = vmatpush.msrb.mxu0 %v155_v27  ;;  %2044 = vmatpush.msrb.mxu1 %v172_v28  ;;  %v242_v9 = vld [vmem:[#allocation5 + $0x4f8] sm:$0xff]  ;;  %v241_v13 = vld [vmem:[#allocation5 + $0x4f0] sm:$0xff]  ;;  %v256_v14 = vld [vmem:[#allocation5 + $0x568] sm:$0xff] }
  0x3e   :  { %2065 = vmatpush.msrb.mxu2 %v187_v29  ;;  %2084 = vmatpush.msrb.mxu3 %v204_v30  ;;  %v274_v11 = vld [vmem:[#allocation5 + $0x5f8] sm:$0xff]  ;;  %v273_v15 = vld [vmem:[#allocation5 + $0x5f0] sm:$0xff]  ;;  %v60_v16 = vld [vmem:[#allocation2 + $0x10] sm:$0xff] }
  0x3f   :  { %2026 = vmatpush.msrb.mxu0 %v154_v31  ;;  %2045 = vmatpush.msrb.mxu1 %v171_v32  ;;  %v223_v17 = vld [vmem:[#allocation5 + $0x460] sm:$0xff]  ;;  %v240_v18 = vld [vmem:[#allocation5 + $0x4e8] sm:$0xff]  ;;  %1723 = vst [vmem:[#allocation1] ss:$4 sm:$0xff] %v60_v16  ;;  %v222_v22 = vld [vmem:[#allocation5 + $0x458] sm:$0xff] }
  0x40   :  { %2066 = vmatpush.msrb.mxu2 %v186_v33  ;;  %2085 = vmatpush.msrb.mxu3 %v203_v34  ;;  %v255_v19 = vld [vmem:[#allocation5 + $0x560] sm:$0xff]  ;;  %v272_v20 = vld [vmem:[#allocation5 + $0x5e8] sm:$0xff]  ;;  %v254_v24 = vld [vmem:[#allocation5 + $0x558] sm:$0xff] }
  0x41   :  { %2027 = vmatpush.msrb.mxu0 %v153_v35  ;;  %2046 = vmatpush.msrb.mxu1 %v170_v36  ;;  %v1721_v21 = vld.sshfl [vmem:[#allocation1 + $0x30] sm:$0xff pattern:$0x73625140]  ;;  %v1719_v26 = vld.sshfl [vmem:[#allocation1 + $0x20] sm:$0xff pattern:$0x73625140] }
  0x42   :  { %2067 = vmatpush.msrb.mxu2 %v185_v38  ;;  %2086 = vmatpush.msrb.mxu3 %v202_v39  ;;  %v239_v23 = vld [vmem:[#allocation5 + $0x4e0] sm:$0xff]  ;;  %v1722_v27 = vld.sshfl [vmem:[#allocation1 + $0x38] sm:$0xff pattern:$0x73625140]  ;;  %v221_v28 = vld [vmem:[#allocation5 + $0x450] sm:$0xff] }
  0x43   :  { %2028 = vmatpush.msrb.mxu0 %v152_v40  ;;  %2047 = vmatpush.msrb.mxu1 %v169_v41  ;;  %v271_v25 = vld [vmem:[#allocation5 + $0x5e0] sm:$0xff]  ;;  %v238_v29 = vld [vmem:[#allocation5 + $0x4d8] sm:$0xff]  ;;  %v253_v30 = vld [vmem:[#allocation5 + $0x550] sm:$0xff] }
  0x44   :  { %2068 = vmatpush.msrb.mxu2 %v184_v42  ;;  %2087 = vmatpush.msrb.mxu3 %v201_v43  ;;  %v270_v31 = vld [vmem:[#allocation5 + $0x5d8] sm:$0xff]  ;;  %v220_v33 = vld [vmem:[#allocation5 + $0x448] sm:$0xff]  ;;  %v237_v34 = vld [vmem:[#allocation5 + $0x4d0] sm:$0xff] }
  0x45   :  { %2029 = vmatpush.msrb.mxu0 %v151_v44  ;;  %2048 = vmatpush.msrb.mxu1 %v168_v45  ;;  %v1720_v32 = vld.sshfl [vmem:[#allocation1 + $0x28] sm:$0xff pattern:$0x73625140]  ;;  %v252_v35 = vld [vmem:[#allocation5 + $0x548] sm:$0xff]  ;;  %v269_v36 = vld [vmem:[#allocation5 + $0x5d0] sm:$0xff] }
  0x46   :  { %2069 = vmatpush.msrb.mxu2 %v183_v46  ;;  %2088 = vmatpush.msrb.mxu3 %v200_v47  ;;  %v219_v37 = vld [vmem:[#allocation5 + $0x440] sm:$0xff]  ;;  %v236_v38 = vld [vmem:[#allocation5 + $0x4c8] sm:$0xff]  ;;  %v218_v41 = vld [vmem:[#allocation5 + $0x438] sm:$0xff] }
  0x47   :  { %2030 = vmatpush.msrb.mxu0 %v150_v48  ;;  %2049 = vmatpush.msrb.mxu1 %v167_v49  ;;  %v251_v39 = vld [vmem:[#allocation5 + $0x540] sm:$0xff]  ;;  %v268_v40 = vld [vmem:[#allocation5 + $0x5c8] sm:$0xff]  ;;  %v250_v43 = vld [vmem:[#allocation5 + $0x538] sm:$0xff] }
  0x48   :  { %2070 = vmatpush.msrb.mxu2 %v182_v50  ;;  %2089 = vmatpush.msrb.mxu3 %v199_v51  ;;  %v235_v42 = vld [vmem:[#allocation5 + $0x4c0] sm:$0xff]  ;;  %v217_v45 = vld [vmem:[#allocation5 + $0x430] sm:$0xff]  ;;  %v234_v46 = vld [vmem:[#allocation5 + $0x4b8] sm:$0xff] }
  0x49   :  { %2031 = vmatpush.msrb.mxu0 %v149_v52  ;;  %2050 = vmatpush.msrb.mxu1 %v166_v53  ;;  %v267_v44 = vld [vmem:[#allocation5 + $0x5c0] sm:$0xff]  ;;  %v249_v47 = vld [vmem:[#allocation5 + $0x530] sm:$0xff]  ;;  %v266_v48 = vld [vmem:[#allocation5 + $0x5b8] sm:$0xff] }
  0x4a   :  { %2071 = vmatpush.msrb.mxu2 %v181_v54  ;;  %2090 = vmatpush.msrb.mxu3 %v198_v55  ;;  %v216_v49 = vld [vmem:[#allocation5 + $0x428] sm:$0xff]  ;;  %v233_v50 = vld [vmem:[#allocation5 + $0x4b0] sm:$0xff]  ;;  %v215_v53 = vld [vmem:[#allocation5 + $0x420] sm:$0xff] }
  0x4b   :  { %2032 = vmatpush.msrb.mxu0 %v148_v56  ;;  %2051 = vmatpush.msrb.mxu1 %v165_v57  ;;  %v248_v51 = vld [vmem:[#allocation5 + $0x528] sm:$0xff]  ;;  %v265_v52 = vld [vmem:[#allocation5 + $0x5b0] sm:$0xff]  ;;  %v247_v55 = vld [vmem:[#allocation5 + $0x520] sm:$0xff] }
  0x4c   :  { %2072 = vmatpush.msrb.mxu2 %v180_v58  ;;  %2091 = vmatpush.msrb.mxu3 %v197_v59  ;;  %v232_v54 = vld [vmem:[#allocation5 + $0x4a8] sm:$0xff]  ;;  %v214_v57 = vld [vmem:[#allocation5 + $0x418] sm:$0xff]  ;;  %v231_v58 = vld [vmem:[#allocation5 + $0x4a0] sm:$0xff] }
  0x4d   :  { %2033 = vmatpush.msrb.mxu0 %v147_v60  ;;  %2052 = vmatpush.msrb.mxu1 %v164_v61  ;;  %v264_v56 = vld [vmem:[#allocation5 + $0x5a8] sm:$0xff]  ;;  %v246_v59 = vld [vmem:[#allocation5 + $0x518] sm:$0xff]  ;;  %v263_v60 = vld [vmem:[#allocation5 + $0x5a0] sm:$0xff] }
  0x4e   :  { %2073 = vmatpush.msrb.mxu2 %v179_v62  ;;  %2092 = vmatpush.msrb.mxu3 %v196_v63  ;;  %v213_v61 = vld [vmem:[#allocation5 + $0x410] sm:$0xff]  ;;  %v230_v62 = vld [vmem:[#allocation5 + $0x498] sm:$0xff] }
  0x4f   :  { %1954 = vmatmul.f32.vlgmr.msra.gmra.mxu0 %v1715_v0  ;;  %1994 = vmatmul.f32.vlgmr.msra.gmra.mxu2 %v1717_v1  ;;  %v245_v63 = vld [vmem:[#allocation5 + $0x510] sm:$0xff]  ;;  %v262_v0 = vld [vmem:[#allocation5 + $0x598] sm:$0xff]  ;;  %v212_v1 = vld [vmem:[#allocation5 + $0x408] sm:$0xff] }
  0x50   :  { %2098 = vmatpush.msra.mxu0 %v226_v2  ;;  %2138 = vmatpush.msra.mxu2 %v258_v3  ;;  %v229_v2 = vld [vmem:[#allocation5 + $0x490] sm:$0xff]  ;;  %v1726_v16 = vld.sshfl [vmem:[#allocation1 + $0x8] sm:$0xff pattern:$0x73625140] }
  0x51   :  { %2053 = vmatpush.msrb.mxu1 %v163_v4  ;;  %2093 = vmatpush.msrb.mxu3 %v195_v5  ;;  %v61_v3 = vld [vmem:[#allocation2 + $0x18] sm:$0xff]  ;;  %v244_v4 = vld [vmem:[#allocation5 + $0x508] sm:$0xff] }
  0x52   :  { %1974 = vmatmul.f32.vlgmr.msra.gmra.mxu1 %v1716_v6  ;;  %2014 = vmatmul.f32.vlgmr.msra.gmra.mxu3 %v1718_v7  ;;  %v261_v5 = vld [vmem:[#allocation5 + $0x590] sm:$0xff]  ;;  %1724 = vst [vmem:[#allocation1 + $0x20] ss:$4 sm:$0xff] %v61_v3  ;;  %v211_v6 = vld [vmem:[#allocation5 + $0x400] sm:$0xff]  ;;  %v228_v7 = vld [vmem:[#allocation5 + $0x488] sm:$0xff] }
  0x53   :  { %2099 = vmatpush.msra.mxu0 %v225_v8  ;;  %2118 = vmatpush.msra.mxu1 %v242_v9  ;;  %v243_v8 = vld [vmem:[#allocation5 + $0x500] sm:$0xff]  ;;  %v260_v9 = vld [vmem:[#allocation5 + $0x588] sm:$0xff]  ;;  %v294_v3 = vld [vmem:[#allocation5 + $0x698] sm:$0xff] }
  0x54   :  { %2139 = vmatpush.msra.mxu2 %v257_v10  ;;  %2158 = vmatpush.msra.mxu3 %v274_v11  ;;  %v1725_v10 = vld.sshfl [vmem:[#allocation1] sm:$0xff pattern:$0x73625140]  ;;  %v1727_v11 = vld.sshfl [vmem:[#allocation1 + $0x10] sm:$0xff pattern:$0x73625140] }
  0x55   :  { %2100 = vmatpush.msra.mxu0 %v224_v12  ;;  %2119 = vmatpush.msra.mxu1 %v241_v13  ;;  %v290_v12 = vld [vmem:[#allocation5 + $0x678] sm:$0xff] }
  0x56   :  { %2140 = vmatpush.msra.mxu2 %v256_v14  ;;  %2159 = vmatpush.msra.mxu3 %v273_v15  ;;  %v322_v13 = vld [vmem:[#allocation5 + $0x778] sm:$0xff]  ;;  %v227_v14 = vld [vmem:[#allocation5 + $0x480] sm:$0xff] }
  0x57   :  { %2101 = vmatpush.msra.mxu0 %v223_v17  ;;  %2120 = vmatpush.msra.mxu1 %v240_v18  ;;  %v259_v15 = vld [vmem:[#allocation5 + $0x580] sm:$0xff]  ;;  %v1728_v17 = vld.sshfl [vmem:[#allocation1 + $0x18] sm:$0xff pattern:$0x73625140]  ;;  %v289_v18 = vld [vmem:[#allocation5 + $0x670] sm:$0xff] }
  0x58   :  { %2141 = vmatpush.msra.mxu2 %v255_v19  ;;  %2160 = vmatpush.msra.mxu3 %v272_v20  ;;  %v306_v19 = vld [vmem:[#allocation5 + $0x6f8] sm:$0xff]  ;;  %v321_v20 = vld [vmem:[#allocation5 + $0x770] sm:$0xff] }
  0x59   :  { %2074 = vmatmul.f32.vlgmr.msrb.gmra.mxu2 %v1721_v21  ;;  %2102 = vmatpush.msra.mxu0 %v222_v22  ;;  %v338_v21 = vld [vmem:[#allocation5 + $0x7f8] sm:$0xff]  ;;  %v288_v22 = vld [vmem:[#allocation5 + $0x668] sm:$0xff] }
  0x5a   :  { %2121 = vmatpush.msra.mxu1 %v239_v23  ;;  %2142 = vmatpush.msra.mxu2 %v254_v24  ;;  %v305_v23 = vld [vmem:[#allocation5 + $0x6f0] sm:$0xff]  ;;  %v320_v24 = vld [vmem:[#allocation5 + $0x768] sm:$0xff] }
  0x5b   :  { %2161 = vmatpush.msra.mxu3 %v271_v25  ;;  %2034 = vmatmul.f32.vlgmr.msrb.gmra.mxu0 %v1719_v26  ;;  %v337_v25 = vld [vmem:[#allocation5 + $0x7f0] sm:$0xff]  ;;  %v287_v26 = vld [vmem:[#allocation5 + $0x660] sm:$0xff] }
  0x5c   :  { %2094 = vmatmul.f32.vlgmr.msrb.gmra.mxu3 %v1722_v27  ;;  %2103 = vmatpush.msra.mxu0 %v221_v28  ;;  %v304_v27 = vld [vmem:[#allocation5 + $0x6e8] sm:$0xff]  ;;  %v319_v28 = vld [vmem:[#allocation5 + $0x760] sm:$0xff] }
  0x5d   :  { %2122 = vmatpush.msra.mxu1 %v238_v29  ;;  %2143 = vmatpush.msra.mxu2 %v253_v30  ;;  %v336_v29 = vld [vmem:[#allocation5 + $0x7e8] sm:$0xff]  ;;  %v286_v30 = vld [vmem:[#allocation5 + $0x658] sm:$0xff] }
  0x5e   :  { %2162 = vmatpush.msra.mxu3 %v270_v31  ;;  %2054 = vmatmul.f32.vlgmr.msrb.gmra.mxu1 %v1720_v32  ;;  %v303_v31 = vld [vmem:[#allocation5 + $0x6e0] sm:$0xff]  ;;  %v318_v32 = vld [vmem:[#allocation5 + $0x758] sm:$0xff] }
  0x5f   :  { %2104 = vmatpush.msra.mxu0 %v220_v33  ;;  %2123 = vmatpush.msra.mxu1 %v237_v34  ;;  %v335_v33 = vld [vmem:[#allocation5 + $0x7e0] sm:$0xff]  ;;  %v285_v34 = vld [vmem:[#allocation5 + $0x650] sm:$0xff] }
  0x60   :  { %2144 = vmatpush.msra.mxu2 %v252_v35  ;;  %2163 = vmatpush.msra.mxu3 %v269_v36  ;;  %v302_v35 = vld [vmem:[#allocation5 + $0x6d8] sm:$0xff]  ;;  %v317_v36 = vld [vmem:[#allocation5 + $0x750] sm:$0xff] }
  0x61   :  { %2105 = vmatpush.msra.mxu0 %v219_v37  ;;  %2124 = vmatpush.msra.mxu1 %v236_v38  ;;  %v334_v37 = vld [vmem:[#allocation5 + $0x7d8] sm:$0xff]  ;;  %v284_v38 = vld [vmem:[#allocation5 + $0x648] sm:$0xff] }
  0x62   :  { %2145 = vmatpush.msra.mxu2 %v251_v39  ;;  %2164 = vmatpush.msra.mxu3 %v268_v40  ;;  %v301_v39 = vld [vmem:[#allocation5 + $0x6d0] sm:$0xff]  ;;  %v316_v40 = vld [vmem:[#allocation5 + $0x748] sm:$0xff] }
  0x63   :  { %2106 = vmatpush.msra.mxu0 %v218_v41  ;;  %2125 = vmatpush.msra.mxu1 %v235_v42  ;;  %v333_v41 = vld [vmem:[#allocation5 + $0x7d0] sm:$0xff]  ;;  %v283_v42 = vld [vmem:[#allocation5 + $0x640] sm:$0xff] }
  0x64   :  { %2146 = vmatpush.msra.mxu2 %v250_v43  ;;  %2165 = vmatpush.msra.mxu3 %v267_v44  ;;  %v300_v43 = vld [vmem:[#allocation5 + $0x6c8] sm:$0xff]  ;;  %v315_v44 = vld [vmem:[#allocation5 + $0x740] sm:$0xff] }
  0x65   :  { %2107 = vmatpush.msra.mxu0 %v217_v45  ;;  %2126 = vmatpush.msra.mxu1 %v234_v46  ;;  %v332_v45 = vld [vmem:[#allocation5 + $0x7c8] sm:$0xff]  ;;  %v282_v46 = vld [vmem:[#allocation5 + $0x638] sm:$0xff] }
  0x66   :  { %2147 = vmatpush.msra.mxu2 %v249_v47  ;;  %2166 = vmatpush.msra.mxu3 %v266_v48  ;;  %v299_v47 = vld [vmem:[#allocation5 + $0x6c0] sm:$0xff]  ;;  %v314_v48 = vld [vmem:[#allocation5 + $0x738] sm:$0xff] }
  0x67   :  { %2108 = vmatpush.msra.mxu0 %v216_v49  ;;  %2127 = vmatpush.msra.mxu1 %v233_v50  ;;  %v331_v49 = vld [vmem:[#allocation5 + $0x7c0] sm:$0xff]  ;;  %v281_v50 = vld [vmem:[#allocation5 + $0x630] sm:$0xff] }
  0x68   :  { %2148 = vmatpush.msra.mxu2 %v248_v51  ;;  %2167 = vmatpush.msra.mxu3 %v265_v52  ;;  %v298_v51 = vld [vmem:[#allocation5 + $0x6b8] sm:$0xff]  ;;  %v313_v52 = vld [vmem:[#allocation5 + $0x730] sm:$0xff] }
  0x69   :  { %2109 = vmatpush.msra.mxu0 %v215_v53  ;;  %2128 = vmatpush.msra.mxu1 %v232_v54  ;;  %v330_v53 = vld [vmem:[#allocation5 + $0x7b8] sm:$0xff]  ;;  %v280_v54 = vld [vmem:[#allocation5 + $0x628] sm:$0xff] }
  0x6a   :  { %2149 = vmatpush.msra.mxu2 %v247_v55  ;;  %2168 = vmatpush.msra.mxu3 %v264_v56  ;;  %v297_v55 = vld [vmem:[#allocation5 + $0x6b0] sm:$0xff]  ;;  %v312_v56 = vld [vmem:[#allocation5 + $0x728] sm:$0xff] }
  0x6b   :  { %2110 = vmatpush.msra.mxu0 %v214_v57  ;;  %2129 = vmatpush.msra.mxu1 %v231_v58  ;;  %v329_v57 = vld [vmem:[#allocation5 + $0x7b0] sm:$0xff]  ;;  %v279_v58 = vld [vmem:[#allocation5 + $0x620] sm:$0xff] }
  0x6c   :  { %2150 = vmatpush.msra.mxu2 %v246_v59  ;;  %2169 = vmatpush.msra.mxu3 %v263_v60  ;;  %v296_v59 = vld [vmem:[#allocation5 + $0x6a8] sm:$0xff]  ;;  %v311_v60 = vld [vmem:[#allocation5 + $0x720] sm:$0xff] }
  0x6d   :  { %2111 = vmatpush.msra.mxu0 %v213_v61  ;;  %2130 = vmatpush.msra.mxu1 %v230_v62  ;;  %v328_v61 = vld [vmem:[#allocation5 + $0x7a8] sm:$0xff]  ;;  %v278_v62 = vld [vmem:[#allocation5 + $0x618] sm:$0xff] }
  0x6e   :  { %2151 = vmatpush.msra.mxu2 %v245_v63  ;;  %2170 = vmatpush.msra.mxu3 %v262_v0  ;;  %v295_v63 = vld [vmem:[#allocation5 + $0x6a0] sm:$0xff]  ;;  %v310_v0 = vld [vmem:[#allocation5 + $0x718] sm:$0xff] }
  0x6f   :  { %2112 = vmatpush.msra.mxu0 %v212_v1  ;;  %2131 = vmatpush.msra.mxu1 %v229_v2  ;;  %v327_v1 = vld [vmem:[#allocation5 + $0x7a0] sm:$0xff]  ;;  %v277_v2 = vld [vmem:[#allocation5 + $0x610] sm:$0xff] }
  0x70   :  { %2152 = vmatpush.msra.mxu2 %v244_v4  ;;  %2171 = vmatpush.msra.mxu3 %v261_v5  ;;  %v309_v4 = vld [vmem:[#allocation5 + $0x710] sm:$0xff]  ;;  %v326_v5 = vld [vmem:[#allocation5 + $0x798] sm:$0xff] }
  0x71   :  { %2113 = vmatpush.msra.mxu0 %v211_v6  ;;  %2132 = vmatpush.msra.mxu1 %v228_v7  ;;  %v276_v6 = vld [vmem:[#allocation5 + $0x608] sm:$0xff]  ;;  %v293_v7 = vld [vmem:[#allocation5 + $0x690] sm:$0xff] }
  0x72   :  { %2153 = vmatpush.msra.mxu2 %v243_v8  ;;  %2172 = vmatpush.msra.mxu3 %v260_v9  ;;  %v62_v8 = vld [vmem:[#allocation2 + $0x20] sm:$0xff]  ;;  %v308_v9 = vld [vmem:[#allocation5 + $0x708] sm:$0xff] }
  0x73   :  { %2114 = vmatmul.f32.vlgmr.msra.gmra.mxu0 %v1725_v10  ;;  %2154 = vmatmul.f32.vlgmr.msra.gmra.mxu2 %v1727_v11  ;;  %v325_v10 = vld [vmem:[#allocation5 + $0x790] sm:$0xff]  ;;  %1733 = vst [vmem:[#allocation1] ss:$4 sm:$0xff] %v62_v8  ;;  %v275_v11 = vld [vmem:[#allocation5 + $0x600] sm:$0xff]  ;;  %v358_v8 = vld [vmem:[#allocation5 + $0x898] sm:$0xff] }
  0x74   :  { %2178 = vmatpush.msrb.mxu0 %v290_v12  ;;  %2218 = vmatpush.msrb.mxu2 %v322_v13  ;;  %v292_v12 = vld [vmem:[#allocation5 + $0x688] sm:$0xff]  ;;  %v307_v13 = vld [vmem:[#allocation5 + $0x700] sm:$0xff] }
  0x75   :  { %2133 = vmatpush.msra.mxu1 %v227_v14  ;;  %2173 = vmatpush.msra.mxu3 %v259_v15  ;;  %v324_v14 = vld [vmem:[#allocation5 + $0x788] sm:$0xff]  ;;  %v1729_v15 = vld.sshfl [vmem:[#allocation1 + $0x20] sm:$0xff pattern:$0x73625140] }
  0x76   :  { %2134 = vmatmul.f32.vlgmr.msra.gmra.mxu1 %v1726_v16  ;;  %2174 = vmatmul.f32.vlgmr.msra.gmra.mxu3 %v1728_v17  ;;  %v1731_v16 = vld.sshfl [vmem:[#allocation1 + $0x30] sm:$0xff pattern:$0x73625140]  ;;  %v354_v17 = vld [vmem:[#allocation5 + $0x878] sm:$0xff] }
  0x77   :  { %2179 = vmatpush.msrb.mxu0 %v289_v18  ;;  %2198 = vmatpush.msrb.mxu1 %v306_v19  ;;  %v386_v18 = vld [vmem:[#allocation5 + $0x978] sm:$0xff]  ;;  %v291_v19 = vld [vmem:[#allocation5 + $0x680] sm:$0xff] }
  0x78   :  { %2219 = vmatpush.msrb.mxu2 %v321_v20  ;;  %2238 = vmatpush.msrb.mxu3 %v338_v21  ;;  %v323_v20 = vld [vmem:[#allocation5 + $0x780] sm:$0xff]  ;;  %v1730_v21 = vld.sshfl [vmem:[#allocation1 + $0x28] sm:$0xff pattern:$0x73625140] }
  0x79   :  { %2180 = vmatpush.msrb.mxu0 %v288_v22  ;;  %2199 = vmatpush.msrb.mxu1 %v305_v23  ;;  %v1732_v22 = vld.sshfl [vmem:[#allocation1 + $0x38] sm:$0xff pattern:$0x73625140]  ;;  %v353_v23 = vld [vmem:[#allocation5 + $0x870] sm:$0xff] }
  0x7a   :  { %2220 = vmatpush.msrb.mxu2 %v320_v24  ;;  %2239 = vmatpush.msrb.mxu3 %v337_v25  ;;  %v370_v24 = vld [vmem:[#allocation5 + $0x8f8] sm:$0xff]  ;;  %v385_v25 = vld [vmem:[#allocation5 + $0x970] sm:$0xff] }
  0x7b   :  { %2181 = vmatpush.msrb.mxu0 %v287_v26  ;;  %2200 = vmatpush.msrb.mxu1 %v304_v27  ;;  %v402_v26 = vld [vmem:[#allocation5 + $0x9f8] sm:$0xff]  ;;  %v352_v27 = vld [vmem:[#allocation5 + $0x868] sm:$0xff] }
  0x7c   :  { %2221 = vmatpush.msrb.mxu2 %v319_v28  ;;  %2240 = vmatpush.msrb.mxu3 %v336_v29  ;;  %v369_v28 = vld [vmem:[#allocation5 + $0x8f0] sm:$0xff]  ;;  %v384_v29 = vld [vmem:[#allocation5 + $0x968] sm:$0xff] }
  0x7d   :  { %2182 = vmatpush.msrb.mxu0 %v286_v30  ;;  %2201 = vmatpush.msrb.mxu1 %v303_v31  ;;  %v401_v30 = vld [vmem:[#allocation5 + $0x9f0] sm:$0xff]  ;;  %v351_v31 = vld [vmem:[#allocation5 + $0x860] sm:$0xff] }
  0x7e   :  { %2222 = vmatpush.msrb.mxu2 %v318_v32  ;;  %2241 = vmatpush.msrb.mxu3 %v335_v33  ;;  %v368_v32 = vld [vmem:[#allocation5 + $0x8e8] sm:$0xff]  ;;  %v383_v33 = vld [vmem:[#allocation5 + $0x960] sm:$0xff] }
  0x7f   :  { %2183 = vmatpush.msrb.mxu0 %v285_v34  ;;  %2202 = vmatpush.msrb.mxu1 %v302_v35  ;;  %v400_v34 = vld [vmem:[#allocation5 + $0x9e8] sm:$0xff]  ;;  %v350_v35 = vld [vmem:[#allocation5 + $0x858] sm:$0xff] }
  0x80   :  { %2223 = vmatpush.msrb.mxu2 %v317_v36  ;;  %2242 = vmatpush.msrb.mxu3 %v334_v37  ;;  %v367_v36 = vld [vmem:[#allocation5 + $0x8e0] sm:$0xff]  ;;  %v382_v37 = vld [vmem:[#allocation5 + $0x958] sm:$0xff] }
  0x81   :  { %2184 = vmatpush.msrb.mxu0 %v284_v38  ;;  %2203 = vmatpush.msrb.mxu1 %v301_v39  ;;  %v399_v38 = vld [vmem:[#allocation5 + $0x9e0] sm:$0xff]  ;;  %v349_v39 = vld [vmem:[#allocation5 + $0x850] sm:$0xff] }
  0x82   :  { %2224 = vmatpush.msrb.mxu2 %v316_v40  ;;  %2243 = vmatpush.msrb.mxu3 %v333_v41  ;;  %v366_v40 = vld [vmem:[#allocation5 + $0x8d8] sm:$0xff]  ;;  %v381_v41 = vld [vmem:[#allocation5 + $0x950] sm:$0xff] }
  0x83   :  { %2185 = vmatpush.msrb.mxu0 %v283_v42  ;;  %2204 = vmatpush.msrb.mxu1 %v300_v43  ;;  %v398_v42 = vld [vmem:[#allocation5 + $0x9d8] sm:$0xff]  ;;  %v348_v43 = vld [vmem:[#allocation5 + $0x848] sm:$0xff] }
  0x84   :  { %2225 = vmatpush.msrb.mxu2 %v315_v44  ;;  %2244 = vmatpush.msrb.mxu3 %v332_v45  ;;  %v365_v44 = vld [vmem:[#allocation5 + $0x8d0] sm:$0xff]  ;;  %v380_v45 = vld [vmem:[#allocation5 + $0x948] sm:$0xff] }
  0x85   :  { %2186 = vmatpush.msrb.mxu0 %v282_v46  ;;  %2205 = vmatpush.msrb.mxu1 %v299_v47  ;;  %v397_v46 = vld [vmem:[#allocation5 + $0x9d0] sm:$0xff]  ;;  %v347_v47 = vld [vmem:[#allocation5 + $0x840] sm:$0xff] }
  0x86   :  { %2226 = vmatpush.msrb.mxu2 %v314_v48  ;;  %2245 = vmatpush.msrb.mxu3 %v331_v49  ;;  %v364_v48 = vld [vmem:[#allocation5 + $0x8c8] sm:$0xff]  ;;  %v379_v49 = vld [vmem:[#allocation5 + $0x940] sm:$0xff] }
  0x87   :  { %2187 = vmatpush.msrb.mxu0 %v281_v50  ;;  %2206 = vmatpush.msrb.mxu1 %v298_v51  ;;  %v396_v50 = vld [vmem:[#allocation5 + $0x9c8] sm:$0xff]  ;;  %v346_v51 = vld [vmem:[#allocation5 + $0x838] sm:$0xff] }
  0x88   :  { %2227 = vmatpush.msrb.mxu2 %v313_v52  ;;  %2246 = vmatpush.msrb.mxu3 %v330_v53  ;;  %v363_v52 = vld [vmem:[#allocation5 + $0x8c0] sm:$0xff]  ;;  %v378_v53 = vld [vmem:[#allocation5 + $0x938] sm:$0xff] }
  0x89   :  { %2188 = vmatpush.msrb.mxu0 %v280_v54  ;;  %2207 = vmatpush.msrb.mxu1 %v297_v55  ;;  %v395_v54 = vld [vmem:[#allocation5 + $0x9c0] sm:$0xff]  ;;  %v345_v55 = vld [vmem:[#allocation5 + $0x830] sm:$0xff] }
  0x8a   :  { %2228 = vmatpush.msrb.mxu2 %v312_v56  ;;  %2247 = vmatpush.msrb.mxu3 %v329_v57  ;;  %v362_v56 = vld [vmem:[#allocation5 + $0x8b8] sm:$0xff]  ;;  %v377_v57 = vld [vmem:[#allocation5 + $0x930] sm:$0xff] }
  0x8b   :  { %2189 = vmatpush.msrb.mxu0 %v279_v58  ;;  %2208 = vmatpush.msrb.mxu1 %v296_v59  ;;  %v394_v58 = vld [vmem:[#allocation5 + $0x9b8] sm:$0xff]  ;;  %v344_v59 = vld [vmem:[#allocation5 + $0x828] sm:$0xff] }
  0x8c   :  { %2229 = vmatpush.msrb.mxu2 %v311_v60  ;;  %2248 = vmatpush.msrb.mxu3 %v328_v61  ;;  %v361_v60 = vld [vmem:[#allocation5 + $0x8b0] sm:$0xff]  ;;  %v376_v61 = vld [vmem:[#allocation5 + $0x928] sm:$0xff] }
  0x8d   :  { %2190 = vmatpush.msrb.mxu0 %v278_v62  ;;  %2209 = vmatpush.msrb.mxu1 %v295_v63  ;;  %v393_v62 = vld [vmem:[#allocation5 + $0x9b0] sm:$0xff]  ;;  %v343_v63 = vld [vmem:[#allocation5 + $0x820] sm:$0xff] }
  0x8e   :  { %2230 = vmatpush.msrb.mxu2 %v310_v0  ;;  %2249 = vmatpush.msrb.mxu3 %v327_v1  ;;  %v360_v0 = vld [vmem:[#allocation5 + $0x8a8] sm:$0xff]  ;;  %v375_v1 = vld [vmem:[#allocation5 + $0x920] sm:$0xff] }
  0x8f   :  { %2191 = vmatpush.msrb.mxu0 %v277_v2  ;;  %2210 = vmatpush.msrb.mxu1 %v294_v3  ;;  %v392_v2 = vld [vmem:[#allocation5 + $0x9a8] sm:$0xff]  ;;  %v342_v3 = vld [vmem:[#allocation5 + $0x818] sm:$0xff] }
  0x90   :  { %2231 = vmatpush.msrb.mxu2 %v309_v4  ;;  %2250 = vmatpush.msrb.mxu3 %v326_v5  ;;  %v359_v4 = vld [vmem:[#allocation5 + $0x8a0] sm:$0xff]  ;;  %v374_v5 = vld [vmem:[#allocation5 + $0x918] sm:$0xff] }
  0x91   :  { %2192 = vmatpush.msrb.mxu0 %v276_v6  ;;  %2211 = vmatpush.msrb.mxu1 %v293_v7  ;;  %v391_v6 = vld [vmem:[#allocation5 + $0x9a0] sm:$0xff]  ;;  %v341_v7 = vld [vmem:[#allocation5 + $0x810] sm:$0xff] }
  0x92   :  { %2232 = vmatpush.msrb.mxu2 %v308_v9  ;;  %2251 = vmatpush.msrb.mxu3 %v325_v10  ;;  %v373_v9 = vld [vmem:[#allocation5 + $0x910] sm:$0xff]  ;;  %v390_v10 = vld [vmem:[#allocation5 + $0x998] sm:$0xff] }
  0x93   :  { %2193 = vmatpush.msrb.mxu0 %v275_v11  ;;  %2212 = vmatpush.msrb.mxu1 %v292_v12  ;;  %v340_v11 = vld [vmem:[#allocation5 + $0x808] sm:$0xff]  ;;  %v357_v12 = vld [vmem:[#allocation5 + $0x890] sm:$0xff] }
  0x94   :  { %2233 = vmatpush.msrb.mxu2 %v307_v13  ;;  %2252 = vmatpush.msrb.mxu3 %v324_v14  ;;  %v63_v13 = vld [vmem:[#allocation2 + $0x28] sm:$0xff]  ;;  %v372_v14 = vld [vmem:[#allocation5 + $0x908] sm:$0xff] }
  0x95   :  { %2194 = vmatmul.f32.vlgmr.msrb.gmra.mxu0 %v1729_v15  ;;  %2234 = vmatmul.f32.vlgmr.msrb.gmra.mxu2 %v1731_v16  ;;  %v389_v15 = vld [vmem:[#allocation5 + $0x990] sm:$0xff]  ;;  %1734 = vst [vmem:[#allocation1 + $0x20] ss:$4 sm:$0xff] %v63_v13  ;;  %v339_v16 = vld [vmem:[#allocation5 + $0x800] sm:$0xff]  ;;  %v422_v13 = vld [vmem:[#allocation5 + $0xa98] sm:$0xff] }
  0x96   :  { %2258 = vmatpush.msra.mxu0 %v354_v17  ;;  %2298 = vmatpush.msra.mxu2 %v386_v18  ;;  %v356_v17 = vld [vmem:[#allocation5 + $0x888] sm:$0xff]  ;;  %v371_v18 = vld [vmem:[#allocation5 + $0x900] sm:$0xff] }
  0x97   :  { %2213 = vmatpush.msrb.mxu1 %v291_v19  ;;  %2253 = vmatpush.msrb.mxu3 %v323_v20  ;;  %v388_v19 = vld [vmem:[#allocation5 + $0x988] sm:$0xff]  ;;  %v1735_v20 = vld.sshfl [vmem:[#allocation1] sm:$0xff pattern:$0x73625140] }
  0x98   :  { %2214 = vmatmul.f32.vlgmr.msrb.gmra.mxu1 %v1730_v21  ;;  %2254 = vmatmul.f32.vlgmr.msrb.gmra.mxu3 %v1732_v22  ;;  %v1737_v21 = vld.sshfl [vmem:[#allocation1 + $0x10] sm:$0xff pattern:$0x73625140]  ;;  %v418_v22 = vld [vmem:[#allocation5 + $0xa78] sm:$0xff] }
  0x99   :  { %2259 = vmatpush.msra.mxu0 %v353_v23  ;;  %2278 = vmatpush.msra.mxu1 %v370_v24  ;;  %v450_v23 = vld [vmem:[#allocation5 + $0xb78] sm:$0xff]  ;;  %v355_v24 = vld [vmem:[#allocation5 + $0x880] sm:$0xff] }
  0x9a   :  { %2299 = vmatpush.msra.mxu2 %v385_v25  ;;  %2318 = vmatpush.msra.mxu3 %v402_v26  ;;  %v387_v25 = vld [vmem:[#allocation5 + $0x980] sm:$0xff]  ;;  %v1736_v26 = vld.sshfl [vmem:[#allocation1 + $0x8] sm:$0xff pattern:$0x73625140] }
  0x9b   :  { %2260 = vmatpush.msra.mxu0 %v352_v27  ;;  %2279 = vmatpush.msra.mxu1 %v369_v28  ;;  %v1738_v27 = vld.sshfl [vmem:[#allocation1 + $0x18] sm:$0xff pattern:$0x73625140]  ;;  %v417_v28 = vld [vmem:[#allocation5 + $0xa70] sm:$0xff] }
  0x9c   :  { %2300 = vmatpush.msra.mxu2 %v384_v29  ;;  %2319 = vmatpush.msra.mxu3 %v401_v30  ;;  %v434_v29 = vld [vmem:[#allocation5 + $0xaf8] sm:$0xff]  ;;  %v449_v30 = vld [vmem:[#allocation5 + $0xb70] sm:$0xff] }
  0x9d   :  { %2261 = vmatpush.msra.mxu0 %v351_v31  ;;  %2280 = vmatpush.msra.mxu1 %v368_v32  ;;  %v466_v31 = vld [vmem:[#allocation5 + $0xbf8] sm:$0xff]  ;;  %v416_v32 = vld [vmem:[#allocation5 + $0xa68] sm:$0xff] }
  0x9e   :  { %2301 = vmatpush.msra.mxu2 %v383_v33  ;;  %2320 = vmatpush.msra.mxu3 %v400_v34  ;;  %v433_v33 = vld [vmem:[#allocation5 + $0xaf0] sm:$0xff]  ;;  %v448_v34 = vld [vmem:[#allocation5 + $0xb68] sm:$0xff] }
  0x9f   :  { %2262 = vmatpush.msra.mxu0 %v350_v35  ;;  %2281 = vmatpush.msra.mxu1 %v367_v36  ;;  %v465_v35 = vld [vmem:[#allocation5 + $0xbf0] sm:$0xff]  ;;  %v415_v36 = vld [vmem:[#allocation5 + $0xa60] sm:$0xff] }
  0xa0   :  { %2302 = vmatpush.msra.mxu2 %v382_v37  ;;  %2321 = vmatpush.msra.mxu3 %v399_v38  ;;  %v432_v37 = vld [vmem:[#allocation5 + $0xae8] sm:$0xff]  ;;  %v447_v38 = vld [vmem:[#allocation5 + $0xb60] sm:$0xff] }
  0xa1   :  { %2263 = vmatpush.msra.mxu0 %v349_v39  ;;  %2282 = vmatpush.msra.mxu1 %v366_v40  ;;  %v464_v39 = vld [vmem:[#allocation5 + $0xbe8] sm:$0xff]  ;;  %v414_v40 = vld [vmem:[#allocation5 + $0xa58] sm:$0xff] }
  0xa2   :  { %2303 = vmatpush.msra.mxu2 %v381_v41  ;;  %2322 = vmatpush.msra.mxu3 %v398_v42  ;;  %v431_v41 = vld [vmem:[#allocation5 + $0xae0] sm:$0xff]  ;;  %v446_v42 = vld [vmem:[#allocation5 + $0xb58] sm:$0xff] }
  0xa3   :  { %2264 = vmatpush.msra.mxu0 %v348_v43  ;;  %2283 = vmatpush.msra.mxu1 %v365_v44  ;;  %v463_v43 = vld [vmem:[#allocation5 + $0xbe0] sm:$0xff]  ;;  %v413_v44 = vld [vmem:[#allocation5 + $0xa50] sm:$0xff] }
  0xa4   :  { %2304 = vmatpush.msra.mxu2 %v380_v45  ;;  %2323 = vmatpush.msra.mxu3 %v397_v46  ;;  %v430_v45 = vld [vmem:[#allocation5 + $0xad8] sm:$0xff]  ;;  %v445_v46 = vld [vmem:[#allocation5 + $0xb50] sm:$0xff] }
  0xa5   :  { %2265 = vmatpush.msra.mxu0 %v347_v47  ;;  %2284 = vmatpush.msra.mxu1 %v364_v48  ;;  %v462_v47 = vld [vmem:[#allocation5 + $0xbd8] sm:$0xff]  ;;  %v412_v48 = vld [vmem:[#allocation5 + $0xa48] sm:$0xff] }
  0xa6   :  { %2305 = vmatpush.msra.mxu2 %v379_v49  ;;  %2324 = vmatpush.msra.mxu3 %v396_v50  ;;  %v429_v49 = vld [vmem:[#allocation5 + $0xad0] sm:$0xff]  ;;  %v444_v50 = vld [vmem:[#allocation5 + $0xb48] sm:$0xff] }
  0xa7   :  { %2266 = vmatpush.msra.mxu0 %v346_v51  ;;  %2285 = vmatpush.msra.mxu1 %v363_v52  ;;  %v461_v51 = vld [vmem:[#allocation5 + $0xbd0] sm:$0xff]  ;;  %v411_v52 = vld [vmem:[#allocation5 + $0xa40] sm:$0xff] }
  0xa8   :  { %2306 = vmatpush.msra.mxu2 %v378_v53  ;;  %2325 = vmatpush.msra.mxu3 %v395_v54  ;;  %v428_v53 = vld [vmem:[#allocation5 + $0xac8] sm:$0xff]  ;;  %v443_v54 = vld [vmem:[#allocation5 + $0xb40] sm:$0xff] }
  0xa9   :  { %2267 = vmatpush.msra.mxu0 %v345_v55  ;;  %2286 = vmatpush.msra.mxu1 %v362_v56  ;;  %v460_v55 = vld [vmem:[#allocation5 + $0xbc8] sm:$0xff]  ;;  %v410_v56 = vld [vmem:[#allocation5 + $0xa38] sm:$0xff] }
  0xaa   :  { %2307 = vmatpush.msra.mxu2 %v377_v57  ;;  %2326 = vmatpush.msra.mxu3 %v394_v58  ;;  %v427_v57 = vld [vmem:[#allocation5 + $0xac0] sm:$0xff]  ;;  %v442_v58 = vld [vmem:[#allocation5 + $0xb38] sm:$0xff] }
  0xab   :  { %2268 = vmatpush.msra.mxu0 %v344_v59  ;;  %2287 = vmatpush.msra.mxu1 %v361_v60  ;;  %v459_v59 = vld [vmem:[#allocation5 + $0xbc0] sm:$0xff]  ;;  %v409_v60 = vld [vmem:[#allocation5 + $0xa30] sm:$0xff] }
  0xac   :  { %2308 = vmatpush.msra.mxu2 %v376_v61  ;;  %2327 = vmatpush.msra.mxu3 %v393_v62  ;;  %v426_v61 = vld [vmem:[#allocation5 + $0xab8] sm:$0xff]  ;;  %v441_v62 = vld [vmem:[#allocation5 + $0xb30] sm:$0xff] }
  0xad   :  { %2269 = vmatpush.msra.mxu0 %v343_v63  ;;  %2288 = vmatpush.msra.mxu1 %v360_v0  ;;  %v458_v63 = vld [vmem:[#allocation5 + $0xbb8] sm:$0xff]  ;;  %v408_v0 = vld [vmem:[#allocation5 + $0xa28] sm:$0xff] }
  0xae   :  { %2309 = vmatpush.msra.mxu2 %v375_v1  ;;  %2328 = vmatpush.msra.mxu3 %v392_v2  ;;  %v425_v1 = vld [vmem:[#allocation5 + $0xab0] sm:$0xff]  ;;  %v440_v2 = vld [vmem:[#allocation5 + $0xb28] sm:$0xff] }
  0xaf   :  { %2270 = vmatpush.msra.mxu0 %v342_v3  ;;  %2289 = vmatpush.msra.mxu1 %v359_v4  ;;  %v457_v3 = vld [vmem:[#allocation5 + $0xbb0] sm:$0xff]  ;;  %v407_v4 = vld [vmem:[#allocation5 + $0xa20] sm:$0xff] }
  0xb0   :  { %2310 = vmatpush.msra.mxu2 %v374_v5  ;;  %2329 = vmatpush.msra.mxu3 %v391_v6  ;;  %v424_v5 = vld [vmem:[#allocation5 + $0xaa8] sm:$0xff]  ;;  %v439_v6 = vld [vmem:[#allocation5 + $0xb20] sm:$0xff] }
  0xb1   :  { %2271 = vmatpush.msra.mxu0 %v341_v7  ;;  %2290 = vmatpush.msra.mxu1 %v358_v8  ;;  %v456_v7 = vld [vmem:[#allocation5 + $0xba8] sm:$0xff]  ;;  %v406_v8 = vld [vmem:[#allocation5 + $0xa18] sm:$0xff] }
  0xb2   :  { %2311 = vmatpush.msra.mxu2 %v373_v9  ;;  %2330 = vmatpush.msra.mxu3 %v390_v10  ;;  %v423_v9 = vld [vmem:[#allocation5 + $0xaa0] sm:$0xff]  ;;  %v438_v10 = vld [vmem:[#allocation5 + $0xb18] sm:$0xff] }
  0xb3   :  { %2272 = vmatpush.msra.mxu0 %v340_v11  ;;  %2291 = vmatpush.msra.mxu1 %v357_v12  ;;  %v455_v11 = vld [vmem:[#allocation5 + $0xba0] sm:$0xff]  ;;  %v405_v12 = vld [vmem:[#allocation5 + $0xa10] sm:$0xff] }
  0xb4   :  { %2312 = vmatpush.msra.mxu2 %v372_v14  ;;  %2331 = vmatpush.msra.mxu3 %v389_v15  ;;  %v437_v14 = vld [vmem:[#allocation5 + $0xb10] sm:$0xff]  ;;  %v454_v15 = vld [vmem:[#allocation5 + $0xb98] sm:$0xff] }
  0xb5   :  { %2273 = vmatpush.msra.mxu0 %v339_v16  ;;  %2292 = vmatpush.msra.mxu1 %v356_v17  ;;  %v404_v16 = vld [vmem:[#allocation5 + $0xa08] sm:$0xff]  ;;  %v421_v17 = vld [vmem:[#allocation5 + $0xa90] sm:$0xff] }
  0xb6   :  { %2313 = vmatpush.msra.mxu2 %v371_v18  ;;  %2332 = vmatpush.msra.mxu3 %v388_v19  ;;  %v64_v18 = vld [vmem:[#allocation2 + $0x30] sm:$0xff] }
  0xb7   :  { %2274 = vmatmul.f32.vlgmr.msra.gmra.mxu0 %v1735_v20  ;;  %2314 = vmatmul.f32.vlgmr.msra.gmra.mxu2 %v1737_v21  ;;  %v436_v19 = vld [vmem:[#allocation5 + $0xb08] sm:$0xff]  ;;  %v453_v20 = vld [vmem:[#allocation5 + $0xb90] sm:$0xff]  ;;  %1743 = vst [vmem:[#allocation1] ss:$4 sm:$0xff] %v64_v18  ;;  %v403_v21 = vld [vmem:[#allocation5 + $0xa00] sm:$0xff] }
  0xb8   :  { %2338 = vmatpush.msrb.mxu0 %v418_v22  ;;  %2378 = vmatpush.msrb.mxu2 %v450_v23  ;;  %v420_v22 = vld [vmem:[#allocation5 + $0xa88] sm:$0xff]  ;;  %v435_v23 = vld [vmem:[#allocation5 + $0xb00] sm:$0xff]  ;;  %v486_v18 = vld [vmem:[#allocation5 + $0xc98] sm:$0xff] }
  0xb9   :  { %2293 = vmatpush.msra.mxu1 %v355_v24  ;;  %2333 = vmatpush.msra.mxu3 %v387_v25  ;;  %v452_v24 = vld [vmem:[#allocation5 + $0xb88] sm:$0xff]  ;;  %v1739_v25 = vld.sshfl [vmem:[#allocation1 + $0x20] sm:$0xff pattern:$0x73625140] }
  0xba   :  { %2294 = vmatmul.f32.vlgmr.msra.gmra.mxu1 %v1736_v26  ;;  %2334 = vmatmul.f32.vlgmr.msra.gmra.mxu3 %v1738_v27  ;;  %v1741_v26 = vld.sshfl [vmem:[#allocation1 + $0x30] sm:$0xff pattern:$0x73625140]  ;;  %v482_v27 = vld [vmem:[#allocation5 + $0xc78] sm:$0xff] }
  0xbb   :  { %2339 = vmatpush.msrb.mxu0 %v417_v28  ;;  %2358 = vmatpush.msrb.mxu1 %v434_v29  ;;  %v514_v28 = vld [vmem:[#allocation5 + $0xd78] sm:$0xff]  ;;  %v419_v29 = vld [vmem:[#allocation5 + $0xa80] sm:$0xff] }
  0xbc   :  { %2379 = vmatpush.msrb.mxu2 %v449_v30  ;;  %2398 = vmatpush.msrb.mxu3 %v466_v31  ;;  %v451_v30 = vld [vmem:[#allocation5 + $0xb80] sm:$0xff]  ;;  %v1740_v31 = vld.sshfl [vmem:[#allocation1 + $0x28] sm:$0xff pattern:$0x73625140] }
  0xbd   :  { %2340 = vmatpush.msrb.mxu0 %v416_v32  ;;  %2359 = vmatpush.msrb.mxu1 %v433_v33  ;;  %v1742_v32 = vld.sshfl [vmem:[#allocation1 + $0x38] sm:$0xff pattern:$0x73625140]  ;;  %v481_v33 = vld [vmem:[#allocation5 + $0xc70] sm:$0xff] }
  0xbe   :  { %2380 = vmatpush.msrb.mxu2 %v448_v34  ;;  %2399 = vmatpush.msrb.mxu3 %v465_v35  ;;  %v498_v34 = vld [vmem:[#allocation5 + $0xcf8] sm:$0xff]  ;;  %v513_v35 = vld [vmem:[#allocation5 + $0xd70] sm:$0xff] }
  0xbf   :  { %2341 = vmatpush.msrb.mxu0 %v415_v36  ;;  %2360 = vmatpush.msrb.mxu1 %v432_v37  ;;  %v530_v36 = vld [vmem:[#allocation5 + $0xdf8] sm:$0xff]  ;;  %v480_v37 = vld [vmem:[#allocation5 + $0xc68] sm:$0xff] }
  0xc0   :  { %2381 = vmatpush.msrb.mxu2 %v447_v38  ;;  %2400 = vmatpush.msrb.mxu3 %v464_v39  ;;  %v497_v38 = vld [vmem:[#allocation5 + $0xcf0] sm:$0xff]  ;;  %v512_v39 = vld [vmem:[#allocation5 + $0xd68] sm:$0xff] }
  0xc1   :  { %2342 = vmatpush.msrb.mxu0 %v414_v40  ;;  %2361 = vmatpush.msrb.mxu1 %v431_v41  ;;  %v529_v40 = vld [vmem:[#allocation5 + $0xdf0] sm:$0xff]  ;;  %v479_v41 = vld [vmem:[#allocation5 + $0xc60] sm:$0xff] }
  0xc2   :  { %2382 = vmatpush.msrb.mxu2 %v446_v42  ;;  %2401 = vmatpush.msrb.mxu3 %v463_v43  ;;  %v496_v42 = vld [vmem:[#allocation5 + $0xce8] sm:$0xff]  ;;  %v511_v43 = vld [vmem:[#allocation5 + $0xd60] sm:$0xff] }
  0xc3   :  { %2343 = vmatpush.msrb.mxu0 %v413_v44  ;;  %2362 = vmatpush.msrb.mxu1 %v430_v45  ;;  %v528_v44 = vld [vmem:[#allocation5 + $0xde8] sm:$0xff]  ;;  %v478_v45 = vld [vmem:[#allocation5 + $0xc58] sm:$0xff] }
  0xc4   :  { %2383 = vmatpush.msrb.mxu2 %v445_v46  ;;  %2402 = vmatpush.msrb.mxu3 %v462_v47  ;;  %v495_v46 = vld [vmem:[#allocation5 + $0xce0] sm:$0xff]  ;;  %v510_v47 = vld [vmem:[#allocation5 + $0xd58] sm:$0xff] }
  0xc5   :  { %2344 = vmatpush.msrb.mxu0 %v412_v48  ;;  %2363 = vmatpush.msrb.mxu1 %v429_v49  ;;  %v527_v48 = vld [vmem:[#allocation5 + $0xde0] sm:$0xff]  ;;  %v477_v49 = vld [vmem:[#allocation5 + $0xc50] sm:$0xff] }
  0xc6   :  { %2384 = vmatpush.msrb.mxu2 %v444_v50  ;;  %2403 = vmatpush.msrb.mxu3 %v461_v51  ;;  %v494_v50 = vld [vmem:[#allocation5 + $0xcd8] sm:$0xff]  ;;  %v509_v51 = vld [vmem:[#allocation5 + $0xd50] sm:$0xff] }
  0xc7   :  { %2345 = vmatpush.msrb.mxu0 %v411_v52  ;;  %2364 = vmatpush.msrb.mxu1 %v428_v53  ;;  %v526_v52 = vld [vmem:[#allocation5 + $0xdd8] sm:$0xff]  ;;  %v476_v53 = vld [vmem:[#allocation5 + $0xc48] sm:$0xff] }
  0xc8   :  { %2385 = vmatpush.msrb.mxu2 %v443_v54  ;;  %2404 = vmatpush.msrb.mxu3 %v460_v55  ;;  %v493_v54 = vld [vmem:[#allocation5 + $0xcd0] sm:$0xff]  ;;  %v508_v55 = vld [vmem:[#allocation5 + $0xd48] sm:$0xff] }
  0xc9   :  { %2346 = vmatpush.msrb.mxu0 %v410_v56  ;;  %2365 = vmatpush.msrb.mxu1 %v427_v57  ;;  %v525_v56 = vld [vmem:[#allocation5 + $0xdd0] sm:$0xff]  ;;  %v475_v57 = vld [vmem:[#allocation5 + $0xc40] sm:$0xff] }
  0xca   :  { %2386 = vmatpush.msrb.mxu2 %v442_v58  ;;  %2405 = vmatpush.msrb.mxu3 %v459_v59  ;;  %v492_v58 = vld [vmem:[#allocation5 + $0xcc8] sm:$0xff]  ;;  %v507_v59 = vld [vmem:[#allocation5 + $0xd40] sm:$0xff] }
  0xcb   :  { %2347 = vmatpush.msrb.mxu0 %v409_v60  ;;  %2366 = vmatpush.msrb.mxu1 %v426_v61  ;;  %v524_v60 = vld [vmem:[#allocation5 + $0xdc8] sm:$0xff]  ;;  %v474_v61 = vld [vmem:[#allocation5 + $0xc38] sm:$0xff] }
  0xcc   :  { %2387 = vmatpush.msrb.mxu2 %v441_v62  ;;  %2406 = vmatpush.msrb.mxu3 %v458_v63  ;;  %v491_v62 = vld [vmem:[#allocation5 + $0xcc0] sm:$0xff]  ;;  %v506_v63 = vld [vmem:[#allocation5 + $0xd38] sm:$0xff] }
  0xcd   :  { %2348 = vmatpush.msrb.mxu0 %v408_v0  ;;  %2367 = vmatpush.msrb.mxu1 %v425_v1  ;;  %v523_v0 = vld [vmem:[#allocation5 + $0xdc0] sm:$0xff]  ;;  %v473_v1 = vld [vmem:[#allocation5 + $0xc30] sm:$0xff] }
  0xce   :  { %2388 = vmatpush.msrb.mxu2 %v440_v2  ;;  %2407 = vmatpush.msrb.mxu3 %v457_v3  ;;  %v490_v2 = vld [vmem:[#allocation5 + $0xcb8] sm:$0xff]  ;;  %v505_v3 = vld [vmem:[#allocation5 + $0xd30] sm:$0xff] }
  0xcf   :  { %2349 = vmatpush.msrb.mxu0 %v407_v4  ;;  %2368 = vmatpush.msrb.mxu1 %v424_v5  ;;  %v522_v4 = vld [vmem:[#allocation5 + $0xdb8] sm:$0xff]  ;;  %v472_v5 = vld [vmem:[#allocation5 + $0xc28] sm:$0xff] }
  0xd0   :  { %2389 = vmatpush.msrb.mxu2 %v439_v6  ;;  %2408 = vmatpush.msrb.mxu3 %v456_v7  ;;  %v489_v6 = vld [vmem:[#allocation5 + $0xcb0] sm:$0xff]  ;;  %v504_v7 = vld [vmem:[#allocation5 + $0xd28] sm:$0xff] }
  0xd1   :  { %2350 = vmatpush.msrb.mxu0 %v406_v8  ;;  %2369 = vmatpush.msrb.mxu1 %v423_v9  ;;  %v521_v8 = vld [vmem:[#allocation5 + $0xdb0] sm:$0xff]  ;;  %v471_v9 = vld [vmem:[#allocation5 + $0xc20] sm:$0xff] }
  0xd2   :  { %2390 = vmatpush.msrb.mxu2 %v438_v10  ;;  %2409 = vmatpush.msrb.mxu3 %v455_v11  ;;  %v488_v10 = vld [vmem:[#allocation5 + $0xca8] sm:$0xff]  ;;  %v503_v11 = vld [vmem:[#allocation5 + $0xd20] sm:$0xff] }
  0xd3   :  { %2351 = vmatpush.msrb.mxu0 %v405_v12  ;;  %2370 = vmatpush.msrb.mxu1 %v422_v13  ;;  %v520_v12 = vld [vmem:[#allocation5 + $0xda8] sm:$0xff]  ;;  %v470_v13 = vld [vmem:[#allocation5 + $0xc18] sm:$0xff] }
  0xd4   :  { %2391 = vmatpush.msrb.mxu2 %v437_v14  ;;  %2410 = vmatpush.msrb.mxu3 %v454_v15  ;;  %v487_v14 = vld [vmem:[#allocation5 + $0xca0] sm:$0xff]  ;;  %v502_v15 = vld [vmem:[#allocation5 + $0xd18] sm:$0xff] }
  0xd5   :  { %2352 = vmatpush.msrb.mxu0 %v404_v16  ;;  %2371 = vmatpush.msrb.mxu1 %v421_v17  ;;  %v519_v16 = vld [vmem:[#allocation5 + $0xda0] sm:$0xff]  ;;  %v469_v17 = vld [vmem:[#allocation5 + $0xc10] sm:$0xff] }
  0xd6   :  { %2392 = vmatpush.msrb.mxu2 %v436_v19  ;;  %2411 = vmatpush.msrb.mxu3 %v453_v20  ;;  %v501_v19 = vld [vmem:[#allocation5 + $0xd10] sm:$0xff]  ;;  %v518_v20 = vld [vmem:[#allocation5 + $0xd98] sm:$0xff] }
  0xd7   :  { %2353 = vmatpush.msrb.mxu0 %v403_v21  ;;  %2372 = vmatpush.msrb.mxu1 %v420_v22  ;;  %v468_v21 = vld [vmem:[#allocation5 + $0xc08] sm:$0xff]  ;;  %v485_v22 = vld [vmem:[#allocation5 + $0xc90] sm:$0xff] }
  0xd8   :  { %2393 = vmatpush.msrb.mxu2 %v435_v23  ;;  %2412 = vmatpush.msrb.mxu3 %v452_v24  ;;  %v65_v23 = vld [vmem:[#allocation2 + $0x38] sm:$0xff]  ;;  %v500_v24 = vld [vmem:[#allocation5 + $0xd08] sm:$0xff] }
  0xd9   :  { %2354 = vmatmul.f32.vlgmr.msrb.gmra.mxu0 %v1739_v25  ;;  %2394 = vmatmul.f32.vlgmr.msrb.gmra.mxu2 %v1741_v26  ;;  %v517_v25 = vld [vmem:[#allocation5 + $0xd90] sm:$0xff]  ;;  %1744 = vst [vmem:[#allocation1 + $0x20] ss:$4 sm:$0xff] %v65_v23  ;;  %v467_v26 = vld [vmem:[#allocation5 + $0xc00] sm:$0xff]  ;;  %v550_v23 = vld [vmem:[#allocation5 + $0xe98] sm:$0xff] }
  0xda   :  { %2418 = vmatpush.msra.mxu0 %v482_v27  ;;  %2458 = vmatpush.msra.mxu2 %v514_v28  ;;  %v484_v27 = vld [vmem:[#allocation5 + $0xc88] sm:$0xff]  ;;  %v499_v28 = vld [vmem:[#allocation5 + $0xd00] sm:$0xff] }
  0xdb   :  { %2373 = vmatpush.msrb.mxu1 %v419_v29  ;;  %2413 = vmatpush.msrb.mxu3 %v451_v30  ;;  %v516_v29 = vld [vmem:[#allocation5 + $0xd88] sm:$0xff]  ;;  %v1745_v30 = vld.sshfl [vmem:[#allocation1] sm:$0xff pattern:$0x73625140] }
  0xdc   :  { %2374 = vmatmul.f32.vlgmr.msrb.gmra.mxu1 %v1740_v31  ;;  %2414 = vmatmul.f32.vlgmr.msrb.gmra.mxu3 %v1742_v32  ;;  %v1747_v31 = vld.sshfl [vmem:[#allocation1 + $0x10] sm:$0xff pattern:$0x73625140]  ;;  %v546_v32 = vld [vmem:[#allocation5 + $0xe78] sm:$0xff] }
  0xdd   :  { %2419 = vmatpush.msra.mxu0 %v481_v33  ;;  %2438 = vmatpush.msra.mxu1 %v498_v34  ;;  %v578_v33 = vld [vmem:[#allocation5 + $0xf78] sm:$0xff]  ;;  %v483_v34 = vld [vmem:[#allocation5 + $0xc80] sm:$0xff] }
  0xde   :  { %2459 = vmatpush.msra.mxu2 %v513_v35  ;;  %2478 = vmatpush.msra.mxu3 %v530_v36  ;;  %v515_v35 = vld [vmem:[#allocation5 + $0xd80] sm:$0xff]  ;;  %v1746_v36 = vld.sshfl [vmem:[#allocation1 + $0x8] sm:$0xff pattern:$0x73625140] }
  0xdf   :  { %2420 = vmatpush.msra.mxu0 %v480_v37  ;;  %2439 = vmatpush.msra.mxu1 %v497_v38  ;;  %v1748_v37 = vld.sshfl [vmem:[#allocation1 + $0x18] sm:$0xff pattern:$0x73625140]  ;;  %v545_v38 = vld [vmem:[#allocation5 + $0xe70] sm:$0xff] }
  0xe0   :  { %2460 = vmatpush.msra.mxu2 %v512_v39  ;;  %2479 = vmatpush.msra.mxu3 %v529_v40  ;;  %v562_v39 = vld [vmem:[#allocation5 + $0xef8] sm:$0xff]  ;;  %v577_v40 = vld [vmem:[#allocation5 + $0xf70] sm:$0xff] }
  0xe1   :  { %2421 = vmatpush.msra.mxu0 %v479_v41  ;;  %2440 = vmatpush.msra.mxu1 %v496_v42  ;;  %v594_v41 = vld [vmem:[#allocation5 + $0xff8] sm:$0xff]  ;;  %v544_v42 = vld [vmem:[#allocation5 + $0xe68] sm:$0xff] }
  0xe2   :  { %2461 = vmatpush.msra.mxu2 %v511_v43  ;;  %2480 = vmatpush.msra.mxu3 %v528_v44  ;;  %v561_v43 = vld [vmem:[#allocation5 + $0xef0] sm:$0xff]  ;;  %v576_v44 = vld [vmem:[#allocation5 + $0xf68] sm:$0xff] }
  0xe3   :  { %2422 = vmatpush.msra.mxu0 %v478_v45  ;;  %2441 = vmatpush.msra.mxu1 %v495_v46  ;;  %v593_v45 = vld [vmem:[#allocation5 + $0xff0] sm:$0xff]  ;;  %v543_v46 = vld [vmem:[#allocation5 + $0xe60] sm:$0xff] }
  0xe4   :  { %2462 = vmatpush.msra.mxu2 %v510_v47  ;;  %2481 = vmatpush.msra.mxu3 %v527_v48  ;;  %v560_v47 = vld [vmem:[#allocation5 + $0xee8] sm:$0xff]  ;;  %v575_v48 = vld [vmem:[#allocation5 + $0xf60] sm:$0xff] }
  0xe5   :  { %2423 = vmatpush.msra.mxu0 %v477_v49  ;;  %2442 = vmatpush.msra.mxu1 %v494_v50  ;;  %v592_v49 = vld [vmem:[#allocation5 + $0xfe8] sm:$0xff]  ;;  %v542_v50 = vld [vmem:[#allocation5 + $0xe58] sm:$0xff] }
  0xe6   :  { %2463 = vmatpush.msra.mxu2 %v509_v51  ;;  %2482 = vmatpush.msra.mxu3 %v526_v52  ;;  %v559_v51 = vld [vmem:[#allocation5 + $0xee0] sm:$0xff]  ;;  %v574_v52 = vld [vmem:[#allocation5 + $0xf58] sm:$0xff] }
  0xe7   :  { %2424 = vmatpush.msra.mxu0 %v476_v53  ;;  %2443 = vmatpush.msra.mxu1 %v493_v54  ;;  %v591_v53 = vld [vmem:[#allocation5 + $0xfe0] sm:$0xff]  ;;  %v541_v54 = vld [vmem:[#allocation5 + $0xe50] sm:$0xff] }
  0xe8   :  { %2464 = vmatpush.msra.mxu2 %v508_v55  ;;  %2483 = vmatpush.msra.mxu3 %v525_v56  ;;  %v558_v55 = vld [vmem:[#allocation5 + $0xed8] sm:$0xff]  ;;  %v573_v56 = vld [vmem:[#allocation5 + $0xf50] sm:$0xff] }
  0xe9   :  { %2425 = vmatpush.msra.mxu0 %v475_v57  ;;  %2444 = vmatpush.msra.mxu1 %v492_v58  ;;  %v590_v57 = vld [vmem:[#allocation5 + $0xfd8] sm:$0xff]  ;;  %v540_v58 = vld [vmem:[#allocation5 + $0xe48] sm:$0xff] }
  0xea   :  { %2465 = vmatpush.msra.mxu2 %v507_v59  ;;  %2484 = vmatpush.msra.mxu3 %v524_v60  ;;  %v557_v59 = vld [vmem:[#allocation5 + $0xed0] sm:$0xff]  ;;  %v572_v60 = vld [vmem:[#allocation5 + $0xf48] sm:$0xff] }
  0xeb   :  { %2426 = vmatpush.msra.mxu0 %v474_v61  ;;  %2445 = vmatpush.msra.mxu1 %v491_v62  ;;  %v589_v61 = vld [vmem:[#allocation5 + $0xfd0] sm:$0xff]  ;;  %v539_v62 = vld [vmem:[#allocation5 + $0xe40] sm:$0xff] }
  0xec   :  { %2466 = vmatpush.msra.mxu2 %v506_v63  ;;  %2485 = vmatpush.msra.mxu3 %v523_v0  ;;  %v556_v63 = vld [vmem:[#allocation5 + $0xec8] sm:$0xff]  ;;  %v571_v0 = vld [vmem:[#allocation5 + $0xf40] sm:$0xff] }
  0xed   :  { %2427 = vmatpush.msra.mxu0 %v473_v1  ;;  %2446 = vmatpush.msra.mxu1 %v490_v2  ;;  %v588_v1 = vld [vmem:[#allocation5 + $0xfc8] sm:$0xff]  ;;  %v538_v2 = vld [vmem:[#allocation5 + $0xe38] sm:$0xff] }
  0xee   :  { %2467 = vmatpush.msra.mxu2 %v505_v3  ;;  %2486 = vmatpush.msra.mxu3 %v522_v4  ;;  %v555_v3 = vld [vmem:[#allocation5 + $0xec0] sm:$0xff]  ;;  %v570_v4 = vld [vmem:[#allocation5 + $0xf38] sm:$0xff] }
  0xef   :  { %2428 = vmatpush.msra.mxu0 %v472_v5  ;;  %2447 = vmatpush.msra.mxu1 %v489_v6  ;;  %v587_v5 = vld [vmem:[#allocation5 + $0xfc0] sm:$0xff]  ;;  %v537_v6 = vld [vmem:[#allocation5 + $0xe30] sm:$0xff] }
  0xf0   :  { %2468 = vmatpush.msra.mxu2 %v504_v7  ;;  %2487 = vmatpush.msra.mxu3 %v521_v8  ;;  %v554_v7 = vld [vmem:[#allocation5 + $0xeb8] sm:$0xff]  ;;  %v569_v8 = vld [vmem:[#allocation5 + $0xf30] sm:$0xff] }
  0xf1   :  { %2429 = vmatpush.msra.mxu0 %v471_v9  ;;  %2448 = vmatpush.msra.mxu1 %v488_v10  ;;  %v586_v9 = vld [vmem:[#allocation5 + $0xfb8] sm:$0xff]  ;;  %v536_v10 = vld [vmem:[#allocation5 + $0xe28] sm:$0xff] }
  0xf2   :  { %2469 = vmatpush.msra.mxu2 %v503_v11  ;;  %2488 = vmatpush.msra.mxu3 %v520_v12  ;;  %v553_v11 = vld [vmem:[#allocation5 + $0xeb0] sm:$0xff]  ;;  %v568_v12 = vld [vmem:[#allocation5 + $0xf28] sm:$0xff] }
  0xf3   :  { %2430 = vmatpush.msra.mxu0 %v470_v13  ;;  %2449 = vmatpush.msra.mxu1 %v487_v14  ;;  %v585_v13 = vld [vmem:[#allocation5 + $0xfb0] sm:$0xff]  ;;  %v535_v14 = vld [vmem:[#allocation5 + $0xe20] sm:$0xff] }
  0xf4   :  { %2470 = vmatpush.msra.mxu2 %v502_v15  ;;  %2489 = vmatpush.msra.mxu3 %v519_v16  ;;  %v552_v15 = vld [vmem:[#allocation5 + $0xea8] sm:$0xff]  ;;  %v567_v16 = vld [vmem:[#allocation5 + $0xf20] sm:$0xff] }
  0xf5   :  { %2431 = vmatpush.msra.mxu0 %v469_v17  ;;  %2450 = vmatpush.msra.mxu1 %v486_v18  ;;  %v584_v17 = vld [vmem:[#allocation5 + $0xfa8] sm:$0xff]  ;;  %v534_v18 = vld [vmem:[#allocation5 + $0xe18] sm:$0xff] }
  0xf6   :  { %2471 = vmatpush.msra.mxu2 %v501_v19  ;;  %2490 = vmatpush.msra.mxu3 %v518_v20  ;;  %v551_v19 = vld [vmem:[#allocation5 + $0xea0] sm:$0xff]  ;;  %v566_v20 = vld [vmem:[#allocation5 + $0xf18] sm:$0xff] }
  0xf7   :  { %2432 = vmatpush.msra.mxu0 %v468_v21  ;;  %2451 = vmatpush.msra.mxu1 %v485_v22  ;;  %v583_v21 = vld [vmem:[#allocation5 + $0xfa0] sm:$0xff]  ;;  %v533_v22 = vld [vmem:[#allocation5 + $0xe10] sm:$0xff] }
  0xf8   :  { %2472 = vmatpush.msra.mxu2 %v500_v24  ;;  %2491 = vmatpush.msra.mxu3 %v517_v25  ;;  %v565_v24 = vld [vmem:[#allocation5 + $0xf10] sm:$0xff]  ;;  %v582_v25 = vld [vmem:[#allocation5 + $0xf98] sm:$0xff] }
  0xf9   :  { %2433 = vmatpush.msra.mxu0 %v467_v26  ;;  %2452 = vmatpush.msra.mxu1 %v484_v27  ;;  %v532_v26 = vld [vmem:[#allocation5 + $0xe08] sm:$0xff]  ;;  %v549_v27 = vld [vmem:[#allocation5 + $0xe90] sm:$0xff] }
  0xfa   :  { %2473 = vmatpush.msra.mxu2 %v499_v28  ;;  %2492 = vmatpush.msra.mxu3 %v516_v29  ;;  %v66_v28 = vld [vmem:[#allocation2 + $0x40] sm:$0xff]  ;;  %v564_v29 = vld [vmem:[#allocation5 + $0xf08] sm:$0xff] }
  0xfb   :  { %2434 = vmatmul.f32.vlgmr.msra.gmra.mxu0 %v1745_v30  ;;  %2474 = vmatmul.f32.vlgmr.msra.gmra.mxu2 %v1747_v31  ;;  %v581_v30 = vld [vmem:[#allocation5 + $0xf90] sm:$0xff]  ;;  %1753 = vst [vmem:[#allocation1] ss:$4 sm:$0xff] %v66_v28  ;;  %v531_v31 = vld [vmem:[#allocation5 + $0xe00] sm:$0xff]  ;;  %v614_v28 = vld [vmem:[#allocation5 + $0x1098] sm:$0xff] }
  0xfc   :  { %2498 = vmatpush.msrb.mxu0 %v546_v32  ;;  %2538 = vmatpush.msrb.mxu2 %v578_v33  ;;  %v548_v32 = vld [vmem:[#allocation5 + $0xe88] sm:$0xff]  ;;  %v563_v33 = vld [vmem:[#allocation5 + $0xf00] sm:$0xff] }
  0xfd   :  { %2453 = vmatpush.msra.mxu1 %v483_v34  ;;  %2493 = vmatpush.msra.mxu3 %v515_v35  ;;  %v580_v34 = vld [vmem:[#allocation5 + $0xf88] sm:$0xff]  ;;  %v1749_v35 = vld.sshfl [vmem:[#allocation1 + $0x20] sm:$0xff pattern:$0x73625140] }
  0xfe   :  { %2454 = vmatmul.f32.vlgmr.msra.gmra.mxu1 %v1746_v36  ;;  %2494 = vmatmul.f32.vlgmr.msra.gmra.mxu3 %v1748_v37  ;;  %v1751_v36 = vld.sshfl [vmem:[#allocation1 + $0x30] sm:$0xff pattern:$0x73625140]  ;;  %v610_v37 = vld [vmem:[#allocation5 + $0x1078] sm:$0xff] }
  0xff   :  { %2499 = vmatpush.msrb.mxu0 %v545_v38  ;;  %2518 = vmatpush.msrb.mxu1 %v562_v39  ;;  %v642_v38 = vld [vmem:[#allocation5 + $0x1178] sm:$0xff]  ;;  %v547_v39 = vld [vmem:[#allocation5 + $0xe80] sm:$0xff] }
 0x100   :  { %2539 = vmatpush.msrb.mxu2 %v577_v40  ;;  %2558 = vmatpush.msrb.mxu3 %v594_v41  ;;  %v579_v40 = vld [vmem:[#allocation5 + $0xf80] sm:$0xff]  ;;  %v1750_v41 = vld.sshfl [vmem:[#allocation1 + $0x28] sm:$0xff pattern:$0x73625140] }
 0x101   :  { %2500 = vmatpush.msrb.mxu0 %v544_v42  ;;  %2519 = vmatpush.msrb.mxu1 %v561_v43  ;;  %v1752_v42 = vld.sshfl [vmem:[#allocation1 + $0x38] sm:$0xff pattern:$0x73625140]  ;;  %v609_v43 = vld [vmem:[#allocation5 + $0x1070] sm:$0xff] }
 0x102   :  { %2540 = vmatpush.msrb.mxu2 %v576_v44  ;;  %2559 = vmatpush.msrb.mxu3 %v593_v45  ;;  %v626_v44 = vld [vmem:[#allocation5 + $0x10f8] sm:$0xff]  ;;  %v641_v45 = vld [vmem:[#allocation5 + $0x1170] sm:$0xff] }
 0x103   :  { %2501 = vmatpush.msrb.mxu0 %v543_v46  ;;  %2520 = vmatpush.msrb.mxu1 %v560_v47  ;;  %v658_v46 = vld [vmem:[#allocation5 + $0x11f8] sm:$0xff]  ;;  %v608_v47 = vld [vmem:[#allocation5 + $0x1068] sm:$0xff] }
 0x104   :  { %2541 = vmatpush.msrb.mxu2 %v575_v48  ;;  %2560 = vmatpush.msrb.mxu3 %v592_v49  ;;  %v625_v48 = vld [vmem:[#allocation5 + $0x10f0] sm:$0xff]  ;;  %v640_v49 = vld [vmem:[#allocation5 + $0x1168] sm:$0xff] }
 0x105   :  { %2502 = vmatpush.msrb.mxu0 %v542_v50  ;;  %2521 = vmatpush.msrb.mxu1 %v559_v51  ;;  %v657_v50 = vld [vmem:[#allocation5 + $0x11f0] sm:$0xff]  ;;  %v607_v51 = vld [vmem:[#allocation5 + $0x1060] sm:$0xff] }
 0x106   :  { %2542 = vmatpush.msrb.mxu2 %v574_v52  ;;  %2561 = vmatpush.msrb.mxu3 %v591_v53  ;;  %v624_v52 = vld [vmem:[#allocation5 + $0x10e8] sm:$0xff]  ;;  %v639_v53 = vld [vmem:[#allocation5 + $0x1160] sm:$0xff] }
 0x107   :  { %2503 = vmatpush.msrb.mxu0 %v541_v54  ;;  %2522 = vmatpush.msrb.mxu1 %v558_v55  ;;  %v656_v54 = vld [vmem:[#allocation5 + $0x11e8] sm:$0xff]  ;;  %v606_v55 = vld [vmem:[#allocation5 + $0x1058] sm:$0xff] }
 0x108   :  { %2543 = vmatpush.msrb.mxu2 %v573_v56  ;;  %2562 = vmatpush.msrb.mxu3 %v590_v57  ;;  %v623_v56 = vld [vmem:[#allocation5 + $0x10e0] sm:$0xff]  ;;  %v638_v57 = vld [vmem:[#allocation5 + $0x1158] sm:$0xff] }
 0x109   :  { %2504 = vmatpush.msrb.mxu0 %v540_v58  ;;  %2523 = vmatpush.msrb.mxu1 %v557_v59  ;;  %v655_v58 = vld [vmem:[#allocation5 + $0x11e0] sm:$0xff]  ;;  %v605_v59 = vld [vmem:[#allocation5 + $0x1050] sm:$0xff] }
 0x10a   :  { %2544 = vmatpush.msrb.mxu2 %v572_v60  ;;  %2563 = vmatpush.msrb.mxu3 %v589_v61  ;;  %v622_v60 = vld [vmem:[#allocation5 + $0x10d8] sm:$0xff]  ;;  %v637_v61 = vld [vmem:[#allocation5 + $0x1150] sm:$0xff] }
 0x10b   :  { %2505 = vmatpush.msrb.mxu0 %v539_v62  ;;  %2524 = vmatpush.msrb.mxu1 %v556_v63  ;;  %v654_v62 = vld [vmem:[#allocation5 + $0x11d8] sm:$0xff]  ;;  %v604_v63 = vld [vmem:[#allocation5 + $0x1048] sm:$0xff] }
 0x10c   :  { %2545 = vmatpush.msrb.mxu2 %v571_v0  ;;  %2564 = vmatpush.msrb.mxu3 %v588_v1  ;;  %v621_v0 = vld [vmem:[#allocation5 + $0x10d0] sm:$0xff]  ;;  %v636_v1 = vld [vmem:[#allocation5 + $0x1148] sm:$0xff] }
 0x10d   :  { %2506 = vmatpush.msrb.mxu0 %v538_v2  ;;  %2525 = vmatpush.msrb.mxu1 %v555_v3  ;;  %v653_v2 = vld [vmem:[#allocation5 + $0x11d0] sm:$0xff]  ;;  %v603_v3 = vld [vmem:[#allocation5 + $0x1040] sm:$0xff] }
 0x10e   :  { %2546 = vmatpush.msrb.mxu2 %v570_v4  ;;  %2565 = vmatpush.msrb.mxu3 %v587_v5  ;;  %v620_v4 = vld [vmem:[#allocation5 + $0x10c8] sm:$0xff]  ;;  %v635_v5 = vld [vmem:[#allocation5 + $0x1140] sm:$0xff] }
 0x10f   :  { %2507 = vmatpush.msrb.mxu0 %v537_v6  ;;  %2526 = vmatpush.msrb.mxu1 %v554_v7  ;;  %v652_v6 = vld [vmem:[#allocation5 + $0x11c8] sm:$0xff]  ;;  %v602_v7 = vld [vmem:[#allocation5 + $0x1038] sm:$0xff] }
 0x110   :  { %2547 = vmatpush.msrb.mxu2 %v569_v8  ;;  %2566 = vmatpush.msrb.mxu3 %v586_v9  ;;  %v619_v8 = vld [vmem:[#allocation5 + $0x10c0] sm:$0xff]  ;;  %v634_v9 = vld [vmem:[#allocation5 + $0x1138] sm:$0xff] }
 0x111   :  { %2508 = vmatpush.msrb.mxu0 %v536_v10  ;;  %2527 = vmatpush.msrb.mxu1 %v553_v11  ;;  %v651_v10 = vld [vmem:[#allocation5 + $0x11c0] sm:$0xff]  ;;  %v601_v11 = vld [vmem:[#allocation5 + $0x1030] sm:$0xff] }
 0x112   :  { %2548 = vmatpush.msrb.mxu2 %v568_v12  ;;  %2567 = vmatpush.msrb.mxu3 %v585_v13  ;;  %v618_v12 = vld [vmem:[#allocation5 + $0x10b8] sm:$0xff]  ;;  %v633_v13 = vld [vmem:[#allocation5 + $0x1130] sm:$0xff] }
 0x113   :  { %2509 = vmatpush.msrb.mxu0 %v535_v14  ;;  %2528 = vmatpush.msrb.mxu1 %v552_v15  ;;  %v650_v14 = vld [vmem:[#allocation5 + $0x11b8] sm:$0xff]  ;;  %v600_v15 = vld [vmem:[#allocation5 + $0x1028] sm:$0xff] }
 0x114   :  { %2549 = vmatpush.msrb.mxu2 %v567_v16  ;;  %2568 = vmatpush.msrb.mxu3 %v584_v17  ;;  %v617_v16 = vld [vmem:[#allocation5 + $0x10b0] sm:$0xff]  ;;  %v632_v17 = vld [vmem:[#allocation5 + $0x1128] sm:$0xff] }
 0x115   :  { %2510 = vmatpush.msrb.mxu0 %v534_v18  ;;  %2529 = vmatpush.msrb.mxu1 %v551_v19  ;;  %v649_v18 = vld [vmem:[#allocation5 + $0x11b0] sm:$0xff]  ;;  %v599_v19 = vld [vmem:[#allocation5 + $0x1020] sm:$0xff] }
 0x116   :  { %2550 = vmatpush.msrb.mxu2 %v566_v20  ;;  %2569 = vmatpush.msrb.mxu3 %v583_v21  ;;  %v616_v20 = vld [vmem:[#allocation5 + $0x10a8] sm:$0xff]  ;;  %v631_v21 = vld [vmem:[#allocation5 + $0x1120] sm:$0xff] }
 0x117   :  { %2511 = vmatpush.msrb.mxu0 %v533_v22  ;;  %2530 = vmatpush.msrb.mxu1 %v550_v23  ;;  %v648_v22 = vld [vmem:[#allocation5 + $0x11a8] sm:$0xff]  ;;  %v598_v23 = vld [vmem:[#allocation5 + $0x1018] sm:$0xff] }
 0x118   :  { %2551 = vmatpush.msrb.mxu2 %v565_v24  ;;  %2570 = vmatpush.msrb.mxu3 %v582_v25  ;;  %v615_v24 = vld [vmem:[#allocation5 + $0x10a0] sm:$0xff]  ;;  %v630_v25 = vld [vmem:[#allocation5 + $0x1118] sm:$0xff] }
 0x119   :  { %2512 = vmatpush.msrb.mxu0 %v532_v26  ;;  %2531 = vmatpush.msrb.mxu1 %v549_v27  ;;  %v647_v26 = vld [vmem:[#allocation5 + $0x11a0] sm:$0xff]  ;;  %v597_v27 = vld [vmem:[#allocation5 + $0x1010] sm:$0xff] }
 0x11a   :  { %2552 = vmatpush.msrb.mxu2 %v564_v29  ;;  %2571 = vmatpush.msrb.mxu3 %v581_v30  ;;  %v629_v29 = vld [vmem:[#allocation5 + $0x1110] sm:$0xff]  ;;  %v646_v30 = vld [vmem:[#allocation5 + $0x1198] sm:$0xff] }
 0x11b   :  { %2513 = vmatpush.msrb.mxu0 %v531_v31  ;;  %2532 = vmatpush.msrb.mxu1 %v548_v32  ;;  %v596_v31 = vld [vmem:[#allocation5 + $0x1008] sm:$0xff]  ;;  %v613_v32 = vld [vmem:[#allocation5 + $0x1090] sm:$0xff] }
 0x11c   :  { %2553 = vmatpush.msrb.mxu2 %v563_v33  ;;  %2572 = vmatpush.msrb.mxu3 %v580_v34  ;;  %v67_v33 = vld [vmem:[#allocation2 + $0x48] sm:$0xff]  ;;  %v628_v34 = vld [vmem:[#allocation5 + $0x1108] sm:$0xff] }
 0x11d   :  { %2514 = vmatmul.f32.vlgmr.msrb.gmra.mxu0 %v1749_v35  ;;  %2554 = vmatmul.f32.vlgmr.msrb.gmra.mxu2 %v1751_v36  ;;  %v645_v35 = vld [vmem:[#allocation5 + $0x1190] sm:$0xff]  ;;  %1754 = vst [vmem:[#allocation1 + $0x20] ss:$4 sm:$0xff] %v67_v33  ;;  %v595_v36 = vld [vmem:[#allocation5 + $0x1000] sm:$0xff]  ;;  %v678_v33 = vld [vmem:[#allocation5 + $0x1298] sm:$0xff] }
 0x11e   :  { %2578 = vmatpush.msra.mxu0 %v610_v37  ;;  %2618 = vmatpush.msra.mxu2 %v642_v38  ;;  %v612_v37 = vld [vmem:[#allocation5 + $0x1088] sm:$0xff]  ;;  %v627_v38 = vld [vmem:[#allocation5 + $0x1100] sm:$0xff] }
 0x11f   :  { %2533 = vmatpush.msrb.mxu1 %v547_v39  ;;  %2573 = vmatpush.msrb.mxu3 %v579_v40  ;;  %v644_v39 = vld [vmem:[#allocation5 + $0x1188] sm:$0xff]  ;;  %v1755_v40 = vld.sshfl [vmem:[#allocation1] sm:$0xff pattern:$0x73625140] }
 0x120   :  { %2534 = vmatmul.f32.vlgmr.msrb.gmra.mxu1 %v1750_v41  ;;  %2574 = vmatmul.f32.vlgmr.msrb.gmra.mxu3 %v1752_v42  ;;  %v1757_v41 = vld.sshfl [vmem:[#allocation1 + $0x10] sm:$0xff pattern:$0x73625140]  ;;  %v674_v42 = vld [vmem:[#allocation5 + $0x1278] sm:$0xff] }
 0x121   :  { %2579 = vmatpush.msra.mxu0 %v609_v43  ;;  %2598 = vmatpush.msra.mxu1 %v626_v44  ;;  %v706_v43 = vld [vmem:[#allocation5 + $0x1378] sm:$0xff]  ;;  %v611_v44 = vld [vmem:[#allocation5 + $0x1080] sm:$0xff] }
 0x122   :  { %2619 = vmatpush.msra.mxu2 %v641_v45  ;;  %2638 = vmatpush.msra.mxu3 %v658_v46  ;;  %v643_v45 = vld [vmem:[#allocation5 + $0x1180] sm:$0xff]  ;;  %v1756_v46 = vld.sshfl [vmem:[#allocation1 + $0x8] sm:$0xff pattern:$0x73625140] }
 0x123   :  { %2580 = vmatpush.msra.mxu0 %v608_v47  ;;  %2599 = vmatpush.msra.mxu1 %v625_v48  ;;  %v1758_v47 = vld.sshfl [vmem:[#allocation1 + $0x18] sm:$0xff pattern:$0x73625140]  ;;  %v673_v48 = vld [vmem:[#allocation5 + $0x1270] sm:$0xff] }
 0x124   :  { %2620 = vmatpush.msra.mxu2 %v640_v49  ;;  %2639 = vmatpush.msra.mxu3 %v657_v50  ;;  %v690_v49 = vld [vmem:[#allocation5 + $0x12f8] sm:$0xff]  ;;  %v705_v50 = vld [vmem:[#allocation5 + $0x1370] sm:$0xff] }
 0x125   :  { %2581 = vmatpush.msra.mxu0 %v607_v51  ;;  %2600 = vmatpush.msra.mxu1 %v624_v52  ;;  %v722_v51 = vld [vmem:[#allocation5 + $0x13f8] sm:$0xff]  ;;  %v672_v52 = vld [vmem:[#allocation5 + $0x1268] sm:$0xff] }
 0x126   :  { %2621 = vmatpush.msra.mxu2 %v639_v53  ;;  %2640 = vmatpush.msra.mxu3 %v656_v54  ;;  %v689_v53 = vld [vmem:[#allocation5 + $0x12f0] sm:$0xff]  ;;  %v704_v54 = vld [vmem:[#allocation5 + $0x1368] sm:$0xff] }
 0x127   :  { %2582 = vmatpush.msra.mxu0 %v606_v55  ;;  %2601 = vmatpush.msra.mxu1 %v623_v56  ;;  %v721_v55 = vld [vmem:[#allocation5 + $0x13f0] sm:$0xff]  ;;  %v671_v56 = vld [vmem:[#allocation5 + $0x1260] sm:$0xff] }
 0x128   :  { %2622 = vmatpush.msra.mxu2 %v638_v57  ;;  %2641 = vmatpush.msra.mxu3 %v655_v58  ;;  %v688_v57 = vld [vmem:[#allocation5 + $0x12e8] sm:$0xff]  ;;  %v703_v58 = vld [vmem:[#allocation5 + $0x1360] sm:$0xff] }
 0x129   :  { %2583 = vmatpush.msra.mxu0 %v605_v59  ;;  %2602 = vmatpush.msra.mxu1 %v622_v60  ;;  %v720_v59 = vld [vmem:[#allocation5 + $0x13e8] sm:$0xff]  ;;  %v670_v60 = vld [vmem:[#allocation5 + $0x1258] sm:$0xff] }
 0x12a   :  { %2623 = vmatpush.msra.mxu2 %v637_v61  ;;  %2642 = vmatpush.msra.mxu3 %v654_v62  ;;  %v687_v61 = vld [vmem:[#allocation5 + $0x12e0] sm:$0xff]  ;;  %v702_v62 = vld [vmem:[#allocation5 + $0x1358] sm:$0xff] }
 0x12b   :  { %2584 = vmatpush.msra.mxu0 %v604_v63  ;;  %2603 = vmatpush.msra.mxu1 %v621_v0  ;;  %v719_v63 = vld [vmem:[#allocation5 + $0x13e0] sm:$0xff]  ;;  %v669_v0 = vld [vmem:[#allocation5 + $0x1250] sm:$0xff] }
 0x12c   :  { %2624 = vmatpush.msra.mxu2 %v636_v1  ;;  %2643 = vmatpush.msra.mxu3 %v653_v2  ;;  %v686_v1 = vld [vmem:[#allocation5 + $0x12d8] sm:$0xff]  ;;  %v701_v2 = vld [vmem:[#allocation5 + $0x1350] sm:$0xff] }
 0x12d   :  { %2585 = vmatpush.msra.mxu0 %v603_v3  ;;  %2604 = vmatpush.msra.mxu1 %v620_v4  ;;  %v718_v3 = vld [vmem:[#allocation5 + $0x13d8] sm:$0xff]  ;;  %v668_v4 = vld [vmem:[#allocation5 + $0x1248] sm:$0xff] }
 0x12e   :  { %2625 = vmatpush.msra.mxu2 %v635_v5  ;;  %2644 = vmatpush.msra.mxu3 %v652_v6  ;;  %v685_v5 = vld [vmem:[#allocation5 + $0x12d0] sm:$0xff]  ;;  %v700_v6 = vld [vmem:[#allocation5 + $0x1348] sm:$0xff] }
 0x12f   :  { %2586 = vmatpush.msra.mxu0 %v602_v7  ;;  %2605 = vmatpush.msra.mxu1 %v619_v8  ;;  %v717_v7 = vld [vmem:[#allocation5 + $0x13d0] sm:$0xff]  ;;  %v667_v8 = vld [vmem:[#allocation5 + $0x1240] sm:$0xff] }
 0x130   :  { %2626 = vmatpush.msra.mxu2 %v634_v9  ;;  %2645 = vmatpush.msra.mxu3 %v651_v10  ;;  %v684_v9 = vld [vmem:[#allocation5 + $0x12c8] sm:$0xff]  ;;  %v699_v10 = vld [vmem:[#allocation5 + $0x1340] sm:$0xff] }
 0x131   :  { %2587 = vmatpush.msra.mxu0 %v601_v11  ;;  %2606 = vmatpush.msra.mxu1 %v618_v12  ;;  %v716_v11 = vld [vmem:[#allocation5 + $0x13c8] sm:$0xff]  ;;  %v666_v12 = vld [vmem:[#allocation5 + $0x1238] sm:$0xff] }
 0x132   :  { %2627 = vmatpush.msra.mxu2 %v633_v13  ;;  %2646 = vmatpush.msra.mxu3 %v650_v14  ;;  %v683_v13 = vld [vmem:[#allocation5 + $0x12c0] sm:$0xff]  ;;  %v698_v14 = vld [vmem:[#allocation5 + $0x1338] sm:$0xff] }
 0x133   :  { %2588 = vmatpush.msra.mxu0 %v600_v15  ;;  %2607 = vmatpush.msra.mxu1 %v617_v16  ;;  %v715_v15 = vld [vmem:[#allocation5 + $0x13c0] sm:$0xff]  ;;  %v665_v16 = vld [vmem:[#allocation5 + $0x1230] sm:$0xff] }
 0x134   :  { %2628 = vmatpush.msra.mxu2 %v632_v17  ;;  %2647 = vmatpush.msra.mxu3 %v649_v18  ;;  %v682_v17 = vld [vmem:[#allocation5 + $0x12b8] sm:$0xff]  ;;  %v697_v18 = vld [vmem:[#allocation5 + $0x1330] sm:$0xff] }
 0x135   :  { %2589 = vmatpush.msra.mxu0 %v599_v19  ;;  %2608 = vmatpush.msra.mxu1 %v616_v20  ;;  %v714_v19 = vld [vmem:[#allocation5 + $0x13b8] sm:$0xff]  ;;  %v664_v20 = vld [vmem:[#allocation5 + $0x1228] sm:$0xff] }
 0x136   :  { %2629 = vmatpush.msra.mxu2 %v631_v21  ;;  %2648 = vmatpush.msra.mxu3 %v648_v22  ;;  %v681_v21 = vld [vmem:[#allocation5 + $0x12b0] sm:$0xff]  ;;  %v696_v22 = vld [vmem:[#allocation5 + $0x1328] sm:$0xff] }
 0x137   :  { %2590 = vmatpush.msra.mxu0 %v598_v23  ;;  %2609 = vmatpush.msra.mxu1 %v615_v24  ;;  %v713_v23 = vld [vmem:[#allocation5 + $0x13b0] sm:$0xff]  ;;  %v663_v24 = vld [vmem:[#allocation5 + $0x1220] sm:$0xff] }
 0x138   :  { %2630 = vmatpush.msra.mxu2 %v630_v25  ;;  %2649 = vmatpush.msra.mxu3 %v647_v26  ;;  %v680_v25 = vld [vmem:[#allocation5 + $0x12a8] sm:$0xff]  ;;  %v695_v26 = vld [vmem:[#allocation5 + $0x1320] sm:$0xff] }
 0x139   :  { %2591 = vmatpush.msra.mxu0 %v597_v27  ;;  %2610 = vmatpush.msra.mxu1 %v614_v28  ;;  %v712_v27 = vld [vmem:[#allocation5 + $0x13a8] sm:$0xff]  ;;  %v662_v28 = vld [vmem:[#allocation5 + $0x1218] sm:$0xff] }
 0x13a   :  { %2631 = vmatpush.msra.mxu2 %v629_v29  ;;  %2650 = vmatpush.msra.mxu3 %v646_v30  ;;  %v679_v29 = vld [vmem:[#allocation5 + $0x12a0] sm:$0xff]  ;;  %v694_v30 = vld [vmem:[#allocation5 + $0x1318] sm:$0xff] }
 0x13b   :  { %2592 = vmatpush.msra.mxu0 %v596_v31  ;;  %2611 = vmatpush.msra.mxu1 %v613_v32  ;;  %v711_v31 = vld [vmem:[#allocation5 + $0x13a0] sm:$0xff]  ;;  %v661_v32 = vld [vmem:[#allocation5 + $0x1210] sm:$0xff] }
 0x13c   :  { %2632 = vmatpush.msra.mxu2 %v628_v34  ;;  %2651 = vmatpush.msra.mxu3 %v645_v35  ;;  %v693_v34 = vld [vmem:[#allocation5 + $0x1310] sm:$0xff]  ;;  %v710_v35 = vld [vmem:[#allocation5 + $0x1398] sm:$0xff] }
 0x13d   :  { %2593 = vmatpush.msra.mxu0 %v595_v36  ;;  %2612 = vmatpush.msra.mxu1 %v612_v37  ;;  %v660_v36 = vld [vmem:[#allocation5 + $0x1208] sm:$0xff]  ;;  %v677_v37 = vld [vmem:[#allocation5 + $0x1290] sm:$0xff] }
 0x13e   :  { %2633 = vmatpush.msra.mxu2 %v627_v38  ;;  %2652 = vmatpush.msra.mxu3 %v644_v39  ;;  %v68_v38 = vld [vmem:[#allocation2 + $0x50] sm:$0xff] }
 0x13f   :  { %2594 = vmatmul.f32.vlgmr.msra.gmra.mxu0 %v1755_v40  ;;  %2634 = vmatmul.f32.vlgmr.msra.gmra.mxu2 %v1757_v41  ;;  %v692_v39 = vld [vmem:[#allocation5 + $0x1308] sm:$0xff]  ;;  %v709_v40 = vld [vmem:[#allocation5 + $0x1390] sm:$0xff]  ;;  %1763 = vst [vmem:[#allocation1] ss:$4 sm:$0xff] %v68_v38  ;;  %v659_v41 = vld [vmem:[#allocation5 + $0x1200] sm:$0xff] }
 0x140   :  { %2658 = vmatpush.msrb.mxu0 %v674_v42  ;;  %2698 = vmatpush.msrb.mxu2 %v706_v43  ;;  %v676_v42 = vld [vmem:[#allocation5 + $0x1288] sm:$0xff]  ;;  %v691_v43 = vld [vmem:[#allocation5 + $0x1300] sm:$0xff]  ;;  %v742_v38 = vld [vmem:[#allocation5 + $0x1498] sm:$0xff] }
 0x141   :  { %2613 = vmatpush.msra.mxu1 %v611_v44  ;;  %2653 = vmatpush.msra.mxu3 %v643_v45  ;;  %v708_v44 = vld [vmem:[#allocation5 + $0x1388] sm:$0xff]  ;;  %v1759_v45 = vld.sshfl [vmem:[#allocation1 + $0x20] sm:$0xff pattern:$0x73625140] }
 0x142   :  { %2614 = vmatmul.f32.vlgmr.msra.gmra.mxu1 %v1756_v46  ;;  %2654 = vmatmul.f32.vlgmr.msra.gmra.mxu3 %v1758_v47  ;;  %v1761_v46 = vld.sshfl [vmem:[#allocation1 + $0x30] sm:$0xff pattern:$0x73625140]  ;;  %v738_v47 = vld [vmem:[#allocation5 + $0x1478] sm:$0xff] }
 0x143   :  { %2659 = vmatpush.msrb.mxu0 %v673_v48  ;;  %2678 = vmatpush.msrb.mxu1 %v690_v49  ;;  %v770_v48 = vld [vmem:[#allocation5 + $0x1578] sm:$0xff]  ;;  %v675_v49 = vld [vmem:[#allocation5 + $0x1280] sm:$0xff] }
 0x144   :  { %2699 = vmatpush.msrb.mxu2 %v705_v50  ;;  %2718 = vmatpush.msrb.mxu3 %v722_v51  ;;  %v707_v50 = vld [vmem:[#allocation5 + $0x1380] sm:$0xff]  ;;  %v1760_v51 = vld.sshfl [vmem:[#allocation1 + $0x28] sm:$0xff pattern:$0x73625140] }
 0x145   :  { %2660 = vmatpush.msrb.mxu0 %v672_v52  ;;  %2679 = vmatpush.msrb.mxu1 %v689_v53  ;;  %v1762_v52 = vld.sshfl [vmem:[#allocation1 + $0x38] sm:$0xff pattern:$0x73625140]  ;;  %v737_v53 = vld [vmem:[#allocation5 + $0x1470] sm:$0xff] }
 0x146   :  { %2700 = vmatpush.msrb.mxu2 %v704_v54  ;;  %2719 = vmatpush.msrb.mxu3 %v721_v55  ;;  %v754_v54 = vld [vmem:[#allocation5 + $0x14f8] sm:$0xff]  ;;  %v769_v55 = vld [vmem:[#allocation5 + $0x1570] sm:$0xff] }
 0x147   :  { %2661 = vmatpush.msrb.mxu0 %v671_v56  ;;  %2680 = vmatpush.msrb.mxu1 %v688_v57  ;;  %v786_v56 = vld [vmem:[#allocation5 + $0x15f8] sm:$0xff]  ;;  %v736_v57 = vld [vmem:[#allocation5 + $0x1468] sm:$0xff] }
 0x148   :  { %2701 = vmatpush.msrb.mxu2 %v703_v58  ;;  %2720 = vmatpush.msrb.mxu3 %v720_v59  ;;  %v753_v58 = vld [vmem:[#allocation5 + $0x14f0] sm:$0xff]  ;;  %v768_v59 = vld [vmem:[#allocation5 + $0x1568] sm:$0xff] }
 0x149   :  { %2662 = vmatpush.msrb.mxu0 %v670_v60  ;;  %2681 = vmatpush.msrb.mxu1 %v687_v61  ;;  %v785_v60 = vld [vmem:[#allocation5 + $0x15f0] sm:$0xff]  ;;  %v735_v61 = vld [vmem:[#allocation5 + $0x1460] sm:$0xff] }
 0x14a   :  { %2702 = vmatpush.msrb.mxu2 %v702_v62  ;;  %2721 = vmatpush.msrb.mxu3 %v719_v63  ;;  %v752_v62 = vld [vmem:[#allocation5 + $0x14e8] sm:$0xff]  ;;  %v767_v63 = vld [vmem:[#allocation5 + $0x1560] sm:$0xff] }
 0x14b   :  { %2663 = vmatpush.msrb.mxu0 %v669_v0  ;;  %2682 = vmatpush.msrb.mxu1 %v686_v1  ;;  %v784_v0 = vld [vmem:[#allocation5 + $0x15e8] sm:$0xff]  ;;  %v734_v1 = vld [vmem:[#allocation5 + $0x1458] sm:$0xff] }
 0x14c   :  { %2703 = vmatpush.msrb.mxu2 %v701_v2  ;;  %2722 = vmatpush.msrb.mxu3 %v718_v3  ;;  %v751_v2 = vld [vmem:[#allocation5 + $0x14e0] sm:$0xff]  ;;  %v766_v3 = vld [vmem:[#allocation5 + $0x1558] sm:$0xff] }
 0x14d   :  { %2664 = vmatpush.msrb.mxu0 %v668_v4  ;;  %2683 = vmatpush.msrb.mxu1 %v685_v5  ;;  %v783_v4 = vld [vmem:[#allocation5 + $0x15e0] sm:$0xff]  ;;  %v733_v5 = vld [vmem:[#allocation5 + $0x1450] sm:$0xff] }
 0x14e   :  { %2704 = vmatpush.msrb.mxu2 %v700_v6  ;;  %2723 = vmatpush.msrb.mxu3 %v717_v7  ;;  %v750_v6 = vld [vmem:[#allocation5 + $0x14d8] sm:$0xff]  ;;  %v765_v7 = vld [vmem:[#allocation5 + $0x1550] sm:$0xff] }
 0x14f   :  { %2665 = vmatpush.msrb.mxu0 %v667_v8  ;;  %2684 = vmatpush.msrb.mxu1 %v684_v9  ;;  %v782_v8 = vld [vmem:[#allocation5 + $0x15d8] sm:$0xff]  ;;  %v732_v9 = vld [vmem:[#allocation5 + $0x1448] sm:$0xff] }
 0x150   :  { %2705 = vmatpush.msrb.mxu2 %v699_v10  ;;  %2724 = vmatpush.msrb.mxu3 %v716_v11  ;;  %v749_v10 = vld [vmem:[#allocation5 + $0x14d0] sm:$0xff]  ;;  %v764_v11 = vld [vmem:[#allocation5 + $0x1548] sm:$0xff] }
 0x151   :  { %2666 = vmatpush.msrb.mxu0 %v666_v12  ;;  %2685 = vmatpush.msrb.mxu1 %v683_v13  ;;  %v781_v12 = vld [vmem:[#allocation5 + $0x15d0] sm:$0xff]  ;;  %v731_v13 = vld [vmem:[#allocation5 + $0x1440] sm:$0xff] }
 0x152   :  { %2706 = vmatpush.msrb.mxu2 %v698_v14  ;;  %2725 = vmatpush.msrb.mxu3 %v715_v15  ;;  %v748_v14 = vld [vmem:[#allocation5 + $0x14c8] sm:$0xff]  ;;  %v763_v15 = vld [vmem:[#allocation5 + $0x1540] sm:$0xff] }
 0x153   :  { %2667 = vmatpush.msrb.mxu0 %v665_v16  ;;  %2686 = vmatpush.msrb.mxu1 %v682_v17  ;;  %v780_v16 = vld [vmem:[#allocation5 + $0x15c8] sm:$0xff]  ;;  %v730_v17 = vld [vmem:[#allocation5 + $0x1438] sm:$0xff] }
 0x154   :  { %2707 = vmatpush.msrb.mxu2 %v697_v18  ;;  %2726 = vmatpush.msrb.mxu3 %v714_v19  ;;  %v747_v18 = vld [vmem:[#allocation5 + $0x14c0] sm:$0xff]  ;;  %v762_v19 = vld [vmem:[#allocation5 + $0x1538] sm:$0xff] }
 0x155   :  { %2668 = vmatpush.msrb.mxu0 %v664_v20  ;;  %2687 = vmatpush.msrb.mxu1 %v681_v21  ;;  %v779_v20 = vld [vmem:[#allocation5 + $0x15c0] sm:$0xff]  ;;  %v729_v21 = vld [vmem:[#allocation5 + $0x1430] sm:$0xff] }
 0x156   :  { %2708 = vmatpush.msrb.mxu2 %v696_v22  ;;  %2727 = vmatpush.msrb.mxu3 %v713_v23  ;;  %v746_v22 = vld [vmem:[#allocation5 + $0x14b8] sm:$0xff]  ;;  %v761_v23 = vld [vmem:[#allocation5 + $0x1530] sm:$0xff] }
 0x157   :  { %2669 = vmatpush.msrb.mxu0 %v663_v24  ;;  %2688 = vmatpush.msrb.mxu1 %v680_v25  ;;  %v778_v24 = vld [vmem:[#allocation5 + $0x15b8] sm:$0xff]  ;;  %v728_v25 = vld [vmem:[#allocation5 + $0x1428] sm:$0xff] }
 0x158   :  { %2709 = vmatpush.msrb.mxu2 %v695_v26  ;;  %2728 = vmatpush.msrb.mxu3 %v712_v27  ;;  %v745_v26 = vld [vmem:[#allocation5 + $0x14b0] sm:$0xff]  ;;  %v760_v27 = vld [vmem:[#allocation5 + $0x1528] sm:$0xff] }
 0x159   :  { %2670 = vmatpush.msrb.mxu0 %v662_v28  ;;  %2689 = vmatpush.msrb.mxu1 %v679_v29  ;;  %v777_v28 = vld [vmem:[#allocation5 + $0x15b0] sm:$0xff]  ;;  %v727_v29 = vld [vmem:[#allocation5 + $0x1420] sm:$0xff] }
 0x15a   :  { %2710 = vmatpush.msrb.mxu2 %v694_v30  ;;  %2729 = vmatpush.msrb.mxu3 %v711_v31  ;;  %v744_v30 = vld [vmem:[#allocation5 + $0x14a8] sm:$0xff]  ;;  %v759_v31 = vld [vmem:[#allocation5 + $0x1520] sm:$0xff] }
 0x15b   :  { %2671 = vmatpush.msrb.mxu0 %v661_v32  ;;  %2690 = vmatpush.msrb.mxu1 %v678_v33  ;;  %v776_v32 = vld [vmem:[#allocation5 + $0x15a8] sm:$0xff]  ;;  %v726_v33 = vld [vmem:[#allocation5 + $0x1418] sm:$0xff] }
 0x15c   :  { %2711 = vmatpush.msrb.mxu2 %v693_v34  ;;  %2730 = vmatpush.msrb.mxu3 %v710_v35  ;;  %v743_v34 = vld [vmem:[#allocation5 + $0x14a0] sm:$0xff]  ;;  %v758_v35 = vld [vmem:[#allocation5 + $0x1518] sm:$0xff] }
 0x15d   :  { %2672 = vmatpush.msrb.mxu0 %v660_v36  ;;  %2691 = vmatpush.msrb.mxu1 %v677_v37  ;;  %v775_v36 = vld [vmem:[#allocation5 + $0x15a0] sm:$0xff]  ;;  %v725_v37 = vld [vmem:[#allocation5 + $0x1410] sm:$0xff] }
 0x15e   :  { %2712 = vmatpush.msrb.mxu2 %v692_v39  ;;  %2731 = vmatpush.msrb.mxu3 %v709_v40  ;;  %v757_v39 = vld [vmem:[#allocation5 + $0x1510] sm:$0xff]  ;;  %v774_v40 = vld [vmem:[#allocation5 + $0x1598] sm:$0xff] }
 0x15f   :  { %2673 = vmatpush.msrb.mxu0 %v659_v41  ;;  %2692 = vmatpush.msrb.mxu1 %v676_v42  ;;  %v724_v41 = vld [vmem:[#allocation5 + $0x1408] sm:$0xff]  ;;  %v741_v42 = vld [vmem:[#allocation5 + $0x1490] sm:$0xff] }
 0x160   :  { %2713 = vmatpush.msrb.mxu2 %v691_v43  ;;  %2732 = vmatpush.msrb.mxu3 %v708_v44  ;;  %v69_v43 = vld [vmem:[#allocation2 + $0x58] sm:$0xff]  ;;  %v756_v44 = vld [vmem:[#allocation5 + $0x1508] sm:$0xff] }
 0x161   :  { %2674 = vmatmul.f32.vlgmr.msrb.gmra.mxu0 %v1759_v45  ;;  %2714 = vmatmul.f32.vlgmr.msrb.gmra.mxu2 %v1761_v46  ;;  %v773_v45 = vld [vmem:[#allocation5 + $0x1590] sm:$0xff]  ;;  %1764 = vst [vmem:[#allocation1 + $0x20] ss:$4 sm:$0xff] %v69_v43  ;;  %v723_v46 = vld [vmem:[#allocation5 + $0x1400] sm:$0xff]  ;;  %v806_v43 = vld [vmem:[#allocation5 + $0x1698] sm:$0xff] }
 0x162   :  { %2738 = vmatpush.msra.mxu0 %v738_v47  ;;  %2778 = vmatpush.msra.mxu2 %v770_v48  ;;  %v740_v47 = vld [vmem:[#allocation5 + $0x1488] sm:$0xff]  ;;  %v755_v48 = vld [vmem:[#allocation5 + $0x1500] sm:$0xff] }
 0x163   :  { %2693 = vmatpush.msrb.mxu1 %v675_v49  ;;  %2733 = vmatpush.msrb.mxu3 %v707_v50  ;;  %v772_v49 = vld [vmem:[#allocation5 + $0x1588] sm:$0xff]  ;;  %v1765_v50 = vld.sshfl [vmem:[#allocation1] sm:$0xff pattern:$0x73625140] }
 0x164   :  { %2694 = vmatmul.f32.vlgmr.msrb.gmra.mxu1 %v1760_v51  ;;  %2734 = vmatmul.f32.vlgmr.msrb.gmra.mxu3 %v1762_v52  ;;  %v1767_v51 = vld.sshfl [vmem:[#allocation1 + $0x10] sm:$0xff pattern:$0x73625140]  ;;  %v802_v52 = vld [vmem:[#allocation5 + $0x1678] sm:$0xff] }
 0x165   :  { %2739 = vmatpush.msra.mxu0 %v737_v53  ;;  %2758 = vmatpush.msra.mxu1 %v754_v54  ;;  %v834_v53 = vld [vmem:[#allocation5 + $0x1778] sm:$0xff]  ;;  %v739_v54 = vld [vmem:[#allocation5 + $0x1480] sm:$0xff] }
 0x166   :  { %2779 = vmatpush.msra.mxu2 %v769_v55  ;;  %2798 = vmatpush.msra.mxu3 %v786_v56  ;;  %v771_v55 = vld [vmem:[#allocation5 + $0x1580] sm:$0xff]  ;;  %v1766_v56 = vld.sshfl [vmem:[#allocation1 + $0x8] sm:$0xff pattern:$0x73625140] }
 0x167   :  { %2740 = vmatpush.msra.mxu0 %v736_v57  ;;  %2759 = vmatpush.msra.mxu1 %v753_v58  ;;  %v1768_v57 = vld.sshfl [vmem:[#allocation1 + $0x18] sm:$0xff pattern:$0x73625140]  ;;  %v801_v58 = vld [vmem:[#allocation5 + $0x1670] sm:$0xff] }
 0x168   :  { %2780 = vmatpush.msra.mxu2 %v768_v59  ;;  %2799 = vmatpush.msra.mxu3 %v785_v60  ;;  %v818_v59 = vld [vmem:[#allocation5 + $0x16f8] sm:$0xff]  ;;  %v833_v60 = vld [vmem:[#allocation5 + $0x1770] sm:$0xff] }
 0x169   :  { %2741 = vmatpush.msra.mxu0 %v735_v61  ;;  %2760 = vmatpush.msra.mxu1 %v752_v62  ;;  %v850_v61 = vld [vmem:[#allocation5 + $0x17f8] sm:$0xff]  ;;  %v800_v62 = vld [vmem:[#allocation5 + $0x1668] sm:$0xff] }
 0x16a   :  { %2781 = vmatpush.msra.mxu2 %v767_v63  ;;  %2800 = vmatpush.msra.mxu3 %v784_v0  ;;  %v817_v63 = vld [vmem:[#allocation5 + $0x16f0] sm:$0xff]  ;;  %v832_v0 = vld [vmem:[#allocation5 + $0x1768] sm:$0xff] }
 0x16b   :  { %2742 = vmatpush.msra.mxu0 %v734_v1  ;;  %2761 = vmatpush.msra.mxu1 %v751_v2  ;;  %v849_v1 = vld [vmem:[#allocation5 + $0x17f0] sm:$0xff]  ;;  %v799_v2 = vld [vmem:[#allocation5 + $0x1660] sm:$0xff] }
 0x16c   :  { %2782 = vmatpush.msra.mxu2 %v766_v3  ;;  %2801 = vmatpush.msra.mxu3 %v783_v4  ;;  %v816_v3 = vld [vmem:[#allocation5 + $0x16e8] sm:$0xff]  ;;  %v831_v4 = vld [vmem:[#allocation5 + $0x1760] sm:$0xff] }
 0x16d   :  { %2743 = vmatpush.msra.mxu0 %v733_v5  ;;  %2762 = vmatpush.msra.mxu1 %v750_v6  ;;  %v848_v5 = vld [vmem:[#allocation5 + $0x17e8] sm:$0xff]  ;;  %v798_v6 = vld [vmem:[#allocation5 + $0x1658] sm:$0xff] }
 0x16e   :  { %2783 = vmatpush.msra.mxu2 %v765_v7  ;;  %2802 = vmatpush.msra.mxu3 %v782_v8  ;;  %v815_v7 = vld [vmem:[#allocation5 + $0x16e0] sm:$0xff]  ;;  %v830_v8 = vld [vmem:[#allocation5 + $0x1758] sm:$0xff] }
 0x16f   :  { %2744 = vmatpush.msra.mxu0 %v732_v9  ;;  %2763 = vmatpush.msra.mxu1 %v749_v10  ;;  %v847_v9 = vld [vmem:[#allocation5 + $0x17e0] sm:$0xff]  ;;  %v797_v10 = vld [vmem:[#allocation5 + $0x1650] sm:$0xff] }
 0x170   :  { %2784 = vmatpush.msra.mxu2 %v764_v11  ;;  %2803 = vmatpush.msra.mxu3 %v781_v12  ;;  %v814_v11 = vld [vmem:[#allocation5 + $0x16d8] sm:$0xff]  ;;  %v829_v12 = vld [vmem:[#allocation5 + $0x1750] sm:$0xff] }
 0x171   :  { %2745 = vmatpush.msra.mxu0 %v731_v13  ;;  %2764 = vmatpush.msra.mxu1 %v748_v14  ;;  %v846_v13 = vld [vmem:[#allocation5 + $0x17d8] sm:$0xff]  ;;  %v796_v14 = vld [vmem:[#allocation5 + $0x1648] sm:$0xff] }
 0x172   :  { %2785 = vmatpush.msra.mxu2 %v763_v15  ;;  %2804 = vmatpush.msra.mxu3 %v780_v16  ;;  %v813_v15 = vld [vmem:[#allocation5 + $0x16d0] sm:$0xff]  ;;  %v828_v16 = vld [vmem:[#allocation5 + $0x1748] sm:$0xff] }
 0x173   :  { %2746 = vmatpush.msra.mxu0 %v730_v17  ;;  %2765 = vmatpush.msra.mxu1 %v747_v18  ;;  %v845_v17 = vld [vmem:[#allocation5 + $0x17d0] sm:$0xff]  ;;  %v795_v18 = vld [vmem:[#allocation5 + $0x1640] sm:$0xff] }
 0x174   :  { %2786 = vmatpush.msra.mxu2 %v762_v19  ;;  %2805 = vmatpush.msra.mxu3 %v779_v20  ;;  %v812_v19 = vld [vmem:[#allocation5 + $0x16c8] sm:$0xff]  ;;  %v827_v20 = vld [vmem:[#allocation5 + $0x1740] sm:$0xff] }
 0x175   :  { %2747 = vmatpush.msra.mxu0 %v729_v21  ;;  %2766 = vmatpush.msra.mxu1 %v746_v22  ;;  %v844_v21 = vld [vmem:[#allocation5 + $0x17c8] sm:$0xff]  ;;  %v794_v22 = vld [vmem:[#allocation5 + $0x1638] sm:$0xff] }
 0x176   :  { %2787 = vmatpush.msra.mxu2 %v761_v23  ;;  %2806 = vmatpush.msra.mxu3 %v778_v24  ;;  %v811_v23 = vld [vmem:[#allocation5 + $0x16c0] sm:$0xff]  ;;  %v826_v24 = vld [vmem:[#allocation5 + $0x1738] sm:$0xff] }
 0x177   :  { %2748 = vmatpush.msra.mxu0 %v728_v25  ;;  %2767 = vmatpush.msra.mxu1 %v745_v26  ;;  %v843_v25 = vld [vmem:[#allocation5 + $0x17c0] sm:$0xff]  ;;  %v793_v26 = vld [vmem:[#allocation5 + $0x1630] sm:$0xff] }
 0x178   :  { %2788 = vmatpush.msra.mxu2 %v760_v27  ;;  %2807 = vmatpush.msra.mxu3 %v777_v28  ;;  %v810_v27 = vld [vmem:[#allocation5 + $0x16b8] sm:$0xff]  ;;  %v825_v28 = vld [vmem:[#allocation5 + $0x1730] sm:$0xff] }
 0x179   :  { %2749 = vmatpush.msra.mxu0 %v727_v29  ;;  %2768 = vmatpush.msra.mxu1 %v744_v30  ;;  %v842_v29 = vld [vmem:[#allocation5 + $0x17b8] sm:$0xff]  ;;  %v792_v30 = vld [vmem:[#allocation5 + $0x1628] sm:$0xff] }
 0x17a   :  { %2789 = vmatpush.msra.mxu2 %v759_v31  ;;  %2808 = vmatpush.msra.mxu3 %v776_v32  ;;  %v809_v31 = vld [vmem:[#allocation5 + $0x16b0] sm:$0xff]  ;;  %v824_v32 = vld [vmem:[#allocation5 + $0x1728] sm:$0xff] }
 0x17b   :  { %2750 = vmatpush.msra.mxu0 %v726_v33  ;;  %2769 = vmatpush.msra.mxu1 %v743_v34  ;;  %v841_v33 = vld [vmem:[#allocation5 + $0x17b0] sm:$0xff]  ;;  %v791_v34 = vld [vmem:[#allocation5 + $0x1620] sm:$0xff] }
 0x17c   :  { %2790 = vmatpush.msra.mxu2 %v758_v35  ;;  %2809 = vmatpush.msra.mxu3 %v775_v36  ;;  %v808_v35 = vld [vmem:[#allocation5 + $0x16a8] sm:$0xff]  ;;  %v823_v36 = vld [vmem:[#allocation5 + $0x1720] sm:$0xff] }
 0x17d   :  { %2751 = vmatpush.msra.mxu0 %v725_v37  ;;  %2770 = vmatpush.msra.mxu1 %v742_v38  ;;  %v840_v37 = vld [vmem:[#allocation5 + $0x17a8] sm:$0xff]  ;;  %v790_v38 = vld [vmem:[#allocation5 + $0x1618] sm:$0xff] }
 0x17e   :  { %2791 = vmatpush.msra.mxu2 %v757_v39  ;;  %2810 = vmatpush.msra.mxu3 %v774_v40  ;;  %v807_v39 = vld [vmem:[#allocation5 + $0x16a0] sm:$0xff]  ;;  %v822_v40 = vld [vmem:[#allocation5 + $0x1718] sm:$0xff] }
 0x17f   :  { %2752 = vmatpush.msra.mxu0 %v724_v41  ;;  %2771 = vmatpush.msra.mxu1 %v741_v42  ;;  %v839_v41 = vld [vmem:[#allocation5 + $0x17a0] sm:$0xff]  ;;  %v789_v42 = vld [vmem:[#allocation5 + $0x1610] sm:$0xff] }
 0x180   :  { %2792 = vmatpush.msra.mxu2 %v756_v44  ;;  %2811 = vmatpush.msra.mxu3 %v773_v45  ;;  %v821_v44 = vld [vmem:[#allocation5 + $0x1710] sm:$0xff]  ;;  %v838_v45 = vld [vmem:[#allocation5 + $0x1798] sm:$0xff] }
 0x181   :  { %2753 = vmatpush.msra.mxu0 %v723_v46  ;;  %2772 = vmatpush.msra.mxu1 %v740_v47  ;;  %v788_v46 = vld [vmem:[#allocation5 + $0x1608] sm:$0xff]  ;;  %v805_v47 = vld [vmem:[#allocation5 + $0x1690] sm:$0xff] }
 0x182   :  { %2793 = vmatpush.msra.mxu2 %v755_v48  ;;  %2812 = vmatpush.msra.mxu3 %v772_v49  ;;  %v70_v48 = vld [vmem:[#allocation2 + $0x60] sm:$0xff]  ;;  %v820_v49 = vld [vmem:[#allocation5 + $0x1708] sm:$0xff] }
 0x183   :  { %2754 = vmatmul.f32.vlgmr.msra.gmra.mxu0 %v1765_v50  ;;  %2794 = vmatmul.f32.vlgmr.msra.gmra.mxu2 %v1767_v51  ;;  %v837_v50 = vld [vmem:[#allocation5 + $0x1790] sm:$0xff]  ;;  %1773 = vst [vmem:[#allocation1] ss:$4 sm:$0xff] %v70_v48  ;;  %v787_v51 = vld [vmem:[#allocation5 + $0x1600] sm:$0xff]  ;;  %v870_v48 = vld [vmem:[#allocation5 + $0x1898] sm:$0xff] }
 0x184   :  { %2818 = vmatpush.msrb.mxu0 %v802_v52  ;;  %2858 = vmatpush.msrb.mxu2 %v834_v53  ;;  %v804_v52 = vld [vmem:[#allocation5 + $0x1688] sm:$0xff]  ;;  %v819_v53 = vld [vmem:[#allocation5 + $0x1700] sm:$0xff] }
 0x185   :  { %2773 = vmatpush.msra.mxu1 %v739_v54  ;;  %2813 = vmatpush.msra.mxu3 %v771_v55  ;;  %v836_v54 = vld [vmem:[#allocation5 + $0x1788] sm:$0xff]  ;;  %v1769_v55 = vld.sshfl [vmem:[#allocation1 + $0x20] sm:$0xff pattern:$0x73625140] }
 0x186   :  { %2774 = vmatmul.f32.vlgmr.msra.gmra.mxu1 %v1766_v56  ;;  %2814 = vmatmul.f32.vlgmr.msra.gmra.mxu3 %v1768_v57  ;;  %v1771_v56 = vld.sshfl [vmem:[#allocation1 + $0x30] sm:$0xff pattern:$0x73625140]  ;;  %v866_v57 = vld [vmem:[#allocation5 + $0x1878] sm:$0xff] }
 0x187   :  { %2819 = vmatpush.msrb.mxu0 %v801_v58  ;;  %2838 = vmatpush.msrb.mxu1 %v818_v59  ;;  %v898_v58 = vld [vmem:[#allocation5 + $0x1978] sm:$0xff]  ;;  %v803_v59 = vld [vmem:[#allocation5 + $0x1680] sm:$0xff] }
 0x188   :  { %2859 = vmatpush.msrb.mxu2 %v833_v60  ;;  %2878 = vmatpush.msrb.mxu3 %v850_v61  ;;  %v835_v60 = vld [vmem:[#allocation5 + $0x1780] sm:$0xff]  ;;  %v1770_v61 = vld.sshfl [vmem:[#allocation1 + $0x28] sm:$0xff pattern:$0x73625140] }
 0x189   :  { %2820 = vmatpush.msrb.mxu0 %v800_v62  ;;  %2839 = vmatpush.msrb.mxu1 %v817_v63  ;;  %v1772_v62 = vld.sshfl [vmem:[#allocation1 + $0x38] sm:$0xff pattern:$0x73625140]  ;;  %v865_v63 = vld [vmem:[#allocation5 + $0x1870] sm:$0xff] }
 0x18a   :  { %2860 = vmatpush.msrb.mxu2 %v832_v0  ;;  %2879 = vmatpush.msrb.mxu3 %v849_v1  ;;  %v882_v0 = vld [vmem:[#allocation5 + $0x18f8] sm:$0xff]  ;;  %v897_v1 = vld [vmem:[#allocation5 + $0x1970] sm:$0xff] }
 0x18b   :  { %2821 = vmatpush.msrb.mxu0 %v799_v2  ;;  %2840 = vmatpush.msrb.mxu1 %v816_v3  ;;  %v914_v2 = vld [vmem:[#allocation5 + $0x19f8] sm:$0xff]  ;;  %v864_v3 = vld [vmem:[#allocation5 + $0x1868] sm:$0xff] }
 0x18c   :  { %2861 = vmatpush.msrb.mxu2 %v831_v4  ;;  %2880 = vmatpush.msrb.mxu3 %v848_v5  ;;  %v881_v4 = vld [vmem:[#allocation5 + $0x18f0] sm:$0xff]  ;;  %v896_v5 = vld [vmem:[#allocation5 + $0x1968] sm:$0xff] }
 0x18d   :  { %2822 = vmatpush.msrb.mxu0 %v798_v6  ;;  %2841 = vmatpush.msrb.mxu1 %v815_v7  ;;  %v913_v6 = vld [vmem:[#allocation5 + $0x19f0] sm:$0xff]  ;;  %v863_v7 = vld [vmem:[#allocation5 + $0x1860] sm:$0xff] }
 0x18e   :  { %2862 = vmatpush.msrb.mxu2 %v830_v8  ;;  %2881 = vmatpush.msrb.mxu3 %v847_v9  ;;  %v880_v8 = vld [vmem:[#allocation5 + $0x18e8] sm:$0xff]  ;;  %v895_v9 = vld [vmem:[#allocation5 + $0x1960] sm:$0xff] }
 0x18f   :  { %2823 = vmatpush.msrb.mxu0 %v797_v10  ;;  %2842 = vmatpush.msrb.mxu1 %v814_v11  ;;  %v912_v10 = vld [vmem:[#allocation5 + $0x19e8] sm:$0xff]  ;;  %v862_v11 = vld [vmem:[#allocation5 + $0x1858] sm:$0xff] }
 0x190   :  { %2863 = vmatpush.msrb.mxu2 %v829_v12  ;;  %2882 = vmatpush.msrb.mxu3 %v846_v13  ;;  %v879_v12 = vld [vmem:[#allocation5 + $0x18e0] sm:$0xff]  ;;  %v894_v13 = vld [vmem:[#allocation5 + $0x1958] sm:$0xff] }
 0x191   :  { %2824 = vmatpush.msrb.mxu0 %v796_v14  ;;  %2843 = vmatpush.msrb.mxu1 %v813_v15  ;;  %v911_v14 = vld [vmem:[#allocation5 + $0x19e0] sm:$0xff]  ;;  %v861_v15 = vld [vmem:[#allocation5 + $0x1850] sm:$0xff] }
 0x192   :  { %2864 = vmatpush.msrb.mxu2 %v828_v16  ;;  %2883 = vmatpush.msrb.mxu3 %v845_v17  ;;  %v878_v16 = vld [vmem:[#allocation5 + $0x18d8] sm:$0xff]  ;;  %v893_v17 = vld [vmem:[#allocation5 + $0x1950] sm:$0xff] }
 0x193   :  { %2825 = vmatpush.msrb.mxu0 %v795_v18  ;;  %2844 = vmatpush.msrb.mxu1 %v812_v19  ;;  %v910_v18 = vld [vmem:[#allocation5 + $0x19d8] sm:$0xff]  ;;  %v860_v19 = vld [vmem:[#allocation5 + $0x1848] sm:$0xff] }
 0x194   :  { %2865 = vmatpush.msrb.mxu2 %v827_v20  ;;  %2884 = vmatpush.msrb.mxu3 %v844_v21  ;;  %v877_v20 = vld [vmem:[#allocation5 + $0x18d0] sm:$0xff]  ;;  %v892_v21 = vld [vmem:[#allocation5 + $0x1948] sm:$0xff] }
 0x195   :  { %2826 = vmatpush.msrb.mxu0 %v794_v22  ;;  %2845 = vmatpush.msrb.mxu1 %v811_v23  ;;  %v909_v22 = vld [vmem:[#allocation5 + $0x19d0] sm:$0xff]  ;;  %v859_v23 = vld [vmem:[#allocation5 + $0x1840] sm:$0xff] }
 0x196   :  { %2866 = vmatpush.msrb.mxu2 %v826_v24  ;;  %2885 = vmatpush.msrb.mxu3 %v843_v25  ;;  %v876_v24 = vld [vmem:[#allocation5 + $0x18c8] sm:$0xff]  ;;  %v891_v25 = vld [vmem:[#allocation5 + $0x1940] sm:$0xff] }
 0x197   :  { %2827 = vmatpush.msrb.mxu0 %v793_v26  ;;  %2846 = vmatpush.msrb.mxu1 %v810_v27  ;;  %v908_v26 = vld [vmem:[#allocation5 + $0x19c8] sm:$0xff]  ;;  %v858_v27 = vld [vmem:[#allocation5 + $0x1838] sm:$0xff] }
 0x198   :  { %2867 = vmatpush.msrb.mxu2 %v825_v28  ;;  %2886 = vmatpush.msrb.mxu3 %v842_v29  ;;  %v875_v28 = vld [vmem:[#allocation5 + $0x18c0] sm:$0xff]  ;;  %v890_v29 = vld [vmem:[#allocation5 + $0x1938] sm:$0xff] }
 0x199   :  { %2828 = vmatpush.msrb.mxu0 %v792_v30  ;;  %2847 = vmatpush.msrb.mxu1 %v809_v31  ;;  %v907_v30 = vld [vmem:[#allocation5 + $0x19c0] sm:$0xff]  ;;  %v857_v31 = vld [vmem:[#allocation5 + $0x1830] sm:$0xff] }
 0x19a   :  { %2868 = vmatpush.msrb.mxu2 %v824_v32  ;;  %2887 = vmatpush.msrb.mxu3 %v841_v33  ;;  %v874_v32 = vld [vmem:[#allocation5 + $0x18b8] sm:$0xff]  ;;  %v889_v33 = vld [vmem:[#allocation5 + $0x1930] sm:$0xff] }
 0x19b   :  { %2829 = vmatpush.msrb.mxu0 %v791_v34  ;;  %2848 = vmatpush.msrb.mxu1 %v808_v35  ;;  %v906_v34 = vld [vmem:[#allocation5 + $0x19b8] sm:$0xff]  ;;  %v856_v35 = vld [vmem:[#allocation5 + $0x1828] sm:$0xff] }
 0x19c   :  { %2869 = vmatpush.msrb.mxu2 %v823_v36  ;;  %2888 = vmatpush.msrb.mxu3 %v840_v37  ;;  %v873_v36 = vld [vmem:[#allocation5 + $0x18b0] sm:$0xff]  ;;  %v888_v37 = vld [vmem:[#allocation5 + $0x1928] sm:$0xff] }
 0x19d   :  { %2830 = vmatpush.msrb.mxu0 %v790_v38  ;;  %2849 = vmatpush.msrb.mxu1 %v807_v39  ;;  %v905_v38 = vld [vmem:[#allocation5 + $0x19b0] sm:$0xff]  ;;  %v855_v39 = vld [vmem:[#allocation5 + $0x1820] sm:$0xff] }
 0x19e   :  { %2870 = vmatpush.msrb.mxu2 %v822_v40  ;;  %2889 = vmatpush.msrb.mxu3 %v839_v41  ;;  %v872_v40 = vld [vmem:[#allocation5 + $0x18a8] sm:$0xff]  ;;  %v887_v41 = vld [vmem:[#allocation5 + $0x1920] sm:$0xff] }
 0x19f   :  { %2831 = vmatpush.msrb.mxu0 %v789_v42  ;;  %2850 = vmatpush.msrb.mxu1 %v806_v43  ;;  %v904_v42 = vld [vmem:[#allocation5 + $0x19a8] sm:$0xff]  ;;  %v854_v43 = vld [vmem:[#allocation5 + $0x1818] sm:$0xff] }
 0x1a0   :  { %2871 = vmatpush.msrb.mxu2 %v821_v44  ;;  %2890 = vmatpush.msrb.mxu3 %v838_v45  ;;  %v871_v44 = vld [vmem:[#allocation5 + $0x18a0] sm:$0xff]  ;;  %v886_v45 = vld [vmem:[#allocation5 + $0x1918] sm:$0xff] }
 0x1a1   :  { %2832 = vmatpush.msrb.mxu0 %v788_v46  ;;  %2851 = vmatpush.msrb.mxu1 %v805_v47  ;;  %v903_v46 = vld [vmem:[#allocation5 + $0x19a0] sm:$0xff]  ;;  %v853_v47 = vld [vmem:[#allocation5 + $0x1810] sm:$0xff] }
 0x1a2   :  { %2872 = vmatpush.msrb.mxu2 %v820_v49  ;;  %2891 = vmatpush.msrb.mxu3 %v837_v50  ;;  %v885_v49 = vld [vmem:[#allocation5 + $0x1910] sm:$0xff]  ;;  %v902_v50 = vld [vmem:[#allocation5 + $0x1998] sm:$0xff] }
 0x1a3   :  { %2833 = vmatpush.msrb.mxu0 %v787_v51  ;;  %2852 = vmatpush.msrb.mxu1 %v804_v52  ;;  %v852_v51 = vld [vmem:[#allocation5 + $0x1808] sm:$0xff]  ;;  %v869_v52 = vld [vmem:[#allocation5 + $0x1890] sm:$0xff] }
 0x1a4   :  { %2873 = vmatpush.msrb.mxu2 %v819_v53  ;;  %2892 = vmatpush.msrb.mxu3 %v836_v54  ;;  %v71_v53 = vld [vmem:[#allocation2 + $0x68] sm:$0xff]  ;;  %v884_v54 = vld [vmem:[#allocation5 + $0x1908] sm:$0xff] }
 0x1a5   :  { %2834 = vmatmul.f32.vlgmr.msrb.gmra.mxu0 %v1769_v55  ;;  %2874 = vmatmul.f32.vlgmr.msrb.gmra.mxu2 %v1771_v56  ;;  %v901_v55 = vld [vmem:[#allocation5 + $0x1990] sm:$0xff]  ;;  %1774 = vst [vmem:[#allocation1 + $0x20] ss:$4 sm:$0xff] %v71_v53  ;;  %v851_v56 = vld [vmem:[#allocation5 + $0x1800] sm:$0xff]  ;;  %v934_v53 = vld [vmem:[#allocation5 + $0x1a98] sm:$0xff] }
 0x1a6   :  { %2898 = vmatpush.msra.mxu0 %v866_v57  ;;  %2938 = vmatpush.msra.mxu2 %v898_v58  ;;  %v868_v57 = vld [vmem:[#allocation5 + $0x1888] sm:$0xff]  ;;  %v883_v58 = vld [vmem:[#allocation5 + $0x1900] sm:$0xff] }
 0x1a7   :  { %2853 = vmatpush.msrb.mxu1 %v803_v59  ;;  %2893 = vmatpush.msrb.mxu3 %v835_v60  ;;  %v900_v59 = vld [vmem:[#allocation5 + $0x1988] sm:$0xff]  ;;  %v1775_v60 = vld.sshfl [vmem:[#allocation1] sm:$0xff pattern:$0x73625140] }
 0x1a8   :  { %2854 = vmatmul.f32.vlgmr.msrb.gmra.mxu1 %v1770_v61  ;;  %2894 = vmatmul.f32.vlgmr.msrb.gmra.mxu3 %v1772_v62  ;;  %v1777_v61 = vld.sshfl [vmem:[#allocation1 + $0x10] sm:$0xff pattern:$0x73625140]  ;;  %v930_v62 = vld [vmem:[#allocation5 + $0x1a78] sm:$0xff] }
 0x1a9   :  { %2899 = vmatpush.msra.mxu0 %v865_v63  ;;  %2918 = vmatpush.msra.mxu1 %v882_v0  ;;  %v962_v63 = vld [vmem:[#allocation5 + $0x1b78] sm:$0xff]  ;;  %v867_v0 = vld [vmem:[#allocation5 + $0x1880] sm:$0xff] }
 0x1aa   :  { %2939 = vmatpush.msra.mxu2 %v897_v1  ;;  %2958 = vmatpush.msra.mxu3 %v914_v2  ;;  %v899_v1 = vld [vmem:[#allocation5 + $0x1980] sm:$0xff]  ;;  %v1776_v2 = vld.sshfl [vmem:[#allocation1 + $0x8] sm:$0xff pattern:$0x73625140] }
 0x1ab   :  { %2900 = vmatpush.msra.mxu0 %v864_v3  ;;  %2919 = vmatpush.msra.mxu1 %v881_v4  ;;  %v1778_v3 = vld.sshfl [vmem:[#allocation1 + $0x18] sm:$0xff pattern:$0x73625140]  ;;  %v929_v4 = vld [vmem:[#allocation5 + $0x1a70] sm:$0xff] }
 0x1ac   :  { %2940 = vmatpush.msra.mxu2 %v896_v5  ;;  %2959 = vmatpush.msra.mxu3 %v913_v6  ;;  %v946_v5 = vld [vmem:[#allocation5 + $0x1af8] sm:$0xff]  ;;  %v961_v6 = vld [vmem:[#allocation5 + $0x1b70] sm:$0xff] }
 0x1ad   :  { %2901 = vmatpush.msra.mxu0 %v863_v7  ;;  %2920 = vmatpush.msra.mxu1 %v880_v8  ;;  %v978_v7 = vld [vmem:[#allocation5 + $0x1bf8] sm:$0xff]  ;;  %v928_v8 = vld [vmem:[#allocation5 + $0x1a68] sm:$0xff] }
 0x1ae   :  { %2941 = vmatpush.msra.mxu2 %v895_v9  ;;  %2960 = vmatpush.msra.mxu3 %v912_v10  ;;  %v945_v9 = vld [vmem:[#allocation5 + $0x1af0] sm:$0xff]  ;;  %v960_v10 = vld [vmem:[#allocation5 + $0x1b68] sm:$0xff] }
 0x1af   :  { %2902 = vmatpush.msra.mxu0 %v862_v11  ;;  %2921 = vmatpush.msra.mxu1 %v879_v12  ;;  %v977_v11 = vld [vmem:[#allocation5 + $0x1bf0] sm:$0xff]  ;;  %v927_v12 = vld [vmem:[#allocation5 + $0x1a60] sm:$0xff] }
 0x1b0   :  { %2942 = vmatpush.msra.mxu2 %v894_v13  ;;  %2961 = vmatpush.msra.mxu3 %v911_v14  ;;  %v944_v13 = vld [vmem:[#allocation5 + $0x1ae8] sm:$0xff]  ;;  %v959_v14 = vld [vmem:[#allocation5 + $0x1b60] sm:$0xff] }
 0x1b1   :  { %2903 = vmatpush.msra.mxu0 %v861_v15  ;;  %2922 = vmatpush.msra.mxu1 %v878_v16  ;;  %v976_v15 = vld [vmem:[#allocation5 + $0x1be8] sm:$0xff]  ;;  %v926_v16 = vld [vmem:[#allocation5 + $0x1a58] sm:$0xff] }
 0x1b2   :  { %2943 = vmatpush.msra.mxu2 %v893_v17  ;;  %2962 = vmatpush.msra.mxu3 %v910_v18  ;;  %v943_v17 = vld [vmem:[#allocation5 + $0x1ae0] sm:$0xff]  ;;  %v958_v18 = vld [vmem:[#allocation5 + $0x1b58] sm:$0xff] }
 0x1b3   :  { %2904 = vmatpush.msra.mxu0 %v860_v19  ;;  %2923 = vmatpush.msra.mxu1 %v877_v20  ;;  %v975_v19 = vld [vmem:[#allocation5 + $0x1be0] sm:$0xff]  ;;  %v925_v20 = vld [vmem:[#allocation5 + $0x1a50] sm:$0xff] }
 0x1b4   :  { %2944 = vmatpush.msra.mxu2 %v892_v21  ;;  %2963 = vmatpush.msra.mxu3 %v909_v22  ;;  %v942_v21 = vld [vmem:[#allocation5 + $0x1ad8] sm:$0xff]  ;;  %v957_v22 = vld [vmem:[#allocation5 + $0x1b50] sm:$0xff] }
 0x1b5   :  { %2905 = vmatpush.msra.mxu0 %v859_v23  ;;  %2924 = vmatpush.msra.mxu1 %v876_v24  ;;  %v974_v23 = vld [vmem:[#allocation5 + $0x1bd8] sm:$0xff]  ;;  %v924_v24 = vld [vmem:[#allocation5 + $0x1a48] sm:$0xff] }
 0x1b6   :  { %2945 = vmatpush.msra.mxu2 %v891_v25  ;;  %2964 = vmatpush.msra.mxu3 %v908_v26  ;;  %v941_v25 = vld [vmem:[#allocation5 + $0x1ad0] sm:$0xff]  ;;  %v956_v26 = vld [vmem:[#allocation5 + $0x1b48] sm:$0xff] }
 0x1b7   :  { %2906 = vmatpush.msra.mxu0 %v858_v27  ;;  %2925 = vmatpush.msra.mxu1 %v875_v28  ;;  %v973_v27 = vld [vmem:[#allocation5 + $0x1bd0] sm:$0xff]  ;;  %v923_v28 = vld [vmem:[#allocation5 + $0x1a40] sm:$0xff] }
 0x1b8   :  { %2946 = vmatpush.msra.mxu2 %v890_v29  ;;  %2965 = vmatpush.msra.mxu3 %v907_v30  ;;  %v940_v29 = vld [vmem:[#allocation5 + $0x1ac8] sm:$0xff]  ;;  %v955_v30 = vld [vmem:[#allocation5 + $0x1b40] sm:$0xff] }
 0x1b9   :  { %2907 = vmatpush.msra.mxu0 %v857_v31  ;;  %2926 = vmatpush.msra.mxu1 %v874_v32  ;;  %v972_v31 = vld [vmem:[#allocation5 + $0x1bc8] sm:$0xff]  ;;  %v922_v32 = vld [vmem:[#allocation5 + $0x1a38] sm:$0xff] }
 0x1ba   :  { %2947 = vmatpush.msra.mxu2 %v889_v33  ;;  %2966 = vmatpush.msra.mxu3 %v906_v34  ;;  %v939_v33 = vld [vmem:[#allocation5 + $0x1ac0] sm:$0xff]  ;;  %v954_v34 = vld [vmem:[#allocation5 + $0x1b38] sm:$0xff] }
 0x1bb   :  { %2908 = vmatpush.msra.mxu0 %v856_v35  ;;  %2927 = vmatpush.msra.mxu1 %v873_v36  ;;  %v971_v35 = vld [vmem:[#allocation5 + $0x1bc0] sm:$0xff]  ;;  %v921_v36 = vld [vmem:[#allocation5 + $0x1a30] sm:$0xff] }
 0x1bc   :  { %2948 = vmatpush.msra.mxu2 %v888_v37  ;;  %2967 = vmatpush.msra.mxu3 %v905_v38  ;;  %v938_v37 = vld [vmem:[#allocation5 + $0x1ab8] sm:$0xff]  ;;  %v953_v38 = vld [vmem:[#allocation5 + $0x1b30] sm:$0xff] }
 0x1bd   :  { %2909 = vmatpush.msra.mxu0 %v855_v39  ;;  %2928 = vmatpush.msra.mxu1 %v872_v40  ;;  %v970_v39 = vld [vmem:[#allocation5 + $0x1bb8] sm:$0xff]  ;;  %v920_v40 = vld [vmem:[#allocation5 + $0x1a28] sm:$0xff] }
 0x1be   :  { %2949 = vmatpush.msra.mxu2 %v887_v41  ;;  %2968 = vmatpush.msra.mxu3 %v904_v42  ;;  %v937_v41 = vld [vmem:[#allocation5 + $0x1ab0] sm:$0xff]  ;;  %v952_v42 = vld [vmem:[#allocation5 + $0x1b28] sm:$0xff] }
 0x1bf   :  { %2910 = vmatpush.msra.mxu0 %v854_v43  ;;  %2929 = vmatpush.msra.mxu1 %v871_v44  ;;  %v969_v43 = vld [vmem:[#allocation5 + $0x1bb0] sm:$0xff]  ;;  %v919_v44 = vld [vmem:[#allocation5 + $0x1a20] sm:$0xff] }
 0x1c0   :  { %2950 = vmatpush.msra.mxu2 %v886_v45  ;;  %2969 = vmatpush.msra.mxu3 %v903_v46  ;;  %v936_v45 = vld [vmem:[#allocation5 + $0x1aa8] sm:$0xff]  ;;  %v951_v46 = vld [vmem:[#allocation5 + $0x1b20] sm:$0xff] }
 0x1c1   :  { %2911 = vmatpush.msra.mxu0 %v853_v47  ;;  %2930 = vmatpush.msra.mxu1 %v870_v48  ;;  %v968_v47 = vld [vmem:[#allocation5 + $0x1ba8] sm:$0xff]  ;;  %v918_v48 = vld [vmem:[#allocation5 + $0x1a18] sm:$0xff] }
 0x1c2   :  { %2951 = vmatpush.msra.mxu2 %v885_v49  ;;  %2970 = vmatpush.msra.mxu3 %v902_v50  ;;  %v935_v49 = vld [vmem:[#allocation5 + $0x1aa0] sm:$0xff]  ;;  %v950_v50 = vld [vmem:[#allocation5 + $0x1b18] sm:$0xff] }
 0x1c3   :  { %2912 = vmatpush.msra.mxu0 %v852_v51  ;;  %2931 = vmatpush.msra.mxu1 %v869_v52  ;;  %v967_v51 = vld [vmem:[#allocation5 + $0x1ba0] sm:$0xff]  ;;  %v917_v52 = vld [vmem:[#allocation5 + $0x1a10] sm:$0xff] }
 0x1c4   :  { %2952 = vmatpush.msra.mxu2 %v884_v54  ;;  %2971 = vmatpush.msra.mxu3 %v901_v55  ;;  %v949_v54 = vld [vmem:[#allocation5 + $0x1b10] sm:$0xff]  ;;  %v966_v55 = vld [vmem:[#allocation5 + $0x1b98] sm:$0xff] }
 0x1c5   :  { %2913 = vmatpush.msra.mxu0 %v851_v56  ;;  %2932 = vmatpush.msra.mxu1 %v868_v57  ;;  %v916_v56 = vld [vmem:[#allocation5 + $0x1a08] sm:$0xff]  ;;  %v933_v57 = vld [vmem:[#allocation5 + $0x1a90] sm:$0xff] }
 0x1c6   :  { %2953 = vmatpush.msra.mxu2 %v883_v58  ;;  %2972 = vmatpush.msra.mxu3 %v900_v59  ;;  %v72_v58 = vld [vmem:[#allocation2 + $0x70] sm:$0xff] }
 0x1c7   :  { %2914 = vmatmul.f32.vlgmr.msra.gmra.mxu0 %v1775_v60  ;;  %2954 = vmatmul.f32.vlgmr.msra.gmra.mxu2 %v1777_v61  ;;  %v948_v59 = vld [vmem:[#allocation5 + $0x1b08] sm:$0xff]  ;;  %v965_v60 = vld [vmem:[#allocation5 + $0x1b90] sm:$0xff]  ;;  %1783 = vst [vmem:[#allocation1] ss:$4 sm:$0xff] %v72_v58  ;;  %v915_v61 = vld [vmem:[#allocation5 + $0x1a00] sm:$0xff] }
 0x1c8   :  { %2978 = vmatpush.msrb.mxu0 %v930_v62  ;;  %3018 = vmatpush.msrb.mxu2 %v962_v63  ;;  %v932_v62 = vld [vmem:[#allocation5 + $0x1a88] sm:$0xff]  ;;  %v947_v63 = vld [vmem:[#allocation5 + $0x1b00] sm:$0xff]  ;;  %v998_v58 = vld [vmem:[#allocation5 + $0x1c98] sm:$0xff] }
 0x1c9   :  { %2933 = vmatpush.msra.mxu1 %v867_v0  ;;  %2973 = vmatpush.msra.mxu3 %v899_v1  ;;  %v964_v0 = vld [vmem:[#allocation5 + $0x1b88] sm:$0xff]  ;;  %v1779_v1 = vld.sshfl [vmem:[#allocation1 + $0x20] sm:$0xff pattern:$0x73625140] }
 0x1ca   :  { %2934 = vmatmul.f32.vlgmr.msra.gmra.mxu1 %v1776_v2  ;;  %2974 = vmatmul.f32.vlgmr.msra.gmra.mxu3 %v1778_v3  ;;  %v1781_v2 = vld.sshfl [vmem:[#allocation1 + $0x30] sm:$0xff pattern:$0x73625140]  ;;  %v994_v3 = vld [vmem:[#allocation5 + $0x1c78] sm:$0xff] }
 0x1cb   :  { %2979 = vmatpush.msrb.mxu0 %v929_v4  ;;  %2998 = vmatpush.msrb.mxu1 %v946_v5  ;;  %v1026_v4 = vld [vmem:[#allocation5 + $0x1d78] sm:$0xff]  ;;  %v931_v5 = vld [vmem:[#allocation5 + $0x1a80] sm:$0xff] }
 0x1cc   :  { %3019 = vmatpush.msrb.mxu2 %v961_v6  ;;  %3038 = vmatpush.msrb.mxu3 %v978_v7  ;;  %v963_v6 = vld [vmem:[#allocation5 + $0x1b80] sm:$0xff]  ;;  %v1780_v7 = vld.sshfl [vmem:[#allocation1 + $0x28] sm:$0xff pattern:$0x73625140] }
 0x1cd   :  { %2980 = vmatpush.msrb.mxu0 %v928_v8  ;;  %2999 = vmatpush.msrb.mxu1 %v945_v9  ;;  %v1782_v8 = vld.sshfl [vmem:[#allocation1 + $0x38] sm:$0xff pattern:$0x73625140]  ;;  %v993_v9 = vld [vmem:[#allocation5 + $0x1c70] sm:$0xff] }
 0x1ce   :  { %3020 = vmatpush.msrb.mxu2 %v960_v10  ;;  %3039 = vmatpush.msrb.mxu3 %v977_v11  ;;  %v1010_v10 = vld [vmem:[#allocation5 + $0x1cf8] sm:$0xff]  ;;  %v1025_v11 = vld [vmem:[#allocation5 + $0x1d70] sm:$0xff] }
 0x1cf   :  { %2981 = vmatpush.msrb.mxu0 %v927_v12  ;;  %3000 = vmatpush.msrb.mxu1 %v944_v13  ;;  %v1042_v12 = vld [vmem:[#allocation5 + $0x1df8] sm:$0xff]  ;;  %v992_v13 = vld [vmem:[#allocation5 + $0x1c68] sm:$0xff] }
 0x1d0   :  { %3021 = vmatpush.msrb.mxu2 %v959_v14  ;;  %3040 = vmatpush.msrb.mxu3 %v976_v15  ;;  %v1009_v14 = vld [vmem:[#allocation5 + $0x1cf0] sm:$0xff]  ;;  %v1024_v15 = vld [vmem:[#allocation5 + $0x1d68] sm:$0xff] }
 0x1d1   :  { %2982 = vmatpush.msrb.mxu0 %v926_v16  ;;  %3001 = vmatpush.msrb.mxu1 %v943_v17  ;;  %v1041_v16 = vld [vmem:[#allocation5 + $0x1df0] sm:$0xff]  ;;  %v991_v17 = vld [vmem:[#allocation5 + $0x1c60] sm:$0xff] }
 0x1d2   :  { %3022 = vmatpush.msrb.mxu2 %v958_v18  ;;  %3041 = vmatpush.msrb.mxu3 %v975_v19  ;;  %v1008_v18 = vld [vmem:[#allocation5 + $0x1ce8] sm:$0xff]  ;;  %v1023_v19 = vld [vmem:[#allocation5 + $0x1d60] sm:$0xff] }
 0x1d3   :  { %2983 = vmatpush.msrb.mxu0 %v925_v20  ;;  %3002 = vmatpush.msrb.mxu1 %v942_v21  ;;  %v1040_v20 = vld [vmem:[#allocation5 + $0x1de8] sm:$0xff]  ;;  %v990_v21 = vld [vmem:[#allocation5 + $0x1c58] sm:$0xff] }
 0x1d4   :  { %3023 = vmatpush.msrb.mxu2 %v957_v22  ;;  %3042 = vmatpush.msrb.mxu3 %v974_v23  ;;  %v1007_v22 = vld [vmem:[#allocation5 + $0x1ce0] sm:$0xff]  ;;  %v1022_v23 = vld [vmem:[#allocation5 + $0x1d58] sm:$0xff] }
 0x1d5   :  { %2984 = vmatpush.msrb.mxu0 %v924_v24  ;;  %3003 = vmatpush.msrb.mxu1 %v941_v25  ;;  %v1039_v24 = vld [vmem:[#allocation5 + $0x1de0] sm:$0xff]  ;;  %v989_v25 = vld [vmem:[#allocation5 + $0x1c50] sm:$0xff] }
 0x1d6   :  { %3024 = vmatpush.msrb.mxu2 %v956_v26  ;;  %3043 = vmatpush.msrb.mxu3 %v973_v27  ;;  %v1006_v26 = vld [vmem:[#allocation5 + $0x1cd8] sm:$0xff]  ;;  %v1021_v27 = vld [vmem:[#allocation5 + $0x1d50] sm:$0xff] }
 0x1d7   :  { %2985 = vmatpush.msrb.mxu0 %v923_v28  ;;  %3004 = vmatpush.msrb.mxu1 %v940_v29  ;;  %v1038_v28 = vld [vmem:[#allocation5 + $0x1dd8] sm:$0xff]  ;;  %v988_v29 = vld [vmem:[#allocation5 + $0x1c48] sm:$0xff] }
 0x1d8   :  { %3025 = vmatpush.msrb.mxu2 %v955_v30  ;;  %3044 = vmatpush.msrb.mxu3 %v972_v31  ;;  %v1005_v30 = vld [vmem:[#allocation5 + $0x1cd0] sm:$0xff]  ;;  %v1020_v31 = vld [vmem:[#allocation5 + $0x1d48] sm:$0xff] }
 0x1d9   :  { %2986 = vmatpush.msrb.mxu0 %v922_v32  ;;  %3005 = vmatpush.msrb.mxu1 %v939_v33  ;;  %v1037_v32 = vld [vmem:[#allocation5 + $0x1dd0] sm:$0xff]  ;;  %v987_v33 = vld [vmem:[#allocation5 + $0x1c40] sm:$0xff] }
 0x1da   :  { %3026 = vmatpush.msrb.mxu2 %v954_v34  ;;  %3045 = vmatpush.msrb.mxu3 %v971_v35  ;;  %v1004_v34 = vld [vmem:[#allocation5 + $0x1cc8] sm:$0xff]  ;;  %v1019_v35 = vld [vmem:[#allocation5 + $0x1d40] sm:$0xff] }
 0x1db   :  { %2987 = vmatpush.msrb.mxu0 %v921_v36  ;;  %3006 = vmatpush.msrb.mxu1 %v938_v37  ;;  %v1036_v36 = vld [vmem:[#allocation5 + $0x1dc8] sm:$0xff]  ;;  %v986_v37 = vld [vmem:[#allocation5 + $0x1c38] sm:$0xff] }
 0x1dc   :  { %3027 = vmatpush.msrb.mxu2 %v953_v38  ;;  %3046 = vmatpush.msrb.mxu3 %v970_v39  ;;  %v1003_v38 = vld [vmem:[#allocation5 + $0x1cc0] sm:$0xff]  ;;  %v1018_v39 = vld [vmem:[#allocation5 + $0x1d38] sm:$0xff] }
 0x1dd   :  { %2988 = vmatpush.msrb.mxu0 %v920_v40  ;;  %3007 = vmatpush.msrb.mxu1 %v937_v41  ;;  %v1035_v40 = vld [vmem:[#allocation5 + $0x1dc0] sm:$0xff]  ;;  %v985_v41 = vld [vmem:[#allocation5 + $0x1c30] sm:$0xff] }
 0x1de   :  { %3028 = vmatpush.msrb.mxu2 %v952_v42  ;;  %3047 = vmatpush.msrb.mxu3 %v969_v43  ;;  %v1002_v42 = vld [vmem:[#allocation5 + $0x1cb8] sm:$0xff]  ;;  %v1017_v43 = vld [vmem:[#allocation5 + $0x1d30] sm:$0xff] }
 0x1df   :  { %2989 = vmatpush.msrb.mxu0 %v919_v44  ;;  %3008 = vmatpush.msrb.mxu1 %v936_v45  ;;  %v1034_v44 = vld [vmem:[#allocation5 + $0x1db8] sm:$0xff]  ;;  %v984_v45 = vld [vmem:[#allocation5 + $0x1c28] sm:$0xff] }
 0x1e0   :  { %3029 = vmatpush.msrb.mxu2 %v951_v46  ;;  %3048 = vmatpush.msrb.mxu3 %v968_v47  ;;  %v1001_v46 = vld [vmem:[#allocation5 + $0x1cb0] sm:$0xff]  ;;  %v1016_v47 = vld [vmem:[#allocation5 + $0x1d28] sm:$0xff] }
 0x1e1   :  { %2990 = vmatpush.msrb.mxu0 %v918_v48  ;;  %3009 = vmatpush.msrb.mxu1 %v935_v49  ;;  %v1033_v48 = vld [vmem:[#allocation5 + $0x1db0] sm:$0xff]  ;;  %v983_v49 = vld [vmem:[#allocation5 + $0x1c20] sm:$0xff] }
 0x1e2   :  { %3030 = vmatpush.msrb.mxu2 %v950_v50  ;;  %3049 = vmatpush.msrb.mxu3 %v967_v51  ;;  %v1000_v50 = vld [vmem:[#allocation5 + $0x1ca8] sm:$0xff]  ;;  %v1015_v51 = vld [vmem:[#allocation5 + $0x1d20] sm:$0xff] }
 0x1e3   :  { %2991 = vmatpush.msrb.mxu0 %v917_v52  ;;  %3010 = vmatpush.msrb.mxu1 %v934_v53  ;;  %v1032_v52 = vld [vmem:[#allocation5 + $0x1da8] sm:$0xff]  ;;  %v982_v53 = vld [vmem:[#allocation5 + $0x1c18] sm:$0xff] }
 0x1e4   :  { %3031 = vmatpush.msrb.mxu2 %v949_v54  ;;  %3050 = vmatpush.msrb.mxu3 %v966_v55  ;;  %v999_v54 = vld [vmem:[#allocation5 + $0x1ca0] sm:$0xff]  ;;  %v1014_v55 = vld [vmem:[#allocation5 + $0x1d18] sm:$0xff] }
 0x1e5   :  { %2992 = vmatpush.msrb.mxu0 %v916_v56  ;;  %3011 = vmatpush.msrb.mxu1 %v933_v57  ;;  %v1031_v56 = vld [vmem:[#allocation5 + $0x1da0] sm:$0xff]  ;;  %v981_v57 = vld [vmem:[#allocation5 + $0x1c10] sm:$0xff] }
 0x1e6   :  { %3032 = vmatpush.msrb.mxu2 %v948_v59  ;;  %3051 = vmatpush.msrb.mxu3 %v965_v60  ;;  %v1013_v59 = vld [vmem:[#allocation5 + $0x1d10] sm:$0xff]  ;;  %v1030_v60 = vld [vmem:[#allocation5 + $0x1d98] sm:$0xff] }
 0x1e7   :  { %2993 = vmatpush.msrb.mxu0 %v915_v61  ;;  %3012 = vmatpush.msrb.mxu1 %v932_v62  ;;  %v980_v61 = vld [vmem:[#allocation5 + $0x1c08] sm:$0xff]  ;;  %v997_v62 = vld [vmem:[#allocation5 + $0x1c90] sm:$0xff] }
 0x1e8   :  { %3033 = vmatpush.msrb.mxu2 %v947_v63  ;;  %3052 = vmatpush.msrb.mxu3 %v964_v0  ;;  %v73_v63 = vld [vmem:[#allocation2 + $0x78] sm:$0xff]  ;;  %v1012_v0 = vld [vmem:[#allocation5 + $0x1d08] sm:$0xff] }
 0x1e9   :  { %2994 = vmatmul.f32.vlgmr.msrb.gmra.mxu0 %v1779_v1  ;;  %3034 = vmatmul.f32.vlgmr.msrb.gmra.mxu2 %v1781_v2  ;;  %v1029_v1 = vld [vmem:[#allocation5 + $0x1d90] sm:$0xff]  ;;  %1784 = vst [vmem:[#allocation1 + $0x20] ss:$4 sm:$0xff] %v73_v63  ;;  %v979_v2 = vld [vmem:[#allocation5 + $0x1c00] sm:$0xff]  ;;  %v1062_v63 = vld [vmem:[#allocation5 + $0x1e98] sm:$0xff] }
 0x1ea   :  { %3058 = vmatpush.msra.mxu0 %v994_v3  ;;  %3098 = vmatpush.msra.mxu2 %v1026_v4  ;;  %v996_v3 = vld [vmem:[#allocation5 + $0x1c88] sm:$0xff]  ;;  %v1011_v4 = vld [vmem:[#allocation5 + $0x1d00] sm:$0xff] }
 0x1eb   :  { %3013 = vmatpush.msrb.mxu1 %v931_v5  ;;  %3053 = vmatpush.msrb.mxu3 %v963_v6  ;;  %v1028_v5 = vld [vmem:[#allocation5 + $0x1d88] sm:$0xff]  ;;  %v1785_v6 = vld.sshfl [vmem:[#allocation1] sm:$0xff pattern:$0x73625140] }
 0x1ec   :  { %3014 = vmatmul.f32.vlgmr.msrb.gmra.mxu1 %v1780_v7  ;;  %3054 = vmatmul.f32.vlgmr.msrb.gmra.mxu3 %v1782_v8  ;;  %v1787_v7 = vld.sshfl [vmem:[#allocation1 + $0x10] sm:$0xff pattern:$0x73625140]  ;;  %v1058_v8 = vld [vmem:[#allocation5 + $0x1e78] sm:$0xff] }
 0x1ed   :  { %3059 = vmatpush.msra.mxu0 %v993_v9  ;;  %3078 = vmatpush.msra.mxu1 %v1010_v10  ;;  %v1090_v9 = vld [vmem:[#allocation5 + $0x1f78] sm:$0xff]  ;;  %v995_v10 = vld [vmem:[#allocation5 + $0x1c80] sm:$0xff] }
 0x1ee   :  { %3099 = vmatpush.msra.mxu2 %v1025_v11  ;;  %3118 = vmatpush.msra.mxu3 %v1042_v12  ;;  %v1027_v11 = vld [vmem:[#allocation5 + $0x1d80] sm:$0xff]  ;;  %v1786_v12 = vld.sshfl [vmem:[#allocation1 + $0x8] sm:$0xff pattern:$0x73625140] }
 0x1ef   :  { %3060 = vmatpush.msra.mxu0 %v992_v13  ;;  %3079 = vmatpush.msra.mxu1 %v1009_v14  ;;  %v1788_v13 = vld.sshfl [vmem:[#allocation1 + $0x18] sm:$0xff pattern:$0x73625140]  ;;  %v1057_v14 = vld [vmem:[#allocation5 + $0x1e70] sm:$0xff] }
 0x1f0   :  { %3100 = vmatpush.msra.mxu2 %v1024_v15  ;;  %3119 = vmatpush.msra.mxu3 %v1041_v16  ;;  %v1074_v15 = vld [vmem:[#allocation5 + $0x1ef8] sm:$0xff]  ;;  %v1089_v16 = vld [vmem:[#allocation5 + $0x1f70] sm:$0xff] }
 0x1f1   :  { %3061 = vmatpush.msra.mxu0 %v991_v17  ;;  %3080 = vmatpush.msra.mxu1 %v1008_v18  ;;  %v1106_v17 = vld [vmem:[#allocation5 + $0x1ff8] sm:$0xff]  ;;  %v1056_v18 = vld [vmem:[#allocation5 + $0x1e68] sm:$0xff] }
 0x1f2   :  { %3101 = vmatpush.msra.mxu2 %v1023_v19  ;;  %3120 = vmatpush.msra.mxu3 %v1040_v20  ;;  %v1073_v19 = vld [vmem:[#allocation5 + $0x1ef0] sm:$0xff]  ;;  %v1088_v20 = vld [vmem:[#allocation5 + $0x1f68] sm:$0xff] }
 0x1f3   :  { %3062 = vmatpush.msra.mxu0 %v990_v21  ;;  %3081 = vmatpush.msra.mxu1 %v1007_v22  ;;  %v1105_v21 = vld [vmem:[#allocation5 + $0x1ff0] sm:$0xff]  ;;  %v1055_v22 = vld [vmem:[#allocation5 + $0x1e60] sm:$0xff] }
 0x1f4   :  { %3102 = vmatpush.msra.mxu2 %v1022_v23  ;;  %3121 = vmatpush.msra.mxu3 %v1039_v24  ;;  %v1072_v23 = vld [vmem:[#allocation5 + $0x1ee8] sm:$0xff]  ;;  %v1087_v24 = vld [vmem:[#allocation5 + $0x1f60] sm:$0xff] }
 0x1f5   :  { %3063 = vmatpush.msra.mxu0 %v989_v25  ;;  %3082 = vmatpush.msra.mxu1 %v1006_v26  ;;  %v1104_v25 = vld [vmem:[#allocation5 + $0x1fe8] sm:$0xff]  ;;  %v1054_v26 = vld [vmem:[#allocation5 + $0x1e58] sm:$0xff] }
 0x1f6   :  { %3103 = vmatpush.msra.mxu2 %v1021_v27  ;;  %3122 = vmatpush.msra.mxu3 %v1038_v28  ;;  %v1071_v27 = vld [vmem:[#allocation5 + $0x1ee0] sm:$0xff]  ;;  %v1086_v28 = vld [vmem:[#allocation5 + $0x1f58] sm:$0xff] }
 0x1f7   :  { %3064 = vmatpush.msra.mxu0 %v988_v29  ;;  %3083 = vmatpush.msra.mxu1 %v1005_v30  ;;  %v1103_v29 = vld [vmem:[#allocation5 + $0x1fe0] sm:$0xff]  ;;  %v1053_v30 = vld [vmem:[#allocation5 + $0x1e50] sm:$0xff] }
 0x1f8   :  { %3104 = vmatpush.msra.mxu2 %v1020_v31  ;;  %3123 = vmatpush.msra.mxu3 %v1037_v32  ;;  %v1070_v31 = vld [vmem:[#allocation5 + $0x1ed8] sm:$0xff]  ;;  %v1085_v32 = vld [vmem:[#allocation5 + $0x1f50] sm:$0xff] }
 0x1f9   :  { %3065 = vmatpush.msra.mxu0 %v987_v33  ;;  %3084 = vmatpush.msra.mxu1 %v1004_v34  ;;  %v1102_v33 = vld [vmem:[#allocation5 + $0x1fd8] sm:$0xff]  ;;  %v1052_v34 = vld [vmem:[#allocation5 + $0x1e48] sm:$0xff] }
 0x1fa   :  { %3105 = vmatpush.msra.mxu2 %v1019_v35  ;;  %3124 = vmatpush.msra.mxu3 %v1036_v36  ;;  %v1069_v35 = vld [vmem:[#allocation5 + $0x1ed0] sm:$0xff]  ;;  %v1084_v36 = vld [vmem:[#allocation5 + $0x1f48] sm:$0xff] }
 0x1fb   :  { %3066 = vmatpush.msra.mxu0 %v986_v37  ;;  %3085 = vmatpush.msra.mxu1 %v1003_v38  ;;  %v1101_v37 = vld [vmem:[#allocation5 + $0x1fd0] sm:$0xff]  ;;  %v1051_v38 = vld [vmem:[#allocation5 + $0x1e40] sm:$0xff] }
 0x1fc   :  { %3106 = vmatpush.msra.mxu2 %v1018_v39  ;;  %3125 = vmatpush.msra.mxu3 %v1035_v40  ;;  %v1068_v39 = vld [vmem:[#allocation5 + $0x1ec8] sm:$0xff]  ;;  %v1083_v40 = vld [vmem:[#allocation5 + $0x1f40] sm:$0xff] }
 0x1fd   :  { %3067 = vmatpush.msra.mxu0 %v985_v41  ;;  %3086 = vmatpush.msra.mxu1 %v1002_v42  ;;  %v1100_v41 = vld [vmem:[#allocation5 + $0x1fc8] sm:$0xff]  ;;  %v1050_v42 = vld [vmem:[#allocation5 + $0x1e38] sm:$0xff] }
 0x1fe   :  { %3107 = vmatpush.msra.mxu2 %v1017_v43  ;;  %3126 = vmatpush.msra.mxu3 %v1034_v44  ;;  %v1067_v43 = vld [vmem:[#allocation5 + $0x1ec0] sm:$0xff]  ;;  %v1082_v44 = vld [vmem:[#allocation5 + $0x1f38] sm:$0xff] }
 0x1ff   :  { %3068 = vmatpush.msra.mxu0 %v984_v45  ;;  %3087 = vmatpush.msra.mxu1 %v1001_v46  ;;  %v1099_v45 = vld [vmem:[#allocation5 + $0x1fc0] sm:$0xff]  ;;  %v1049_v46 = vld [vmem:[#allocation5 + $0x1e30] sm:$0xff] }
 0x200   :  { %3108 = vmatpush.msra.mxu2 %v1016_v47  ;;  %3127 = vmatpush.msra.mxu3 %v1033_v48  ;;  %v1066_v47 = vld [vmem:[#allocation5 + $0x1eb8] sm:$0xff]  ;;  %v1081_v48 = vld [vmem:[#allocation5 + $0x1f30] sm:$0xff] }
 0x201   :  { %3069 = vmatpush.msra.mxu0 %v983_v49  ;;  %3088 = vmatpush.msra.mxu1 %v1000_v50  ;;  %v1098_v49 = vld [vmem:[#allocation5 + $0x1fb8] sm:$0xff]  ;;  %v1048_v50 = vld [vmem:[#allocation5 + $0x1e28] sm:$0xff] }
 0x202   :  { %3109 = vmatpush.msra.mxu2 %v1015_v51  ;;  %3128 = vmatpush.msra.mxu3 %v1032_v52  ;;  %v1065_v51 = vld [vmem:[#allocation5 + $0x1eb0] sm:$0xff]  ;;  %v1080_v52 = vld [vmem:[#allocation5 + $0x1f28] sm:$0xff] }
 0x203   :  { %3070 = vmatpush.msra.mxu0 %v982_v53  ;;  %3089 = vmatpush.msra.mxu1 %v999_v54  ;;  %v1097_v53 = vld [vmem:[#allocation5 + $0x1fb0] sm:$0xff]  ;;  %v1047_v54 = vld [vmem:[#allocation5 + $0x1e20] sm:$0xff] }
 0x204   :  { %3110 = vmatpush.msra.mxu2 %v1014_v55  ;;  %3129 = vmatpush.msra.mxu3 %v1031_v56  ;;  %v1064_v55 = vld [vmem:[#allocation5 + $0x1ea8] sm:$0xff]  ;;  %v1079_v56 = vld [vmem:[#allocation5 + $0x1f20] sm:$0xff] }
 0x205   :  { %3071 = vmatpush.msra.mxu0 %v981_v57  ;;  %3090 = vmatpush.msra.mxu1 %v998_v58  ;;  %v1096_v57 = vld [vmem:[#allocation5 + $0x1fa8] sm:$0xff]  ;;  %v1046_v58 = vld [vmem:[#allocation5 + $0x1e18] sm:$0xff] }
 0x206   :  { %3111 = vmatpush.msra.mxu2 %v1013_v59  ;;  %3130 = vmatpush.msra.mxu3 %v1030_v60  ;;  %v1063_v59 = vld [vmem:[#allocation5 + $0x1ea0] sm:$0xff]  ;;  %v1078_v60 = vld [vmem:[#allocation5 + $0x1f18] sm:$0xff] }
 0x207   :  { %3072 = vmatpush.msra.mxu0 %v980_v61  ;;  %3091 = vmatpush.msra.mxu1 %v997_v62  ;;  %v1095_v61 = vld [vmem:[#allocation5 + $0x1fa0] sm:$0xff]  ;;  %v1045_v62 = vld [vmem:[#allocation5 + $0x1e10] sm:$0xff] }
 0x208   :  { %3112 = vmatpush.msra.mxu2 %v1012_v0  ;;  %3131 = vmatpush.msra.mxu3 %v1029_v1  ;;  %v1077_v0 = vld [vmem:[#allocation5 + $0x1f10] sm:$0xff]  ;;  %v1094_v1 = vld [vmem:[#allocation5 + $0x1f98] sm:$0xff] }
 0x209   :  { %3073 = vmatpush.msra.mxu0 %v979_v2  ;;  %3092 = vmatpush.msra.mxu1 %v996_v3  ;;  %v1044_v2 = vld [vmem:[#allocation5 + $0x1e08] sm:$0xff]  ;;  %v1061_v3 = vld [vmem:[#allocation5 + $0x1e90] sm:$0xff] }
 0x20a   :  { %3113 = vmatpush.msra.mxu2 %v1011_v4  ;;  %3132 = vmatpush.msra.mxu3 %v1028_v5  ;;  %v74_v4 = vld [vmem:[#allocation2 + $0x80] sm:$0xff]  ;;  %v1076_v5 = vld [vmem:[#allocation5 + $0x1f08] sm:$0xff] }
 0x20b   :  { %3074 = vmatmul.f32.vlgmr.msra.gmra.mxu0 %v1785_v6  ;;  %3114 = vmatmul.f32.vlgmr.msra.gmra.mxu2 %v1787_v7  ;;  %v1093_v6 = vld [vmem:[#allocation5 + $0x1f90] sm:$0xff]  ;;  %1793 = vst [vmem:[#allocation1] ss:$4 sm:$0xff] %v74_v4  ;;  %v1043_v7 = vld [vmem:[#allocation5 + $0x1e00] sm:$0xff]  ;;  %v1126_v4 = vld [vmem:[#allocation5 + $0x2098] sm:$0xff] }
 0x20c   :  { %3138 = vmatpush.msrb.mxu0 %v1058_v8  ;;  %3178 = vmatpush.msrb.mxu2 %v1090_v9  ;;  %v1060_v8 = vld [vmem:[#allocation5 + $0x1e88] sm:$0xff]  ;;  %v1075_v9 = vld [vmem:[#allocation5 + $0x1f00] sm:$0xff] }
 0x20d   :  { %3093 = vmatpush.msra.mxu1 %v995_v10  ;;  %3133 = vmatpush.msra.mxu3 %v1027_v11  ;;  %v1092_v10 = vld [vmem:[#allocation5 + $0x1f88] sm:$0xff]  ;;  %v1789_v11 = vld.sshfl [vmem:[#allocation1 + $0x20] sm:$0xff pattern:$0x73625140] }
 0x20e   :  { %3094 = vmatmul.f32.vlgmr.msra.gmra.mxu1 %v1786_v12  ;;  %3134 = vmatmul.f32.vlgmr.msra.gmra.mxu3 %v1788_v13  ;;  %v1791_v12 = vld.sshfl [vmem:[#allocation1 + $0x30] sm:$0xff pattern:$0x73625140]  ;;  %v1122_v13 = vld [vmem:[#allocation5 + $0x2078] sm:$0xff] }
 0x20f   :  { %3139 = vmatpush.msrb.mxu0 %v1057_v14  ;;  %3158 = vmatpush.msrb.mxu1 %v1074_v15  ;;  %v1154_v14 = vld [vmem:[#allocation5 + $0x2178] sm:$0xff]  ;;  %v1059_v15 = vld [vmem:[#allocation5 + $0x1e80] sm:$0xff] }
 0x210   :  { %3179 = vmatpush.msrb.mxu2 %v1089_v16  ;;  %3198 = vmatpush.msrb.mxu3 %v1106_v17  ;;  %v1091_v16 = vld [vmem:[#allocation5 + $0x1f80] sm:$0xff]  ;;  %v1790_v17 = vld.sshfl [vmem:[#allocation1 + $0x28] sm:$0xff pattern:$0x73625140] }
 0x211   :  { %3140 = vmatpush.msrb.mxu0 %v1056_v18  ;;  %3159 = vmatpush.msrb.mxu1 %v1073_v19  ;;  %v1792_v18 = vld.sshfl [vmem:[#allocation1 + $0x38] sm:$0xff pattern:$0x73625140]  ;;  %v1121_v19 = vld [vmem:[#allocation5 + $0x2070] sm:$0xff] }
 0x212   :  { %3180 = vmatpush.msrb.mxu2 %v1088_v20  ;;  %3199 = vmatpush.msrb.mxu3 %v1105_v21  ;;  %v1138_v20 = vld [vmem:[#allocation5 + $0x20f8] sm:$0xff]  ;;  %v1153_v21 = vld [vmem:[#allocation5 + $0x2170] sm:$0xff] }
 0x213   :  { %3141 = vmatpush.msrb.mxu0 %v1055_v22  ;;  %3160 = vmatpush.msrb.mxu1 %v1072_v23  ;;  %v1170_v22 = vld [vmem:[#allocation5 + $0x21f8] sm:$0xff]  ;;  %v1120_v23 = vld [vmem:[#allocation5 + $0x2068] sm:$0xff] }
 0x214   :  { %3181 = vmatpush.msrb.mxu2 %v1087_v24  ;;  %3200 = vmatpush.msrb.mxu3 %v1104_v25  ;;  %v1137_v24 = vld [vmem:[#allocation5 + $0x20f0] sm:$0xff]  ;;  %v1152_v25 = vld [vmem:[#allocation5 + $0x2168] sm:$0xff] }
 0x215   :  { %3142 = vmatpush.msrb.mxu0 %v1054_v26  ;;  %3161 = vmatpush.msrb.mxu1 %v1071_v27  ;;  %v1169_v26 = vld [vmem:[#allocation5 + $0x21f0] sm:$0xff]  ;;  %v1119_v27 = vld [vmem:[#allocation5 + $0x2060] sm:$0xff] }
 0x216   :  { %3182 = vmatpush.msrb.mxu2 %v1086_v28  ;;  %3201 = vmatpush.msrb.mxu3 %v1103_v29  ;;  %v1136_v28 = vld [vmem:[#allocation5 + $0x20e8] sm:$0xff]  ;;  %v1151_v29 = vld [vmem:[#allocation5 + $0x2160] sm:$0xff] }
 0x217   :  { %3143 = vmatpush.msrb.mxu0 %v1053_v30  ;;  %3162 = vmatpush.msrb.mxu1 %v1070_v31  ;;  %v1168_v30 = vld [vmem:[#allocation5 + $0x21e8] sm:$0xff]  ;;  %v1118_v31 = vld [vmem:[#allocation5 + $0x2058] sm:$0xff] }
 0x218   :  { %3183 = vmatpush.msrb.mxu2 %v1085_v32  ;;  %3202 = vmatpush.msrb.mxu3 %v1102_v33  ;;  %v1135_v32 = vld [vmem:[#allocation5 + $0x20e0] sm:$0xff]  ;;  %v1150_v33 = vld [vmem:[#allocation5 + $0x2158] sm:$0xff] }
 0x219   :  { %3144 = vmatpush.msrb.mxu0 %v1052_v34  ;;  %3163 = vmatpush.msrb.mxu1 %v1069_v35  ;;  %v1167_v34 = vld [vmem:[#allocation5 + $0x21e0] sm:$0xff]  ;;  %v1117_v35 = vld [vmem:[#allocation5 + $0x2050] sm:$0xff] }
 0x21a   :  { %3184 = vmatpush.msrb.mxu2 %v1084_v36  ;;  %3203 = vmatpush.msrb.mxu3 %v1101_v37  ;;  %v1134_v36 = vld [vmem:[#allocation5 + $0x20d8] sm:$0xff]  ;;  %v1149_v37 = vld [vmem:[#allocation5 + $0x2150] sm:$0xff] }
 0x21b   :  { %3145 = vmatpush.msrb.mxu0 %v1051_v38  ;;  %3164 = vmatpush.msrb.mxu1 %v1068_v39  ;;  %v1166_v38 = vld [vmem:[#allocation5 + $0x21d8] sm:$0xff]  ;;  %v1116_v39 = vld [vmem:[#allocation5 + $0x2048] sm:$0xff] }
 0x21c   :  { %3185 = vmatpush.msrb.mxu2 %v1083_v40  ;;  %3204 = vmatpush.msrb.mxu3 %v1100_v41  ;;  %v1133_v40 = vld [vmem:[#allocation5 + $0x20d0] sm:$0xff]  ;;  %v1148_v41 = vld [vmem:[#allocation5 + $0x2148] sm:$0xff] }
 0x21d   :  { %3146 = vmatpush.msrb.mxu0 %v1050_v42  ;;  %3165 = vmatpush.msrb.mxu1 %v1067_v43  ;;  %v1165_v42 = vld [vmem:[#allocation5 + $0x21d0] sm:$0xff]  ;;  %v1115_v43 = vld [vmem:[#allocation5 + $0x2040] sm:$0xff] }
 0x21e   :  { %3186 = vmatpush.msrb.mxu2 %v1082_v44  ;;  %3205 = vmatpush.msrb.mxu3 %v1099_v45  ;;  %v1132_v44 = vld [vmem:[#allocation5 + $0x20c8] sm:$0xff]  ;;  %v1147_v45 = vld [vmem:[#allocation5 + $0x2140] sm:$0xff] }
 0x21f   :  { %3147 = vmatpush.msrb.mxu0 %v1049_v46  ;;  %3166 = vmatpush.msrb.mxu1 %v1066_v47  ;;  %v1164_v46 = vld [vmem:[#allocation5 + $0x21c8] sm:$0xff]  ;;  %v1114_v47 = vld [vmem:[#allocation5 + $0x2038] sm:$0xff] }
 0x220   :  { %3187 = vmatpush.msrb.mxu2 %v1081_v48  ;;  %3206 = vmatpush.msrb.mxu3 %v1098_v49  ;;  %v1131_v48 = vld [vmem:[#allocation5 + $0x20c0] sm:$0xff]  ;;  %v1146_v49 = vld [vmem:[#allocation5 + $0x2138] sm:$0xff] }
 0x221   :  { %3148 = vmatpush.msrb.mxu0 %v1048_v50  ;;  %3167 = vmatpush.msrb.mxu1 %v1065_v51  ;;  %v1163_v50 = vld [vmem:[#allocation5 + $0x21c0] sm:$0xff]  ;;  %v1113_v51 = vld [vmem:[#allocation5 + $0x2030] sm:$0xff] }
 0x222   :  { %3188 = vmatpush.msrb.mxu2 %v1080_v52  ;;  %3207 = vmatpush.msrb.mxu3 %v1097_v53  ;;  %v1130_v52 = vld [vmem:[#allocation5 + $0x20b8] sm:$0xff]  ;;  %v1145_v53 = vld [vmem:[#allocation5 + $0x2130] sm:$0xff] }
 0x223   :  { %3149 = vmatpush.msrb.mxu0 %v1047_v54  ;;  %3168 = vmatpush.msrb.mxu1 %v1064_v55  ;;  %v1162_v54 = vld [vmem:[#allocation5 + $0x21b8] sm:$0xff]  ;;  %v1112_v55 = vld [vmem:[#allocation5 + $0x2028] sm:$0xff] }
 0x224   :  { %3189 = vmatpush.msrb.mxu2 %v1079_v56  ;;  %3208 = vmatpush.msrb.mxu3 %v1096_v57  ;;  %v1129_v56 = vld [vmem:[#allocation5 + $0x20b0] sm:$0xff]  ;;  %v1144_v57 = vld [vmem:[#allocation5 + $0x2128] sm:$0xff] }
 0x225   :  { %3150 = vmatpush.msrb.mxu0 %v1046_v58  ;;  %3169 = vmatpush.msrb.mxu1 %v1063_v59  ;;  %v1161_v58 = vld [vmem:[#allocation5 + $0x21b0] sm:$0xff]  ;;  %v1111_v59 = vld [vmem:[#allocation5 + $0x2020] sm:$0xff] }
 0x226   :  { %3190 = vmatpush.msrb.mxu2 %v1078_v60  ;;  %3209 = vmatpush.msrb.mxu3 %v1095_v61  ;;  %v1128_v60 = vld [vmem:[#allocation5 + $0x20a8] sm:$0xff]  ;;  %v1143_v61 = vld [vmem:[#allocation5 + $0x2120] sm:$0xff] }
 0x227   :  { %3151 = vmatpush.msrb.mxu0 %v1045_v62  ;;  %3170 = vmatpush.msrb.mxu1 %v1062_v63  ;;  %v1160_v62 = vld [vmem:[#allocation5 + $0x21a8] sm:$0xff]  ;;  %v1110_v63 = vld [vmem:[#allocation5 + $0x2018] sm:$0xff] }
 0x228   :  { %3191 = vmatpush.msrb.mxu2 %v1077_v0  ;;  %3210 = vmatpush.msrb.mxu3 %v1094_v1  ;;  %v1127_v0 = vld [vmem:[#allocation5 + $0x20a0] sm:$0xff]  ;;  %v1142_v1 = vld [vmem:[#allocation5 + $0x2118] sm:$0xff] }
 0x229   :  { %3152 = vmatpush.msrb.mxu0 %v1044_v2  ;;  %3171 = vmatpush.msrb.mxu1 %v1061_v3  ;;  %v1159_v2 = vld [vmem:[#allocation5 + $0x21a0] sm:$0xff]  ;;  %v1109_v3 = vld [vmem:[#allocation5 + $0x2010] sm:$0xff] }
 0x22a   :  { %3192 = vmatpush.msrb.mxu2 %v1076_v5  ;;  %3211 = vmatpush.msrb.mxu3 %v1093_v6  ;;  %v1141_v5 = vld [vmem:[#allocation5 + $0x2110] sm:$0xff]  ;;  %v1158_v6 = vld [vmem:[#allocation5 + $0x2198] sm:$0xff] }
 0x22b   :  { %3153 = vmatpush.msrb.mxu0 %v1043_v7  ;;  %3172 = vmatpush.msrb.mxu1 %v1060_v8  ;;  %v1108_v7 = vld [vmem:[#allocation5 + $0x2008] sm:$0xff]  ;;  %v1125_v8 = vld [vmem:[#allocation5 + $0x2090] sm:$0xff] }
 0x22c   :  { %3193 = vmatpush.msrb.mxu2 %v1075_v9  ;;  %3212 = vmatpush.msrb.mxu3 %v1092_v10  ;;  %v75_v9 = vld [vmem:[#allocation2 + $0x88] sm:$0xff]  ;;  %v1140_v10 = vld [vmem:[#allocation5 + $0x2108] sm:$0xff] }
 0x22d   :  { %3154 = vmatmul.f32.vlgmr.msrb.gmra.mxu0 %v1789_v11  ;;  %3194 = vmatmul.f32.vlgmr.msrb.gmra.mxu2 %v1791_v12  ;;  %v1157_v11 = vld [vmem:[#allocation5 + $0x2190] sm:$0xff]  ;;  %1794 = vst [vmem:[#allocation1 + $0x20] ss:$4 sm:$0xff] %v75_v9  ;;  %v1107_v12 = vld [vmem:[#allocation5 + $0x2000] sm:$0xff]  ;;  %v1190_v9 = vld [vmem:[#allocation5 + $0x2298] sm:$0xff] }
 0x22e   :  { %3218 = vmatpush.msra.mxu0 %v1122_v13  ;;  %3258 = vmatpush.msra.mxu2 %v1154_v14  ;;  %v1124_v13 = vld [vmem:[#allocation5 + $0x2088] sm:$0xff]  ;;  %v1139_v14 = vld [vmem:[#allocation5 + $0x2100] sm:$0xff] }
 0x22f   :  { %3173 = vmatpush.msrb.mxu1 %v1059_v15  ;;  %3213 = vmatpush.msrb.mxu3 %v1091_v16  ;;  %v1156_v15 = vld [vmem:[#allocation5 + $0x2188] sm:$0xff]  ;;  %v1795_v16 = vld.sshfl [vmem:[#allocation1] sm:$0xff pattern:$0x73625140] }
 0x230   :  { %3174 = vmatmul.f32.vlgmr.msrb.gmra.mxu1 %v1790_v17  ;;  %3214 = vmatmul.f32.vlgmr.msrb.gmra.mxu3 %v1792_v18  ;;  %v1797_v17 = vld.sshfl [vmem:[#allocation1 + $0x10] sm:$0xff pattern:$0x73625140]  ;;  %v1186_v18 = vld [vmem:[#allocation5 + $0x2278] sm:$0xff] }
 0x231   :  { %3219 = vmatpush.msra.mxu0 %v1121_v19  ;;  %3238 = vmatpush.msra.mxu1 %v1138_v20  ;;  %v1218_v19 = vld [vmem:[#allocation5 + $0x2378] sm:$0xff]  ;;  %v1123_v20 = vld [vmem:[#allocation5 + $0x2080] sm:$0xff] }
 0x232   :  { %3259 = vmatpush.msra.mxu2 %v1153_v21  ;;  %3278 = vmatpush.msra.mxu3 %v1170_v22  ;;  %v1155_v21 = vld [vmem:[#allocation5 + $0x2180] sm:$0xff]  ;;  %v1796_v22 = vld.sshfl [vmem:[#allocation1 + $0x8] sm:$0xff pattern:$0x73625140] }
 0x233   :  { %3220 = vmatpush.msra.mxu0 %v1120_v23  ;;  %3239 = vmatpush.msra.mxu1 %v1137_v24  ;;  %v1798_v23 = vld.sshfl [vmem:[#allocation1 + $0x18] sm:$0xff pattern:$0x73625140]  ;;  %v1185_v24 = vld [vmem:[#allocation5 + $0x2270] sm:$0xff] }
 0x234   :  { %3260 = vmatpush.msra.mxu2 %v1152_v25  ;;  %3279 = vmatpush.msra.mxu3 %v1169_v26  ;;  %v1202_v25 = vld [vmem:[#allocation5 + $0x22f8] sm:$0xff]  ;;  %v1217_v26 = vld [vmem:[#allocation5 + $0x2370] sm:$0xff] }
 0x235   :  { %3221 = vmatpush.msra.mxu0 %v1119_v27  ;;  %3240 = vmatpush.msra.mxu1 %v1136_v28  ;;  %v1234_v27 = vld [vmem:[#allocation5 + $0x23f8] sm:$0xff]  ;;  %v1184_v28 = vld [vmem:[#allocation5 + $0x2268] sm:$0xff] }
 0x236   :  { %3261 = vmatpush.msra.mxu2 %v1151_v29  ;;  %3280 = vmatpush.msra.mxu3 %v1168_v30  ;;  %v1201_v29 = vld [vmem:[#allocation5 + $0x22f0] sm:$0xff]  ;;  %v1216_v30 = vld [vmem:[#allocation5 + $0x2368] sm:$0xff] }
 0x237   :  { %3222 = vmatpush.msra.mxu0 %v1118_v31  ;;  %3241 = vmatpush.msra.mxu1 %v1135_v32  ;;  %v1233_v31 = vld [vmem:[#allocation5 + $0x23f0] sm:$0xff]  ;;  %v1183_v32 = vld [vmem:[#allocation5 + $0x2260] sm:$0xff] }
 0x238   :  { %3262 = vmatpush.msra.mxu2 %v1150_v33  ;;  %3281 = vmatpush.msra.mxu3 %v1167_v34  ;;  %v1200_v33 = vld [vmem:[#allocation5 + $0x22e8] sm:$0xff]  ;;  %v1215_v34 = vld [vmem:[#allocation5 + $0x2360] sm:$0xff] }
 0x239   :  { %3223 = vmatpush.msra.mxu0 %v1117_v35  ;;  %3242 = vmatpush.msra.mxu1 %v1134_v36  ;;  %v1232_v35 = vld [vmem:[#allocation5 + $0x23e8] sm:$0xff]  ;;  %v1182_v36 = vld [vmem:[#allocation5 + $0x2258] sm:$0xff] }
 0x23a   :  { %3263 = vmatpush.msra.mxu2 %v1149_v37  ;;  %3282 = vmatpush.msra.mxu3 %v1166_v38  ;;  %v1199_v37 = vld [vmem:[#allocation5 + $0x22e0] sm:$0xff]  ;;  %v1214_v38 = vld [vmem:[#allocation5 + $0x2358] sm:$0xff] }
 0x23b   :  { %3224 = vmatpush.msra.mxu0 %v1116_v39  ;;  %3243 = vmatpush.msra.mxu1 %v1133_v40  ;;  %v1231_v39 = vld [vmem:[#allocation5 + $0x23e0] sm:$0xff]  ;;  %v1181_v40 = vld [vmem:[#allocation5 + $0x2250] sm:$0xff] }
 0x23c   :  { %3264 = vmatpush.msra.mxu2 %v1148_v41  ;;  %3283 = vmatpush.msra.mxu3 %v1165_v42  ;;  %v1198_v41 = vld [vmem:[#allocation5 + $0x22d8] sm:$0xff]  ;;  %v1213_v42 = vld [vmem:[#allocation5 + $0x2350] sm:$0xff] }
 0x23d   :  { %3225 = vmatpush.msra.mxu0 %v1115_v43  ;;  %3244 = vmatpush.msra.mxu1 %v1132_v44  ;;  %v1230_v43 = vld [vmem:[#allocation5 + $0x23d8] sm:$0xff]  ;;  %v1180_v44 = vld [vmem:[#allocation5 + $0x2248] sm:$0xff] }
 0x23e   :  { %3265 = vmatpush.msra.mxu2 %v1147_v45  ;;  %3284 = vmatpush.msra.mxu3 %v1164_v46  ;;  %v1197_v45 = vld [vmem:[#allocation5 + $0x22d0] sm:$0xff]  ;;  %v1212_v46 = vld [vmem:[#allocation5 + $0x2348] sm:$0xff] }
 0x23f   :  { %3226 = vmatpush.msra.mxu0 %v1114_v47  ;;  %3245 = vmatpush.msra.mxu1 %v1131_v48  ;;  %v1229_v47 = vld [vmem:[#allocation5 + $0x23d0] sm:$0xff]  ;;  %v1179_v48 = vld [vmem:[#allocation5 + $0x2240] sm:$0xff] }
 0x240   :  { %3266 = vmatpush.msra.mxu2 %v1146_v49  ;;  %3285 = vmatpush.msra.mxu3 %v1163_v50  ;;  %v1196_v49 = vld [vmem:[#allocation5 + $0x22c8] sm:$0xff]  ;;  %v1211_v50 = vld [vmem:[#allocation5 + $0x2340] sm:$0xff] }
 0x241   :  { %3227 = vmatpush.msra.mxu0 %v1113_v51  ;;  %3246 = vmatpush.msra.mxu1 %v1130_v52  ;;  %v1228_v51 = vld [vmem:[#allocation5 + $0x23c8] sm:$0xff]  ;;  %v1178_v52 = vld [vmem:[#allocation5 + $0x2238] sm:$0xff] }
 0x242   :  { %3267 = vmatpush.msra.mxu2 %v1145_v53  ;;  %3286 = vmatpush.msra.mxu3 %v1162_v54  ;;  %v1195_v53 = vld [vmem:[#allocation5 + $0x22c0] sm:$0xff]  ;;  %v1210_v54 = vld [vmem:[#allocation5 + $0x2338] sm:$0xff] }
 0x243   :  { %3228 = vmatpush.msra.mxu0 %v1112_v55  ;;  %3247 = vmatpush.msra.mxu1 %v1129_v56  ;;  %v1227_v55 = vld [vmem:[#allocation5 + $0x23c0] sm:$0xff]  ;;  %v1177_v56 = vld [vmem:[#allocation5 + $0x2230] sm:$0xff] }
 0x244   :  { %3268 = vmatpush.msra.mxu2 %v1144_v57  ;;  %3287 = vmatpush.msra.mxu3 %v1161_v58  ;;  %v1194_v57 = vld [vmem:[#allocation5 + $0x22b8] sm:$0xff]  ;;  %v1209_v58 = vld [vmem:[#allocation5 + $0x2330] sm:$0xff] }
 0x245   :  { %3229 = vmatpush.msra.mxu0 %v1111_v59  ;;  %3248 = vmatpush.msra.mxu1 %v1128_v60  ;;  %v1226_v59 = vld [vmem:[#allocation5 + $0x23b8] sm:$0xff]  ;;  %v1176_v60 = vld [vmem:[#allocation5 + $0x2228] sm:$0xff] }
 0x246   :  { %3269 = vmatpush.msra.mxu2 %v1143_v61  ;;  %3288 = vmatpush.msra.mxu3 %v1160_v62  ;;  %v1193_v61 = vld [vmem:[#allocation5 + $0x22b0] sm:$0xff]  ;;  %v1208_v62 = vld [vmem:[#allocation5 + $0x2328] sm:$0xff] }
 0x247   :  { %3230 = vmatpush.msra.mxu0 %v1110_v63  ;;  %3249 = vmatpush.msra.mxu1 %v1127_v0  ;;  %v1225_v63 = vld [vmem:[#allocation5 + $0x23b0] sm:$0xff]  ;;  %v1175_v0 = vld [vmem:[#allocation5 + $0x2220] sm:$0xff] }
 0x248   :  { %3270 = vmatpush.msra.mxu2 %v1142_v1  ;;  %3289 = vmatpush.msra.mxu3 %v1159_v2  ;;  %v1192_v1 = vld [vmem:[#allocation5 + $0x22a8] sm:$0xff]  ;;  %v1207_v2 = vld [vmem:[#allocation5 + $0x2320] sm:$0xff] }
 0x249   :  { %3231 = vmatpush.msra.mxu0 %v1109_v3  ;;  %3250 = vmatpush.msra.mxu1 %v1126_v4  ;;  %v1224_v3 = vld [vmem:[#allocation5 + $0x23a8] sm:$0xff]  ;;  %v1174_v4 = vld [vmem:[#allocation5 + $0x2218] sm:$0xff] }
 0x24a   :  { %3271 = vmatpush.msra.mxu2 %v1141_v5  ;;  %3290 = vmatpush.msra.mxu3 %v1158_v6  ;;  %v1191_v5 = vld [vmem:[#allocation5 + $0x22a0] sm:$0xff]  ;;  %v1206_v6 = vld [vmem:[#allocation5 + $0x2318] sm:$0xff] }
 0x24b   :  { %3232 = vmatpush.msra.mxu0 %v1108_v7  ;;  %3251 = vmatpush.msra.mxu1 %v1125_v8  ;;  %v1223_v7 = vld [vmem:[#allocation5 + $0x23a0] sm:$0xff]  ;;  %v1173_v8 = vld [vmem:[#allocation5 + $0x2210] sm:$0xff] }
 0x24c   :  { %3272 = vmatpush.msra.mxu2 %v1140_v10  ;;  %3291 = vmatpush.msra.mxu3 %v1157_v11  ;;  %v1205_v10 = vld [vmem:[#allocation5 + $0x2310] sm:$0xff]  ;;  %v1222_v11 = vld [vmem:[#allocation5 + $0x2398] sm:$0xff] }
 0x24d   :  { %3233 = vmatpush.msra.mxu0 %v1107_v12  ;;  %3252 = vmatpush.msra.mxu1 %v1124_v13  ;;  %v1172_v12 = vld [vmem:[#allocation5 + $0x2208] sm:$0xff]  ;;  %v1189_v13 = vld [vmem:[#allocation5 + $0x2290] sm:$0xff] }
 0x24e   :  { %3273 = vmatpush.msra.mxu2 %v1139_v14  ;;  %3292 = vmatpush.msra.mxu3 %v1156_v15  ;;  %v76_v14 = vld [vmem:[#allocation2 + $0x90] sm:$0xff] }
 0x24f   :  { %3234 = vmatmul.f32.vlgmr.msra.gmra.mxu0 %v1795_v16  ;;  %3274 = vmatmul.f32.vlgmr.msra.gmra.mxu2 %v1797_v17  ;;  %v1204_v15 = vld [vmem:[#allocation5 + $0x2308] sm:$0xff]  ;;  %v1221_v16 = vld [vmem:[#allocation5 + $0x2390] sm:$0xff]  ;;  %1803 = vst [vmem:[#allocation1] ss:$4 sm:$0xff] %v76_v14  ;;  %v1171_v17 = vld [vmem:[#allocation5 + $0x2200] sm:$0xff] }
 0x250   :  { %3298 = vmatpush.msrb.mxu0 %v1186_v18  ;;  %3338 = vmatpush.msrb.mxu2 %v1218_v19  ;;  %v1188_v18 = vld [vmem:[#allocation5 + $0x2288] sm:$0xff]  ;;  %v1203_v19 = vld [vmem:[#allocation5 + $0x2300] sm:$0xff]  ;;  %v1254_v14 = vld [vmem:[#allocation5 + $0x2498] sm:$0xff] }
 0x251   :  { %3253 = vmatpush.msra.mxu1 %v1123_v20  ;;  %3293 = vmatpush.msra.mxu3 %v1155_v21  ;;  %v1220_v20 = vld [vmem:[#allocation5 + $0x2388] sm:$0xff]  ;;  %v1799_v21 = vld.sshfl [vmem:[#allocation1 + $0x20] sm:$0xff pattern:$0x73625140] }
 0x252   :  { %3254 = vmatmul.f32.vlgmr.msra.gmra.mxu1 %v1796_v22  ;;  %3294 = vmatmul.f32.vlgmr.msra.gmra.mxu3 %v1798_v23  ;;  %v1801_v22 = vld.sshfl [vmem:[#allocation1 + $0x30] sm:$0xff pattern:$0x73625140]  ;;  %v1250_v23 = vld [vmem:[#allocation5 + $0x2478] sm:$0xff] }
 0x253   :  { %3299 = vmatpush.msrb.mxu0 %v1185_v24  ;;  %3318 = vmatpush.msrb.mxu1 %v1202_v25  ;;  %v1282_v24 = vld [vmem:[#allocation5 + $0x2578] sm:$0xff]  ;;  %v1187_v25 = vld [vmem:[#allocation5 + $0x2280] sm:$0xff] }
 0x254   :  { %3339 = vmatpush.msrb.mxu2 %v1217_v26  ;;  %3358 = vmatpush.msrb.mxu3 %v1234_v27  ;;  %v1219_v26 = vld [vmem:[#allocation5 + $0x2380] sm:$0xff]  ;;  %v1800_v27 = vld.sshfl [vmem:[#allocation1 + $0x28] sm:$0xff pattern:$0x73625140] }
 0x255   :  { %3300 = vmatpush.msrb.mxu0 %v1184_v28  ;;  %3319 = vmatpush.msrb.mxu1 %v1201_v29  ;;  %v1802_v28 = vld.sshfl [vmem:[#allocation1 + $0x38] sm:$0xff pattern:$0x73625140]  ;;  %v1249_v29 = vld [vmem:[#allocation5 + $0x2470] sm:$0xff] }
 0x256   :  { %3340 = vmatpush.msrb.mxu2 %v1216_v30  ;;  %3359 = vmatpush.msrb.mxu3 %v1233_v31  ;;  %v1266_v30 = vld [vmem:[#allocation5 + $0x24f8] sm:$0xff]  ;;  %v1281_v31 = vld [vmem:[#allocation5 + $0x2570] sm:$0xff] }
 0x257   :  { %3301 = vmatpush.msrb.mxu0 %v1183_v32  ;;  %3320 = vmatpush.msrb.mxu1 %v1200_v33  ;;  %v1298_v32 = vld [vmem:[#allocation5 + $0x25f8] sm:$0xff]  ;;  %v1248_v33 = vld [vmem:[#allocation5 + $0x2468] sm:$0xff] }
 0x258   :  { %3341 = vmatpush.msrb.mxu2 %v1215_v34  ;;  %3360 = vmatpush.msrb.mxu3 %v1232_v35  ;;  %v1265_v34 = vld [vmem:[#allocation5 + $0x24f0] sm:$0xff]  ;;  %v1280_v35 = vld [vmem:[#allocation5 + $0x2568] sm:$0xff] }
 0x259   :  { %3302 = vmatpush.msrb.mxu0 %v1182_v36  ;;  %3321 = vmatpush.msrb.mxu1 %v1199_v37  ;;  %v1297_v36 = vld [vmem:[#allocation5 + $0x25f0] sm:$0xff]  ;;  %v1247_v37 = vld [vmem:[#allocation5 + $0x2460] sm:$0xff] }
 0x25a   :  { %3342 = vmatpush.msrb.mxu2 %v1214_v38  ;;  %3361 = vmatpush.msrb.mxu3 %v1231_v39  ;;  %v1264_v38 = vld [vmem:[#allocation5 + $0x24e8] sm:$0xff]  ;;  %v1279_v39 = vld [vmem:[#allocation5 + $0x2560] sm:$0xff] }
 0x25b   :  { %3303 = vmatpush.msrb.mxu0 %v1181_v40  ;;  %3322 = vmatpush.msrb.mxu1 %v1198_v41  ;;  %v1296_v40 = vld [vmem:[#allocation5 + $0x25e8] sm:$0xff]  ;;  %v1246_v41 = vld [vmem:[#allocation5 + $0x2458] sm:$0xff] }
 0x25c   :  { %3343 = vmatpush.msrb.mxu2 %v1213_v42  ;;  %3362 = vmatpush.msrb.mxu3 %v1230_v43  ;;  %v1263_v42 = vld [vmem:[#allocation5 + $0x24e0] sm:$0xff]  ;;  %v1278_v43 = vld [vmem:[#allocation5 + $0x2558] sm:$0xff] }
 0x25d   :  { %3304 = vmatpush.msrb.mxu0 %v1180_v44  ;;  %3323 = vmatpush.msrb.mxu1 %v1197_v45  ;;  %v1295_v44 = vld [vmem:[#allocation5 + $0x25e0] sm:$0xff]  ;;  %v1245_v45 = vld [vmem:[#allocation5 + $0x2450] sm:$0xff] }
 0x25e   :  { %3344 = vmatpush.msrb.mxu2 %v1212_v46  ;;  %3363 = vmatpush.msrb.mxu3 %v1229_v47  ;;  %v1262_v46 = vld [vmem:[#allocation5 + $0x24d8] sm:$0xff]  ;;  %v1277_v47 = vld [vmem:[#allocation5 + $0x2550] sm:$0xff] }
 0x25f   :  { %3305 = vmatpush.msrb.mxu0 %v1179_v48  ;;  %3324 = vmatpush.msrb.mxu1 %v1196_v49  ;;  %v1294_v48 = vld [vmem:[#allocation5 + $0x25d8] sm:$0xff]  ;;  %v1244_v49 = vld [vmem:[#allocation5 + $0x2448] sm:$0xff] }
 0x260   :  { %3345 = vmatpush.msrb.mxu2 %v1211_v50  ;;  %3364 = vmatpush.msrb.mxu3 %v1228_v51  ;;  %v1261_v50 = vld [vmem:[#allocation5 + $0x24d0] sm:$0xff]  ;;  %v1276_v51 = vld [vmem:[#allocation5 + $0x2548] sm:$0xff] }
 0x261   :  { %3306 = vmatpush.msrb.mxu0 %v1178_v52  ;;  %3325 = vmatpush.msrb.mxu1 %v1195_v53  ;;  %v1293_v52 = vld [vmem:[#allocation5 + $0x25d0] sm:$0xff]  ;;  %v1243_v53 = vld [vmem:[#allocation5 + $0x2440] sm:$0xff] }
 0x262   :  { %3346 = vmatpush.msrb.mxu2 %v1210_v54  ;;  %3365 = vmatpush.msrb.mxu3 %v1227_v55  ;;  %v1260_v54 = vld [vmem:[#allocation5 + $0x24c8] sm:$0xff]  ;;  %v1275_v55 = vld [vmem:[#allocation5 + $0x2540] sm:$0xff] }
 0x263   :  { %3307 = vmatpush.msrb.mxu0 %v1177_v56  ;;  %3326 = vmatpush.msrb.mxu1 %v1194_v57  ;;  %v1292_v56 = vld [vmem:[#allocation5 + $0x25c8] sm:$0xff]  ;;  %v1242_v57 = vld [vmem:[#allocation5 + $0x2438] sm:$0xff] }
 0x264   :  { %3347 = vmatpush.msrb.mxu2 %v1209_v58  ;;  %3366 = vmatpush.msrb.mxu3 %v1226_v59  ;;  %v1259_v58 = vld [vmem:[#allocation5 + $0x24c0] sm:$0xff]  ;;  %v1274_v59 = vld [vmem:[#allocation5 + $0x2538] sm:$0xff] }
 0x265   :  { %3308 = vmatpush.msrb.mxu0 %v1176_v60  ;;  %3327 = vmatpush.msrb.mxu1 %v1193_v61  ;;  %v1291_v60 = vld [vmem:[#allocation5 + $0x25c0] sm:$0xff]  ;;  %v1241_v61 = vld [vmem:[#allocation5 + $0x2430] sm:$0xff] }
 0x266   :  { %3348 = vmatpush.msrb.mxu2 %v1208_v62  ;;  %3367 = vmatpush.msrb.mxu3 %v1225_v63  ;;  %v1258_v62 = vld [vmem:[#allocation5 + $0x24b8] sm:$0xff]  ;;  %v1273_v63 = vld [vmem:[#allocation5 + $0x2530] sm:$0xff] }
 0x267   :  { %3309 = vmatpush.msrb.mxu0 %v1175_v0  ;;  %3328 = vmatpush.msrb.mxu1 %v1192_v1  ;;  %v1290_v0 = vld [vmem:[#allocation5 + $0x25b8] sm:$0xff]  ;;  %v1240_v1 = vld [vmem:[#allocation5 + $0x2428] sm:$0xff] }
 0x268   :  { %3349 = vmatpush.msrb.mxu2 %v1207_v2  ;;  %3368 = vmatpush.msrb.mxu3 %v1224_v3  ;;  %v1257_v2 = vld [vmem:[#allocation5 + $0x24b0] sm:$0xff]  ;;  %v1272_v3 = vld [vmem:[#allocation5 + $0x2528] sm:$0xff] }
 0x269   :  { %3310 = vmatpush.msrb.mxu0 %v1174_v4  ;;  %3329 = vmatpush.msrb.mxu1 %v1191_v5  ;;  %v1289_v4 = vld [vmem:[#allocation5 + $0x25b0] sm:$0xff]  ;;  %v1239_v5 = vld [vmem:[#allocation5 + $0x2420] sm:$0xff] }
 0x26a   :  { %3350 = vmatpush.msrb.mxu2 %v1206_v6  ;;  %3369 = vmatpush.msrb.mxu3 %v1223_v7  ;;  %v1256_v6 = vld [vmem:[#allocation5 + $0x24a8] sm:$0xff]  ;;  %v1271_v7 = vld [vmem:[#allocation5 + $0x2520] sm:$0xff] }
 0x26b   :  { %3311 = vmatpush.msrb.mxu0 %v1173_v8  ;;  %3330 = vmatpush.msrb.mxu1 %v1190_v9  ;;  %v1288_v8 = vld [vmem:[#allocation5 + $0x25a8] sm:$0xff]  ;;  %v1238_v9 = vld [vmem:[#allocation5 + $0x2418] sm:$0xff] }
 0x26c   :  { %3351 = vmatpush.msrb.mxu2 %v1205_v10  ;;  %3370 = vmatpush.msrb.mxu3 %v1222_v11  ;;  %v1255_v10 = vld [vmem:[#allocation5 + $0x24a0] sm:$0xff]  ;;  %v1270_v11 = vld [vmem:[#allocation5 + $0x2518] sm:$0xff] }
 0x26d   :  { %3312 = vmatpush.msrb.mxu0 %v1172_v12  ;;  %3331 = vmatpush.msrb.mxu1 %v1189_v13  ;;  %v1287_v12 = vld [vmem:[#allocation5 + $0x25a0] sm:$0xff]  ;;  %v1237_v13 = vld [vmem:[#allocation5 + $0x2410] sm:$0xff] }
 0x26e   :  { %3352 = vmatpush.msrb.mxu2 %v1204_v15  ;;  %3371 = vmatpush.msrb.mxu3 %v1221_v16  ;;  %v1269_v15 = vld [vmem:[#allocation5 + $0x2510] sm:$0xff]  ;;  %v1286_v16 = vld [vmem:[#allocation5 + $0x2598] sm:$0xff] }
 0x26f   :  { %3313 = vmatpush.msrb.mxu0 %v1171_v17  ;;  %3332 = vmatpush.msrb.mxu1 %v1188_v18  ;;  %v1236_v17 = vld [vmem:[#allocation5 + $0x2408] sm:$0xff]  ;;  %v1253_v18 = vld [vmem:[#allocation5 + $0x2490] sm:$0xff] }
 0x270   :  { %3353 = vmatpush.msrb.mxu2 %v1203_v19  ;;  %3372 = vmatpush.msrb.mxu3 %v1220_v20  ;;  %v77_v19 = vld [vmem:[#allocation2 + $0x98] sm:$0xff]  ;;  %v1268_v20 = vld [vmem:[#allocation5 + $0x2508] sm:$0xff] }
 0x271   :  { %3314 = vmatmul.f32.vlgmr.msrb.gmra.mxu0 %v1799_v21  ;;  %3354 = vmatmul.f32.vlgmr.msrb.gmra.mxu2 %v1801_v22  ;;  %v1285_v21 = vld [vmem:[#allocation5 + $0x2590] sm:$0xff]  ;;  %1804 = vst [vmem:[#allocation1 + $0x20] ss:$4 sm:$0xff] %v77_v19  ;;  %v1235_v22 = vld [vmem:[#allocation5 + $0x2400] sm:$0xff]  ;;  %v1318_v19 = vld [vmem:[#allocation5 + $0x2698] sm:$0xff] }
 0x272   :  { %3378 = vmatpush.msra.mxu0 %v1250_v23  ;;  %3418 = vmatpush.msra.mxu2 %v1282_v24  ;;  %v1252_v23 = vld [vmem:[#allocation5 + $0x2488] sm:$0xff]  ;;  %v1267_v24 = vld [vmem:[#allocation5 + $0x2500] sm:$0xff] }
 0x273   :  { %3333 = vmatpush.msrb.mxu1 %v1187_v25  ;;  %3373 = vmatpush.msrb.mxu3 %v1219_v26  ;;  %v1284_v25 = vld [vmem:[#allocation5 + $0x2588] sm:$0xff]  ;;  %v1805_v26 = vld.sshfl [vmem:[#allocation1] sm:$0xff pattern:$0x73625140] }
 0x274   :  { %3334 = vmatmul.f32.vlgmr.msrb.gmra.mxu1 %v1800_v27  ;;  %3374 = vmatmul.f32.vlgmr.msrb.gmra.mxu3 %v1802_v28  ;;  %v1807_v27 = vld.sshfl [vmem:[#allocation1 + $0x10] sm:$0xff pattern:$0x73625140]  ;;  %v1314_v28 = vld [vmem:[#allocation5 + $0x2678] sm:$0xff] }
 0x275   :  { %3379 = vmatpush.msra.mxu0 %v1249_v29  ;;  %3398 = vmatpush.msra.mxu1 %v1266_v30  ;;  %v1346_v29 = vld [vmem:[#allocation5 + $0x2778] sm:$0xff]  ;;  %v1251_v30 = vld [vmem:[#allocation5 + $0x2480] sm:$0xff] }
 0x276   :  { %3419 = vmatpush.msra.mxu2 %v1281_v31  ;;  %3438 = vmatpush.msra.mxu3 %v1298_v32  ;;  %v1283_v31 = vld [vmem:[#allocation5 + $0x2580] sm:$0xff]  ;;  %v1806_v32 = vld.sshfl [vmem:[#allocation1 + $0x8] sm:$0xff pattern:$0x73625140] }
 0x277   :  { %3380 = vmatpush.msra.mxu0 %v1248_v33  ;;  %3399 = vmatpush.msra.mxu1 %v1265_v34  ;;  %v1808_v33 = vld.sshfl [vmem:[#allocation1 + $0x18] sm:$0xff pattern:$0x73625140]  ;;  %v1313_v34 = vld [vmem:[#allocation5 + $0x2670] sm:$0xff] }
 0x278   :  { %3420 = vmatpush.msra.mxu2 %v1280_v35  ;;  %3439 = vmatpush.msra.mxu3 %v1297_v36  ;;  %v1330_v35 = vld [vmem:[#allocation5 + $0x26f8] sm:$0xff]  ;;  %v1345_v36 = vld [vmem:[#allocation5 + $0x2770] sm:$0xff] }
 0x279   :  { %3381 = vmatpush.msra.mxu0 %v1247_v37  ;;  %3400 = vmatpush.msra.mxu1 %v1264_v38  ;;  %v1362_v37 = vld [vmem:[#allocation5 + $0x27f8] sm:$0xff]  ;;  %v1312_v38 = vld [vmem:[#allocation5 + $0x2668] sm:$0xff] }
 0x27a   :  { %3421 = vmatpush.msra.mxu2 %v1279_v39  ;;  %3440 = vmatpush.msra.mxu3 %v1296_v40  ;;  %v1329_v39 = vld [vmem:[#allocation5 + $0x26f0] sm:$0xff]  ;;  %v1344_v40 = vld [vmem:[#allocation5 + $0x2768] sm:$0xff] }
 0x27b   :  { %3382 = vmatpush.msra.mxu0 %v1246_v41  ;;  %3401 = vmatpush.msra.mxu1 %v1263_v42  ;;  %v1361_v41 = vld [vmem:[#allocation5 + $0x27f0] sm:$0xff]  ;;  %v1311_v42 = vld [vmem:[#allocation5 + $0x2660] sm:$0xff] }
 0x27c   :  { %3422 = vmatpush.msra.mxu2 %v1278_v43  ;;  %3441 = vmatpush.msra.mxu3 %v1295_v44  ;;  %v1328_v43 = vld [vmem:[#allocation5 + $0x26e8] sm:$0xff]  ;;  %v1343_v44 = vld [vmem:[#allocation5 + $0x2760] sm:$0xff] }
 0x27d   :  { %3383 = vmatpush.msra.mxu0 %v1245_v45  ;;  %3402 = vmatpush.msra.mxu1 %v1262_v46  ;;  %v1360_v45 = vld [vmem:[#allocation5 + $0x27e8] sm:$0xff]  ;;  %v1310_v46 = vld [vmem:[#allocation5 + $0x2658] sm:$0xff] }
 0x27e   :  { %3423 = vmatpush.msra.mxu2 %v1277_v47  ;;  %3442 = vmatpush.msra.mxu3 %v1294_v48  ;;  %v1327_v47 = vld [vmem:[#allocation5 + $0x26e0] sm:$0xff]  ;;  %v1342_v48 = vld [vmem:[#allocation5 + $0x2758] sm:$0xff] }
 0x27f   :  { %3384 = vmatpush.msra.mxu0 %v1244_v49  ;;  %3403 = vmatpush.msra.mxu1 %v1261_v50  ;;  %v1359_v49 = vld [vmem:[#allocation5 + $0x27e0] sm:$0xff]  ;;  %v1309_v50 = vld [vmem:[#allocation5 + $0x2650] sm:$0xff] }
 0x280   :  { %3424 = vmatpush.msra.mxu2 %v1276_v51  ;;  %3443 = vmatpush.msra.mxu3 %v1293_v52  ;;  %v1326_v51 = vld [vmem:[#allocation5 + $0x26d8] sm:$0xff]  ;;  %v1341_v52 = vld [vmem:[#allocation5 + $0x2750] sm:$0xff] }
 0x281   :  { %3385 = vmatpush.msra.mxu0 %v1243_v53  ;;  %3404 = vmatpush.msra.mxu1 %v1260_v54  ;;  %v1358_v53 = vld [vmem:[#allocation5 + $0x27d8] sm:$0xff]  ;;  %v1308_v54 = vld [vmem:[#allocation5 + $0x2648] sm:$0xff] }
 0x282   :  { %3425 = vmatpush.msra.mxu2 %v1275_v55  ;;  %3444 = vmatpush.msra.mxu3 %v1292_v56  ;;  %v1325_v55 = vld [vmem:[#allocation5 + $0x26d0] sm:$0xff]  ;;  %v1340_v56 = vld [vmem:[#allocation5 + $0x2748] sm:$0xff] }
 0x283   :  { %3386 = vmatpush.msra.mxu0 %v1242_v57  ;;  %3405 = vmatpush.msra.mxu1 %v1259_v58  ;;  %v1357_v57 = vld [vmem:[#allocation5 + $0x27d0] sm:$0xff]  ;;  %v1307_v58 = vld [vmem:[#allocation5 + $0x2640] sm:$0xff] }
 0x284   :  { %3426 = vmatpush.msra.mxu2 %v1274_v59  ;;  %3445 = vmatpush.msra.mxu3 %v1291_v60  ;;  %v1324_v59 = vld [vmem:[#allocation5 + $0x26c8] sm:$0xff]  ;;  %v1339_v60 = vld [vmem:[#allocation5 + $0x2740] sm:$0xff] }
 0x285   :  { %3387 = vmatpush.msra.mxu0 %v1241_v61  ;;  %3406 = vmatpush.msra.mxu1 %v1258_v62  ;;  %v1356_v61 = vld [vmem:[#allocation5 + $0x27c8] sm:$0xff]  ;;  %v1306_v62 = vld [vmem:[#allocation5 + $0x2638] sm:$0xff] }
 0x286   :  { %3427 = vmatpush.msra.mxu2 %v1273_v63  ;;  %3446 = vmatpush.msra.mxu3 %v1290_v0  ;;  %v1323_v63 = vld [vmem:[#allocation5 + $0x26c0] sm:$0xff]  ;;  %v1338_v0 = vld [vmem:[#allocation5 + $0x2738] sm:$0xff] }
 0x287   :  { %3388 = vmatpush.msra.mxu0 %v1240_v1  ;;  %3407 = vmatpush.msra.mxu1 %v1257_v2  ;;  %v1355_v1 = vld [vmem:[#allocation5 + $0x27c0] sm:$0xff]  ;;  %v1305_v2 = vld [vmem:[#allocation5 + $0x2630] sm:$0xff] }
 0x288   :  { %3428 = vmatpush.msra.mxu2 %v1272_v3  ;;  %3447 = vmatpush.msra.mxu3 %v1289_v4  ;;  %v1322_v3 = vld [vmem:[#allocation5 + $0x26b8] sm:$0xff]  ;;  %v1337_v4 = vld [vmem:[#allocation5 + $0x2730] sm:$0xff] }
 0x289   :  { %3389 = vmatpush.msra.mxu0 %v1239_v5  ;;  %3408 = vmatpush.msra.mxu1 %v1256_v6  ;;  %v1354_v5 = vld [vmem:[#allocation5 + $0x27b8] sm:$0xff]  ;;  %v1304_v6 = vld [vmem:[#allocation5 + $0x2628] sm:$0xff] }
 0x28a   :  { %3429 = vmatpush.msra.mxu2 %v1271_v7  ;;  %3448 = vmatpush.msra.mxu3 %v1288_v8  ;;  %v1321_v7 = vld [vmem:[#allocation5 + $0x26b0] sm:$0xff]  ;;  %v1336_v8 = vld [vmem:[#allocation5 + $0x2728] sm:$0xff] }
 0x28b   :  { %3390 = vmatpush.msra.mxu0 %v1238_v9  ;;  %3409 = vmatpush.msra.mxu1 %v1255_v10  ;;  %v1353_v9 = vld [vmem:[#allocation5 + $0x27b0] sm:$0xff]  ;;  %v1303_v10 = vld [vmem:[#allocation5 + $0x2620] sm:$0xff] }
 0x28c   :  { %3430 = vmatpush.msra.mxu2 %v1270_v11  ;;  %3449 = vmatpush.msra.mxu3 %v1287_v12  ;;  %v1320_v11 = vld [vmem:[#allocation5 + $0x26a8] sm:$0xff]  ;;  %v1335_v12 = vld [vmem:[#allocation5 + $0x2720] sm:$0xff] }
 0x28d   :  { %3391 = vmatpush.msra.mxu0 %v1237_v13  ;;  %3410 = vmatpush.msra.mxu1 %v1254_v14  ;;  %v1352_v13 = vld [vmem:[#allocation5 + $0x27a8] sm:$0xff]  ;;  %v1302_v14 = vld [vmem:[#allocation5 + $0x2618] sm:$0xff] }
 0x28e   :  { %3431 = vmatpush.msra.mxu2 %v1269_v15  ;;  %3450 = vmatpush.msra.mxu3 %v1286_v16  ;;  %v1319_v15 = vld [vmem:[#allocation5 + $0x26a0] sm:$0xff]  ;;  %v1334_v16 = vld [vmem:[#allocation5 + $0x2718] sm:$0xff] }
 0x28f   :  { %3392 = vmatpush.msra.mxu0 %v1236_v17  ;;  %3411 = vmatpush.msra.mxu1 %v1253_v18  ;;  %v1351_v17 = vld [vmem:[#allocation5 + $0x27a0] sm:$0xff]  ;;  %v1301_v18 = vld [vmem:[#allocation5 + $0x2610] sm:$0xff] }
 0x290   :  { %3432 = vmatpush.msra.mxu2 %v1268_v20  ;;  %3451 = vmatpush.msra.mxu3 %v1285_v21  ;;  %v1333_v20 = vld [vmem:[#allocation5 + $0x2710] sm:$0xff]  ;;  %v1350_v21 = vld [vmem:[#allocation5 + $0x2798] sm:$0xff] }
 0x291   :  { %3393 = vmatpush.msra.mxu0 %v1235_v22  ;;  %3412 = vmatpush.msra.mxu1 %v1252_v23  ;;  %v1300_v22 = vld [vmem:[#allocation5 + $0x2608] sm:$0xff]  ;;  %v1317_v23 = vld [vmem:[#allocation5 + $0x2690] sm:$0xff] }
 0x292   :  { %3433 = vmatpush.msra.mxu2 %v1267_v24  ;;  %3452 = vmatpush.msra.mxu3 %v1284_v25  ;;  %v78_v24 = vld [vmem:[#allocation2 + $0xa0] sm:$0xff]  ;;  %v1332_v25 = vld [vmem:[#allocation5 + $0x2708] sm:$0xff] }
 0x293   :  { %3394 = vmatmul.f32.vlgmr.msra.gmra.mxu0 %v1805_v26  ;;  %3434 = vmatmul.f32.vlgmr.msra.gmra.mxu2 %v1807_v27  ;;  %v1349_v26 = vld [vmem:[#allocation5 + $0x2790] sm:$0xff]  ;;  %1813 = vst [vmem:[#allocation1] ss:$4 sm:$0xff] %v78_v24  ;;  %v1299_v27 = vld [vmem:[#allocation5 + $0x2600] sm:$0xff] }
 0x294   :  { %3458 = vmatpush.msrb.mxu0 %v1314_v28  ;;  %3498 = vmatpush.msrb.mxu2 %v1346_v29  ;;  %v1316_v28 = vld [vmem:[#allocation5 + $0x2688] sm:$0xff]  ;;  %v1331_v29 = vld [vmem:[#allocation5 + $0x2700] sm:$0xff]  ;;  %v1385_v24 = vld [vmem:[#allocation5 + $0x28b0] sm:$0xff] }
 0x295   :  { %3413 = vmatpush.msra.mxu1 %v1251_v30  ;;  %3453 = vmatpush.msra.mxu3 %v1283_v31  ;;  %v1348_v30 = vld [vmem:[#allocation5 + $0x2788] sm:$0xff]  ;;  %v1809_v31 = vld.sshfl [vmem:[#allocation1 + $0x20] sm:$0xff pattern:$0x73625140] }
 0x296   :  { %3414 = vmatmul.f32.vlgmr.msra.gmra.mxu1 %v1806_v32  ;;  %3454 = vmatmul.f32.vlgmr.msra.gmra.mxu3 %v1808_v33  ;;  %v1811_v32 = vld.sshfl [vmem:[#allocation1 + $0x30] sm:$0xff pattern:$0x73625140] }
 0x297   :  { %3459 = vmatpush.msrb.mxu0 %v1313_v34  ;;  %3478 = vmatpush.msrb.mxu1 %v1330_v35  ;;  %v3963_v33 = vld [vmem:[#allocation7] ss:$0 sm:$0xff]  ;;  %v1378_v34 = vld [vmem:[#allocation5 + $0x2878] sm:$0xff] }
 0x298   :  { %3499 = vmatpush.msrb.mxu2 %v1345_v36  ;;  %3518 = vmatpush.msrb.mxu3 %v1362_v37  ;;  %v1410_v35 = vld [vmem:[#allocation5 + $0x2978] sm:$0xff]  ;;  %v1955_v36 = vpop.f32.mrf.mxu0  ;;  %v1315_v37 = vld [vmem:[#allocation5 + $0x2680] sm:$0xff] }
 0x299   :  { %3460 = vmatpush.msrb.mxu0 %v1312_v38  ;;  %3479 = vmatpush.msrb.mxu1 %v1329_v39  ;;  %v1347_v38 = vld [vmem:[#allocation5 + $0x2780] sm:$0xff]  ;;  %v1810_v39 = vld.sshfl [vmem:[#allocation1 + $0x28] sm:$0xff pattern:$0x73625140] }
 0x29a   :  { %3500 = vmatpush.msrb.mxu2 %v1344_v40  ;;  %3519 = vmatpush.msrb.mxu3 %v1361_v41  ;;  %v1812_v40 = vld.sshfl [vmem:[#allocation1 + $0x38] sm:$0xff pattern:$0x73625140]  ;;  %v1377_v41 = vld [vmem:[#allocation5 + $0x2870] sm:$0xff] }
 0x29b   :  { %3461 = vmatpush.msrb.mxu0 %v1311_v42  ;;  %3480 = vmatpush.msrb.mxu1 %v1328_v43  ;;  %v1394_v42 = vld [vmem:[#allocation5 + $0x28f8] sm:$0xff]  ;;  %v1956_v43 = vadd.f32 %v3963_v33, %v1955_v36  ;;  %v1415_v36 = vld [vmem:[#allocation5 + $0x29a0] sm:$0xff] }
 0x29c   :  { %3501 = vmatpush.msrb.mxu2 %v1343_v44  ;;  %3520 = vmatpush.msrb.mxu3 %v1360_v45  ;;  %v1409_v44 = vld [vmem:[#allocation5 + $0x2970] sm:$0xff]  ;;  %v1426_v45 = vld [vmem:[#allocation5 + $0x29f8] sm:$0xff] }
 0x29d   :  { %3462 = vmatpush.msrb.mxu0 %v1310_v46  ;;  %3481 = vmatpush.msrb.mxu1 %v1327_v47  ;;  %v1975_v46 = vpop.f32.mrf.mxu1  ;;  %v1376_v47 = vld [vmem:[#allocation5 + $0x2868] sm:$0xff]  ;;  %v1366_v33 = vld [vmem:[#allocation5 + $0x2818] sm:$0xff] }
 0x29e   :  { %3502 = vmatpush.msrb.mxu2 %v1342_v48  ;;  %3521 = vmatpush.msrb.mxu3 %v1359_v49  ;;  %v1393_v48 = vld [vmem:[#allocation5 + $0x28f0] sm:$0xff]  ;;  %v1408_v49 = vld [vmem:[#allocation5 + $0x2968] sm:$0xff] }
 0x29f   :  { %3463 = vmatpush.msrb.mxu0 %v1309_v50  ;;  %3482 = vmatpush.msrb.mxu1 %v1326_v51  ;;  %v1425_v50 = vld [vmem:[#allocation5 + $0x29f0] sm:$0xff]  ;;  %v1375_v51 = vld [vmem:[#allocation5 + $0x2860] sm:$0xff] }
 0x2a0   :  { %3503 = vmatpush.msrb.mxu2 %v1341_v52  ;;  %3522 = vmatpush.msrb.mxu3 %v1358_v53  ;;  %v1392_v52 = vld [vmem:[#allocation5 + $0x28e8] sm:$0xff]  ;;  %v1976_v53 = vadd.f32 %v1975_v46, %v1956_v43 }
 0x2a1   :  { %3464 = vmatpush.msrb.mxu0 %v1308_v54  ;;  %3483 = vmatpush.msrb.mxu1 %v1325_v55  ;;  %v1407_v54 = vld [vmem:[#allocation5 + $0x2960] sm:$0xff]  ;;  %v1424_v55 = vld [vmem:[#allocation5 + $0x29e8] sm:$0xff] }
 0x2a2   :  { %3504 = vmatpush.msrb.mxu2 %v1340_v56  ;;  %3523 = vmatpush.msrb.mxu3 %v1357_v57  ;;  %v1995_v56 = vpop.f32.mrf.mxu2  ;;  %v1374_v57 = vld [vmem:[#allocation5 + $0x2858] sm:$0xff]  ;;  %v1364_v43 = vld [vmem:[#allocation5 + $0x2808] sm:$0xff] }
 0x2a3   :  { %3465 = vmatpush.msrb.mxu0 %v1307_v58  ;;  %3484 = vmatpush.msrb.mxu1 %v1324_v59  ;;  %v1391_v58 = vld [vmem:[#allocation5 + $0x28e0] sm:$0xff]  ;;  %v1406_v59 = vld [vmem:[#allocation5 + $0x2958] sm:$0xff]  ;;  %v1396_v46 = vld [vmem:[#allocation5 + $0x2908] sm:$0xff] }
 0x2a4   :  { %3505 = vmatpush.msrb.mxu2 %v1339_v60  ;;  %3524 = vmatpush.msrb.mxu3 %v1356_v61  ;;  %v1423_v60 = vld [vmem:[#allocation5 + $0x29e0] sm:$0xff]  ;;  %v1373_v61 = vld [vmem:[#allocation5 + $0x2850] sm:$0xff] }
 0x2a5   :  { %3466 = vmatpush.msrb.mxu0 %v1306_v62  ;;  %3485 = vmatpush.msrb.mxu1 %v1323_v63  ;;  %v1390_v62 = vld [vmem:[#allocation5 + $0x28d8] sm:$0xff]  ;;  %v1996_v63 = vadd.f32 %v1995_v56, %v1976_v53  ;;  %v1412_v53 = vld [vmem:[#allocation5 + $0x2988] sm:$0xff] }
 0x2a6   :  { %3506 = vmatpush.msrb.mxu2 %v1338_v0  ;;  %3525 = vmatpush.msrb.mxu3 %v1355_v1  ;;  %v1405_v0 = vld [vmem:[#allocation5 + $0x2950] sm:$0xff]  ;;  %v1422_v1 = vld [vmem:[#allocation5 + $0x29d8] sm:$0xff] }
 0x2a7   :  { %3467 = vmatpush.msrb.mxu0 %v1305_v2  ;;  %3486 = vmatpush.msrb.mxu1 %v1322_v3  ;;  %v2015_v2 = vpop.f32.mrf.mxu3  ;;  %v1372_v3 = vld [vmem:[#allocation5 + $0x2848] sm:$0xff] }
 0x2a8   :  { %3507 = vmatpush.msrb.mxu2 %v1337_v4  ;;  %3526 = vmatpush.msrb.mxu3 %v1354_v5  ;;  %v1389_v4 = vld [vmem:[#allocation5 + $0x28d0] sm:$0xff]  ;;  %v1404_v5 = vld [vmem:[#allocation5 + $0x2948] sm:$0xff] }
 0x2a9   :  { %3468 = vmatpush.msrb.mxu0 %v1304_v6  ;;  %3487 = vmatpush.msrb.mxu1 %v1321_v7  ;;  %v1421_v6 = vld [vmem:[#allocation5 + $0x29d0] sm:$0xff]  ;;  %v1371_v7 = vld [vmem:[#allocation5 + $0x2840] sm:$0xff] }
 0x2aa   :  { %3508 = vmatpush.msrb.mxu2 %v1336_v8  ;;  %3527 = vmatpush.msrb.mxu3 %v1353_v9  ;;  %v1388_v8 = vld [vmem:[#allocation5 + $0x28c8] sm:$0xff]  ;;  %v2016_v9 = vadd.f32 %v2015_v2, %v1996_v63  ;;  %v1458_v2 = vld [vmem:[#allocation5 + $0x2af8] sm:$0xff] }
 0x2ab   :  { %3469 = vmatpush.msrb.mxu0 %v1303_v10  ;;  %3488 = vmatpush.msrb.mxu1 %v1320_v11  ;;  %v1403_v10 = vld [vmem:[#allocation5 + $0x2940] sm:$0xff]  ;;  %v1420_v11 = vld [vmem:[#allocation5 + $0x29c8] sm:$0xff] }
 0x2ac   :  { %3509 = vmatpush.msrb.mxu2 %v1335_v12  ;;  %3528 = vmatpush.msrb.mxu3 %v1352_v13  ;;  %v2035_v12 = vpop.f32.mrf.mxu0  ;;  %v1370_v13 = vld [vmem:[#allocation5 + $0x2838] sm:$0xff]  ;;  %v1818_v63 = vld.sshfl [vmem:[#allocation1 + $0x18] sm:$0xff pattern:$0x73625140] }
 0x2ad   :  { %3470 = vmatpush.msrb.mxu0 %v1302_v14  ;;  %3489 = vmatpush.msrb.mxu1 %v1319_v15  ;;  %v1387_v14 = vld [vmem:[#allocation5 + $0x28c0] sm:$0xff]  ;;  %v1402_v15 = vld [vmem:[#allocation5 + $0x2938] sm:$0xff] }
 0x2ae   :  { %3510 = vmatpush.msrb.mxu2 %v1334_v16  ;;  %3529 = vmatpush.msrb.mxu3 %v1351_v17  ;;  %v1419_v16 = vld [vmem:[#allocation5 + $0x29c0] sm:$0xff]  ;;  %v1369_v17 = vld [vmem:[#allocation5 + $0x2830] sm:$0xff] }
 0x2af   :  { %3471 = vmatpush.msrb.mxu0 %v1301_v18  ;;  %3490 = vmatpush.msrb.mxu1 %v1318_v19  ;;  %v1386_v18 = vld [vmem:[#allocation5 + $0x28b8] sm:$0xff]  ;;  %v2036_v19 = vadd.f32 %v2035_v12, %v2016_v9  ;;  %v1472_v9 = vld [vmem:[#allocation5 + $0x2b68] sm:$0xff]  ;;  %v1439_v12 = vld [vmem:[#allocation5 + $0x2a60] sm:$0xff] }
 0x2b0   :  { %3511 = vmatpush.msrb.mxu2 %v1333_v20  ;;  %3530 = vmatpush.msrb.mxu3 %v1350_v21  ;;  %v1401_v20 = vld [vmem:[#allocation5 + $0x2930] sm:$0xff]  ;;  %v1418_v21 = vld [vmem:[#allocation5 + $0x29b8] sm:$0xff] }
 0x2b1   :  { %3472 = vmatpush.msrb.mxu0 %v1300_v22  ;;  %3491 = vmatpush.msrb.mxu1 %v1317_v23  ;;  %v2055_v22 = vpop.f32.mrf.mxu1  ;;  %v1368_v23 = vld [vmem:[#allocation5 + $0x2828] sm:$0xff] }
 0x2b2   :  { %3512 = vmatpush.msrb.mxu2 %v1332_v25  ;;  %3531 = vmatpush.msrb.mxu3 %v1349_v26  ;;  %v1400_v25 = vld [vmem:[#allocation5 + $0x2928] sm:$0xff]  ;;  %v1417_v26 = vld [vmem:[#allocation5 + $0x29b0] sm:$0xff] }
 0x2b3   :  { %3473 = vmatpush.msrb.mxu0 %v1299_v27  ;;  %3492 = vmatpush.msrb.mxu1 %v1316_v28  ;;  %v1367_v27 = vld [vmem:[#allocation5 + $0x2820] sm:$0xff]  ;;  %v1384_v28 = vld [vmem:[#allocation5 + $0x28a8] sm:$0xff] }
 0x2b4   :  { %3513 = vmatpush.msrb.mxu2 %v1331_v29  ;;  %3532 = vmatpush.msrb.mxu3 %v1348_v30  ;;  %v2056_v29 = vadd.f32 %v2055_v22, %v2036_v19  ;;  %v1399_v30 = vld [vmem:[#allocation5 + $0x2920] sm:$0xff]  ;;  %v1437_v22 = vld [vmem:[#allocation5 + $0x2a50] sm:$0xff] }
 0x2b5   :  { %3474 = vmatmul.f32.vlgmr.msrb.gmra.mxu0 %v1809_v31  ;;  %3514 = vmatmul.f32.vlgmr.msrb.gmra.mxu2 %v1811_v32  ;;  %v1416_v31 = vld [vmem:[#allocation5 + $0x29a8] sm:$0xff]  ;;  %v2075_v32 = vpop.f32.mrf.mxu2 }
 0x2b6   :  { %3538 = vmatpush.msra.mxu0 %v1378_v34  ;;  %3578 = vmatpush.msra.mxu2 %v1410_v35  ;;  %v1383_v34 = vld [vmem:[#allocation5 + $0x28a0] sm:$0xff]  ;;  %v1398_v35 = vld [vmem:[#allocation5 + $0x2918] sm:$0xff] }
 0x2b7   :  { %3493 = vmatpush.msrb.mxu1 %v1315_v37  ;;  %3533 = vmatpush.msrb.mxu3 %v1347_v38  ;;  %v1365_v37 = vld [vmem:[#allocation5 + $0x2810] sm:$0xff]  ;;  %v1382_v38 = vld [vmem:[#allocation5 + $0x2898] sm:$0xff] }
 0x2b8   :  { %3494 = vmatmul.f32.vlgmr.msrb.gmra.mxu1 %v1810_v39  ;;  %3534 = vmatmul.f32.vlgmr.msrb.gmra.mxu3 %v1812_v40  ;;  %v2076_v39 = vadd.f32 %v2075_v32, %v2056_v29  ;;  %v1397_v40 = vld [vmem:[#allocation5 + $0x2910] sm:$0xff] }
 0x2b9   :  { %3539 = vmatpush.msra.mxu0 %v1377_v41  ;;  %3558 = vmatpush.msra.mxu1 %v1394_v42  ;;  %v1414_v41 = vld [vmem:[#allocation5 + $0x2998] sm:$0xff]  ;;  %v2095_v42 = vpop.f32.mrf.mxu3  ;;  %v1453_v29 = vld [vmem:[#allocation5 + $0x2ad0] sm:$0xff] }
 0x2ba   :  { %3579 = vmatpush.msra.mxu2 %v1409_v44  ;;  %3598 = vmatpush.msra.mxu3 %v1426_v45  ;;  %v1381_v44 = vld [vmem:[#allocation5 + $0x2890] sm:$0xff]  ;;  %v79_v45 = vld [vmem:[#allocation2 + $0xa8] sm:$0xff] }
 0x2bb   :  { %3540 = vmatpush.msra.mxu0 %v1376_v47  ;;  %3559 = vmatpush.msra.mxu1 %v1393_v48  ;;  %v1413_v47 = vld [vmem:[#allocation5 + $0x2990] sm:$0xff]  ;;  %1814 = vst [vmem:[#allocation1 + $0x20] ss:$4 sm:$0xff] %v79_v45  ;;  %v2115_v48 = vpop.f32.mrf.mxu0  ;;  %v1450_v45 = vld [vmem:[#allocation5 + $0x2ab8] sm:$0xff] }
 0x2bc   :  { %3580 = vmatpush.msra.mxu2 %v1408_v49  ;;  %3599 = vmatpush.msra.mxu3 %v1425_v50  ;;  %v1363_v49 = vld [vmem:[#allocation5 + $0x2800] sm:$0xff]  ;;  %v1380_v50 = vld [vmem:[#allocation5 + $0x2888] sm:$0xff] }
 0x2bd   :  { %3541 = vmatpush.msra.mxu0 %v1375_v51  ;;  %3560 = vmatpush.msra.mxu1 %v1392_v52  ;;  %v2096_v51 = vadd.f32 %v2095_v42, %v2076_v39  ;;  %v1395_v52 = vld [vmem:[#allocation5 + $0x2900] sm:$0xff] }
 0x2be   :  { %3581 = vmatpush.msra.mxu2 %v1407_v54  ;;  %3600 = vmatpush.msra.mxu3 %v1424_v55  ;;  %v1815_v54 = vld.sshfl [vmem:[#allocation1] sm:$0xff pattern:$0x73625140]  ;;  %v1817_v55 = vld.sshfl [vmem:[#allocation1 + $0x10] sm:$0xff pattern:$0x73625140] }
 0x2bf   :  { %3542 = vmatpush.msra.mxu0 %v1374_v57  ;;  %3561 = vmatpush.msra.mxu1 %v1391_v58  ;;  %v2116_v56 = vadd.f32 %v2115_v48, %v2096_v51  ;;  %v1442_v57 = vld [vmem:[#allocation5 + $0x2a78] sm:$0xff]  ;;  %v1451_v39 = vld [vmem:[#allocation5 + $0x2ac0] sm:$0xff] }
 0x2c0   :  { %3582 = vmatpush.msra.mxu2 %v1406_v59  ;;  %3601 = vmatpush.msra.mxu3 %v1423_v60  ;;  %v1474_v58 = vld [vmem:[#allocation5 + $0x2b78] sm:$0xff]  ;;  %v2135_v59 = vpop.f32.mrf.mxu1  ;;  %v1379_v60 = vld [vmem:[#allocation5 + $0x2880] sm:$0xff] }
 0x2c1   :  { %3543 = vmatpush.msra.mxu0 %v1373_v61  ;;  %3562 = vmatpush.msra.mxu1 %v1390_v62  ;;  %v1411_v61 = vld [vmem:[#allocation5 + $0x2980] sm:$0xff]  ;;  %v1816_v62 = vld.sshfl [vmem:[#allocation1 + $0x8] sm:$0xff pattern:$0x73625140] }
 0x2c2   :  { %3583 = vmatpush.msra.mxu2 %v1405_v0  ;;  %3602 = vmatpush.msra.mxu3 %v1422_v1  ;;  %v2155_v0 = vpop.f32.mrf.mxu2  ;;  %v1441_v1 = vld [vmem:[#allocation5 + $0x2a70] sm:$0xff]  ;;  %v1483_v42 = vld [vmem:[#allocation5 + $0x2bc0] sm:$0xff] }
 0x2c3   :  { %3544 = vmatpush.msra.mxu0 %v1372_v3  ;;  %3563 = vmatpush.msra.mxu1 %v1389_v4  ;;  %v2136_v3 = vadd.f32 %v2135_v59, %v2116_v56  ;;  %v1473_v4 = vld [vmem:[#allocation5 + $0x2b70] sm:$0xff] }
 0x2c4   :  { %3584 = vmatpush.msra.mxu2 %v1404_v5  ;;  %3603 = vmatpush.msra.mxu3 %v1421_v6  ;;  %v1490_v5 = vld [vmem:[#allocation5 + $0x2bf8] sm:$0xff]  ;;  %v1440_v6 = vld [vmem:[#allocation5 + $0x2a68] sm:$0xff] }
 0x2c5   :  { %3545 = vmatpush.msra.mxu0 %v1371_v7  ;;  %3564 = vmatpush.msra.mxu1 %v1388_v8  ;;  %v1457_v7 = vld [vmem:[#allocation5 + $0x2af0] sm:$0xff]  ;;  %v2156_v8 = vadd.f32 %v2155_v0, %v2136_v3 }
 0x2c6   :  { %3585 = vmatpush.msra.mxu2 %v1403_v10  ;;  %3604 = vmatpush.msra.mxu3 %v1420_v11  ;;  %v1489_v10 = vld [vmem:[#allocation5 + $0x2bf0] sm:$0xff]  ;;  %v2175_v11 = vpop.f32.mrf.mxu3 }
 0x2c7   :  { %3546 = vmatpush.msra.mxu0 %v1370_v13  ;;  %3565 = vmatpush.msra.mxu1 %v1387_v14  ;;  %v1456_v13 = vld [vmem:[#allocation5 + $0x2ae8] sm:$0xff]  ;;  %v1471_v14 = vld [vmem:[#allocation5 + $0x2b60] sm:$0xff]  ;;  %v2176_v19 = vadd.f32 %v2175_v11, %v2156_v8  ;;  %v1477_v11 = vld [vmem:[#allocation5 + $0x2b90] sm:$0xff] }
 0x2c8   :  { %3586 = vmatpush.msra.mxu2 %v1402_v15  ;;  %3605 = vmatpush.msra.mxu3 %v1419_v16  ;;  %v1488_v15 = vld [vmem:[#allocation5 + $0x2be8] sm:$0xff]  ;;  %v2195_v16 = vpop.f32.mrf.mxu0 }
 0x2c9   :  { %3547 = vmatpush.msra.mxu0 %v1369_v17  ;;  %3566 = vmatpush.msra.mxu1 %v1386_v18  ;;  %v1438_v17 = vld [vmem:[#allocation5 + $0x2a58] sm:$0xff]  ;;  %v1455_v18 = vld [vmem:[#allocation5 + $0x2ae0] sm:$0xff]  ;;  %v80_v8 = vld [vmem:[#allocation2 + $0xb0] sm:$0xff] }
 0x2ca   :  { %3587 = vmatpush.msra.mxu2 %v1401_v20  ;;  %3606 = vmatpush.msra.mxu3 %v1418_v21  ;;  %v1470_v20 = vld [vmem:[#allocation5 + $0x2b58] sm:$0xff]  ;;  %v1487_v21 = vld [vmem:[#allocation5 + $0x2be0] sm:$0xff]  ;;  %v2235_v32 = vpop.f32.mrf.mxu2  ;;  %1823 = vst [vmem:[#allocation1] ss:$4 sm:$0xff] %v80_v8 }
 0x2cb   :  { %3548 = vmatpush.msra.mxu0 %v1368_v23  ;;  %3567 = vmatpush.msra.mxu1 %v1385_v24  ;;  %v1454_v23 = vld [vmem:[#allocation5 + $0x2ad8] sm:$0xff]  ;;  %v2196_v24 = vadd.f32 %v2195_v16, %v2176_v19  ;;  %v1476_v16 = vld [vmem:[#allocation5 + $0x2b88] sm:$0xff]  ;;  %v1821_v19 = vld.sshfl [vmem:[#allocation1 + $0x30] sm:$0xff pattern:$0x73625140] }
 0x2cc   :  { %3588 = vmatpush.msra.mxu2 %v1400_v25  ;;  %3607 = vmatpush.msra.mxu3 %v1417_v26  ;;  %v1469_v25 = vld [vmem:[#allocation5 + $0x2b50] sm:$0xff]  ;;  %v1486_v26 = vld [vmem:[#allocation5 + $0x2bd8] sm:$0xff] }
 0x2cd   :  { %3549 = vmatpush.msra.mxu0 %v1367_v27  ;;  %3568 = vmatpush.msra.mxu1 %v1384_v28  ;;  %v2215_v27 = vpop.f32.mrf.mxu1  ;;  %v1436_v28 = vld [vmem:[#allocation5 + $0x2a48] sm:$0xff]  ;;  %v1514_v8 = vld [vmem:[#allocation5 + $0x2cb8] sm:$0xff] }
 0x2ce   :  { %3589 = vmatpush.msra.mxu2 %v1399_v30  ;;  %3608 = vmatpush.msra.mxu3 %v1416_v31  ;;  %v1468_v30 = vld [vmem:[#allocation5 + $0x2b48] sm:$0xff]  ;;  %v1485_v31 = vld [vmem:[#allocation5 + $0x2bd0] sm:$0xff] }
 0x2cf   :  { %3550 = vmatpush.msra.mxu0 %v1366_v33  ;;  %3569 = vmatpush.msra.mxu1 %v1383_v34  ;;  %v1435_v33 = vld [vmem:[#allocation5 + $0x2a40] sm:$0xff]  ;;  %v1452_v34 = vld [vmem:[#allocation5 + $0x2ac8] sm:$0xff] }
 0x2d0   :  { %3590 = vmatpush.msra.mxu2 %v1398_v35  ;;  %3609 = vmatpush.msra.mxu3 %v1415_v36  ;;  %v2216_v35 = vadd.f32 %v2215_v27, %v2196_v24  ;;  %v1467_v36 = vld [vmem:[#allocation5 + $0x2b40] sm:$0xff]  ;;  %v2275_v48 = vpop.f32.mrf.mxu0  ;;  %v1822_v27 = vld.sshfl [vmem:[#allocation1 + $0x38] sm:$0xff pattern:$0x73625140] }
 0x2d1   :  { %3551 = vmatpush.msra.mxu0 %v1365_v37  ;;  %3570 = vmatpush.msra.mxu1 %v1382_v38  ;;  %v1484_v37 = vld [vmem:[#allocation5 + $0x2bc8] sm:$0xff]  ;;  %v1434_v38 = vld [vmem:[#allocation5 + $0x2a38] sm:$0xff]  ;;  %v1475_v24 = vld [vmem:[#allocation5 + $0x2b80] sm:$0xff] }
 0x2d2   :  { %3591 = vmatpush.msra.mxu2 %v1397_v40  ;;  %3610 = vmatpush.msra.mxu3 %v1414_v41  ;;  %v2236_v40 = vadd.f32 %v2235_v32, %v2216_v35  ;;  %v1466_v41 = vld [vmem:[#allocation5 + $0x2b38] sm:$0xff]  ;;  %v2315_v0 = vpop.f32.mrf.mxu2  ;;  %v1521_v35 = vld [vmem:[#allocation5 + $0x2cf0] sm:$0xff] }
 0x2d3   :  { %3552 = vmatpush.msra.mxu0 %v1364_v43  ;;  %3571 = vmatpush.msra.mxu1 %v1381_v44  ;;  %v2255_v43 = vpop.f32.mrf.mxu3  ;;  %v1433_v44 = vld [vmem:[#allocation5 + $0x2a30] sm:$0xff]  ;;  %v1554_v32 = vld [vmem:[#allocation5 + $0x2df8] sm:$0xff] }
 0x2d4   :  { %3592 = vmatpush.msra.mxu2 %v1396_v46  ;;  %3611 = vmatpush.msra.mxu3 %v1413_v47  ;;  %v1465_v46 = vld [vmem:[#allocation5 + $0x2b30] sm:$0xff]  ;;  %v1482_v47 = vld [vmem:[#allocation5 + $0x2bb8] sm:$0xff]  ;;  %v2256_v51 = vadd.f32 %v2255_v43, %v2236_v40  ;;  %v1520_v40 = vld [vmem:[#allocation5 + $0x2ce8] sm:$0xff] }
 0x2d5   :  { %3553 = vmatpush.msra.mxu0 %v1363_v49  ;;  %3572 = vmatpush.msra.mxu1 %v1380_v50  ;;  %v1432_v49 = vld [vmem:[#allocation5 + $0x2a28] sm:$0xff]  ;;  %v1449_v50 = vld [vmem:[#allocation5 + $0x2ab0] sm:$0xff]  ;;  %v2295_v59 = vpop.f32.mrf.mxu1 }
 0x2d6   :  { %3593 = vmatpush.msra.mxu2 %v1395_v52  ;;  %3612 = vmatpush.msra.mxu3 %v1412_v53  ;;  %v1464_v52 = vld [vmem:[#allocation5 + $0x2b28] sm:$0xff]  ;;  %v1481_v53 = vld [vmem:[#allocation5 + $0x2bb0] sm:$0xff]  ;;  %v2276_v56 = vadd.f32 %v2275_v48, %v2256_v51  ;;  %v1551_v48 = vld [vmem:[#allocation5 + $0x2de0] sm:$0xff] }
 0x2d7   :  { %3554 = vmatmul.f32.vlgmr.msra.gmra.mxu0 %v1815_v54  ;;  %3594 = vmatmul.f32.vlgmr.msra.gmra.mxu2 %v1817_v55  ;;  %v1431_v54 = vld [vmem:[#allocation5 + $0x2a20] sm:$0xff]  ;;  %v1448_v55 = vld [vmem:[#allocation5 + $0x2aa8] sm:$0xff]  ;;  %v1518_v51 = vld [vmem:[#allocation5 + $0x2cd8] sm:$0xff] }
 0x2d8   :  { %3618 = vmatpush.msrb.mxu0 %v1442_v57  ;;  %3658 = vmatpush.msrb.mxu2 %v1474_v58  ;;  %v1463_v57 = vld [vmem:[#allocation5 + $0x2b20] sm:$0xff]  ;;  %v1480_v58 = vld [vmem:[#allocation5 + $0x2ba8] sm:$0xff]  ;;  %v2296_v3 = vadd.f32 %v2295_v59, %v2276_v56  ;;  %v1517_v56 = vld [vmem:[#allocation5 + $0x2cd0] sm:$0xff] }
 0x2d9   :  { %3573 = vmatpush.msra.mxu1 %v1379_v60  ;;  %3613 = vmatpush.msra.mxu3 %v1411_v61  ;;  %v1430_v60 = vld [vmem:[#allocation5 + $0x2a18] sm:$0xff]  ;;  %v1447_v61 = vld [vmem:[#allocation5 + $0x2aa0] sm:$0xff]  ;;  %v1552_v43 = vld [vmem:[#allocation5 + $0x2de8] sm:$0xff] }
 0x2da   :  { %3574 = vmatmul.f32.vlgmr.msra.gmra.mxu1 %v1816_v62  ;;  %3614 = vmatmul.f32.vlgmr.msra.gmra.mxu3 %v1818_v63  ;;  %v1462_v62 = vld [vmem:[#allocation5 + $0x2b18] sm:$0xff]  ;;  %v1479_v63 = vld [vmem:[#allocation5 + $0x2ba0] sm:$0xff]  ;;  %v1549_v59 = vld [vmem:[#allocation5 + $0x2dd0] sm:$0xff] }
 0x2db   :  { %3619 = vmatpush.msrb.mxu0 %v1441_v1  ;;  %3638 = vmatpush.msrb.mxu1 %v1458_v2  ;;  %v1429_v1 = vld [vmem:[#allocation5 + $0x2a10] sm:$0xff]  ;;  %v1446_v2 = vld [vmem:[#allocation5 + $0x2a98] sm:$0xff] }
 0x2dc   :  { %3659 = vmatpush.msrb.mxu2 %v1473_v4  ;;  %3678 = vmatpush.msrb.mxu3 %v1490_v5  ;;  %v1461_v4 = vld [vmem:[#allocation5 + $0x2b10] sm:$0xff]  ;;  %v1478_v5 = vld [vmem:[#allocation5 + $0x2b98] sm:$0xff] }
 0x2dd   :  { %3620 = vmatpush.msrb.mxu0 %v1440_v6  ;;  %3639 = vmatpush.msrb.mxu1 %v1457_v7  ;;  %v1428_v6 = vld [vmem:[#allocation5 + $0x2a08] sm:$0xff]  ;;  %v1445_v7 = vld [vmem:[#allocation5 + $0x2a90] sm:$0xff] }
 0x2de   :  { %3660 = vmatpush.msrb.mxu2 %v1472_v9  ;;  %3679 = vmatpush.msrb.mxu3 %v1489_v10  ;;  %v2316_v9 = vadd.f32 %v2315_v0, %v2296_v3  ;;  %v1460_v10 = vld [vmem:[#allocation5 + $0x2b08] sm:$0xff]  ;;  %v1515_v3 = vld [vmem:[#allocation5 + $0x2cc0] sm:$0xff] }
 0x2df   :  { %3621 = vmatpush.msrb.mxu0 %v1439_v12  ;;  %3640 = vmatpush.msrb.mxu1 %v1456_v13  ;;  %v2335_v12 = vpop.f32.mrf.mxu3  ;;  %v1427_v13 = vld [vmem:[#allocation5 + $0x2a00] sm:$0xff]  ;;  %v1548_v0 = vld [vmem:[#allocation5 + $0x2dc8] sm:$0xff] }
 0x2e0   :  { %3661 = vmatpush.msrb.mxu2 %v1471_v14  ;;  %3680 = vmatpush.msrb.mxu3 %v1488_v15  ;;  %v1444_v14 = vld [vmem:[#allocation5 + $0x2a88] sm:$0xff]  ;;  %v1459_v15 = vld [vmem:[#allocation5 + $0x2b00] sm:$0xff] }
 0x2e1   :  { %3622 = vmatpush.msrb.mxu0 %v1438_v17  ;;  %3641 = vmatpush.msrb.mxu1 %v1455_v18  ;;  %v2355_v17 = vpop.f32.mrf.mxu0  ;;  %v1819_v18 = vld.sshfl [vmem:[#allocation1 + $0x20] sm:$0xff pattern:$0x73625140] }
 0x2e2   :  { %3662 = vmatpush.msrb.mxu2 %v1470_v20  ;;  %3681 = vmatpush.msrb.mxu3 %v1487_v21  ;;  %v2336_v20 = vadd.f32 %v2335_v12, %v2316_v9  ;;  %v1506_v21 = vld [vmem:[#allocation5 + $0x2c78] sm:$0xff] }
 0x2e3   :  { %3623 = vmatpush.msrb.mxu0 %v1437_v22  ;;  %3642 = vmatpush.msrb.mxu1 %v1454_v23  ;;  %v1538_v22 = vld [vmem:[#allocation5 + $0x2d78] sm:$0xff]  ;;  %v1443_v23 = vld [vmem:[#allocation5 + $0x2a80] sm:$0xff] }
 0x2e4   :  { %3663 = vmatpush.msrb.mxu2 %v1469_v25  ;;  %3682 = vmatpush.msrb.mxu3 %v1486_v26  ;;  %v2356_v25 = vadd.f32 %v2355_v17, %v2336_v20  ;;  %v1820_v26 = vld.sshfl [vmem:[#allocation1 + $0x28] sm:$0xff pattern:$0x73625140] }
 0x2e5   :  { %3624 = vmatpush.msrb.mxu0 %v1436_v28  ;;  %3643 = vmatpush.msrb.mxu1 %v1453_v29  ;;  %v2375_v28 = vpop.f32.mrf.mxu1  ;;  %v1505_v29 = vld [vmem:[#allocation5 + $0x2c70] sm:$0xff] }
 0x2e6   :  { %3664 = vmatpush.msrb.mxu2 %v1468_v30  ;;  %3683 = vmatpush.msrb.mxu3 %v1485_v31  ;;  %v1522_v30 = vld [vmem:[#allocation5 + $0x2cf8] sm:$0xff]  ;;  %v1537_v31 = vld [vmem:[#allocation5 + $0x2d70] sm:$0xff] }
 0x2e7   :  { %3625 = vmatpush.msrb.mxu0 %v1435_v33  ;;  %3644 = vmatpush.msrb.mxu1 %v1452_v34  ;;  %v2395_v33 = vpop.f32.mrf.mxu2  ;;  %v1504_v34 = vld [vmem:[#allocation5 + $0x2c68] sm:$0xff] }
 0x2e8   :  { %3665 = vmatpush.msrb.mxu2 %v1467_v36  ;;  %3684 = vmatpush.msrb.mxu3 %v1484_v37  ;;  %v2376_v36 = vadd.f32 %v2375_v28, %v2356_v25  ;;  %v1536_v37 = vld [vmem:[#allocation5 + $0x2d68] sm:$0xff] }
 0x2e9   :  { %3626 = vmatpush.msrb.mxu0 %v1434_v38  ;;  %3645 = vmatpush.msrb.mxu1 %v1451_v39  ;;  %v1553_v38 = vld [vmem:[#allocation5 + $0x2df0] sm:$0xff]  ;;  %v1503_v39 = vld [vmem:[#allocation5 + $0x2c60] sm:$0xff] }
 0x2ea   :  { %3666 = vmatpush.msrb.mxu2 %v1466_v41  ;;  %3685 = vmatpush.msrb.mxu3 %v1483_v42  ;;  %v2396_v41 = vadd.f32 %v2395_v33, %v2376_v36  ;;  %v1535_v42 = vld [vmem:[#allocation5 + $0x2d60] sm:$0xff]  ;;  %v81_v36 = vld [vmem:[#allocation2 + $0xb8] sm:$0xff] }
 0x2eb   :  { %3627 = vmatpush.msrb.mxu0 %v1433_v44  ;;  %3646 = vmatpush.msrb.mxu1 %v1450_v45  ;;  %v2415_v44 = vpop.f32.mrf.mxu3  ;;  %v1502_v45 = vld [vmem:[#allocation5 + $0x2c58] sm:$0xff]  ;;  %1824 = vst [vmem:[#allocation1 + $0x20] ss:$4 sm:$0xff] %v81_v36 }
 0x2ec   :  { %3667 = vmatpush.msrb.mxu2 %v1465_v46  ;;  %3686 = vmatpush.msrb.mxu3 %v1482_v47  ;;  %v1519_v46 = vld [vmem:[#allocation5 + $0x2ce0] sm:$0xff]  ;;  %v1534_v47 = vld [vmem:[#allocation5 + $0x2d58] sm:$0xff] }
 0x2ed   :  { %3628 = vmatpush.msrb.mxu0 %v1432_v49  ;;  %3647 = vmatpush.msrb.mxu1 %v1449_v50  ;;  %v2435_v49 = vpop.f32.mrf.mxu0  ;;  %v1501_v50 = vld [vmem:[#allocation5 + $0x2c50] sm:$0xff]  ;;  %v1578_v36 = vld [vmem:[#allocation5 + $0x2eb8] sm:$0xff] }
 0x2ee   :  { %3668 = vmatpush.msrb.mxu2 %v1464_v52  ;;  %3687 = vmatpush.msrb.mxu3 %v1481_v53  ;;  %v2416_v52 = vadd.f32 %v2415_v44, %v2396_v41  ;;  %v1533_v53 = vld [vmem:[#allocation5 + $0x2d50] sm:$0xff]  ;;  %v1508_v41 = vld [vmem:[#allocation5 + $0x2c88] sm:$0xff] }
 0x2ef   :  { %3629 = vmatpush.msrb.mxu0 %v1431_v54  ;;  %3648 = vmatpush.msrb.mxu1 %v1448_v55  ;;  %v1550_v54 = vld [vmem:[#allocation5 + $0x2dd8] sm:$0xff]  ;;  %v1500_v55 = vld [vmem:[#allocation5 + $0x2c48] sm:$0xff] }
 0x2f0   :  { %3669 = vmatpush.msrb.mxu2 %v1463_v57  ;;  %3688 = vmatpush.msrb.mxu3 %v1480_v58  ;;  %v2436_v57 = vadd.f32 %v2435_v49, %v2416_v52  ;;  %v1532_v58 = vld [vmem:[#allocation5 + $0x2d48] sm:$0xff]  ;;  %v1602_v49 = vld [vmem:[#allocation5 + $0x2f78] sm:$0xff]  ;;  %v1539_v52 = vld [vmem:[#allocation5 + $0x2d80] sm:$0xff] }
 0x2f1   :  { %3630 = vmatpush.msrb.mxu0 %v1430_v60  ;;  %3649 = vmatpush.msrb.mxu1 %v1447_v61  ;;  %v2455_v60 = vpop.f32.mrf.mxu1  ;;  %v1499_v61 = vld [vmem:[#allocation5 + $0x2c40] sm:$0xff]  ;;  %v1540_v44 = vld [vmem:[#allocation5 + $0x2d88] sm:$0xff] }
 0x2f2   :  { %3670 = vmatpush.msrb.mxu2 %v1462_v62  ;;  %3689 = vmatpush.msrb.mxu3 %v1479_v63  ;;  %v1516_v62 = vld [vmem:[#allocation5 + $0x2cc8] sm:$0xff]  ;;  %v1531_v63 = vld [vmem:[#allocation5 + $0x2d40] sm:$0xff] }
 0x2f3   :  { %3631 = vmatpush.msrb.mxu0 %v1429_v1  ;;  %3650 = vmatpush.msrb.mxu1 %v1446_v2  ;;  %v2475_v1 = vpop.f32.mrf.mxu2  ;;  %v1498_v2 = vld [vmem:[#allocation5 + $0x2c38] sm:$0xff]  ;;  %v2495_v12 = vpop.f32.mrf.mxu3 }
 0x2f4   :  { %3671 = vmatpush.msrb.mxu2 %v1461_v4  ;;  %3690 = vmatpush.msrb.mxu3 %v1478_v5  ;;  %v2456_v4 = vadd.f32 %v2455_v60, %v2436_v57  ;;  %v1530_v5 = vld [vmem:[#allocation5 + $0x2d38] sm:$0xff] }
 0x2f5   :  { %3632 = vmatpush.msrb.mxu0 %v1428_v6  ;;  %3651 = vmatpush.msrb.mxu1 %v1445_v7  ;;  %v1547_v6 = vld [vmem:[#allocation5 + $0x2dc0] sm:$0xff]  ;;  %v1497_v7 = vld [vmem:[#allocation5 + $0x2c30] sm:$0xff]  ;;  %v2515_v17 = vpop.f32.mrf.mxu0  ;;  %v1586_v57 = vld [vmem:[#allocation5 + $0x2ef8] sm:$0xff] }
 0x2f6   :  { %3672 = vmatpush.msrb.mxu2 %v1460_v10  ;;  %3691 = vmatpush.msrb.mxu3 %v1477_v11  ;;  %v2476_v9 = vadd.f32 %v2475_v1, %v2456_v4  ;;  %v1529_v10 = vld [vmem:[#allocation5 + $0x2d30] sm:$0xff]  ;;  %v1546_v11 = vld [vmem:[#allocation5 + $0x2db8] sm:$0xff]  ;;  %v1584_v4 = vld [vmem:[#allocation5 + $0x2ee8] sm:$0xff] }
 0x2f7   :  { %3633 = vmatpush.msrb.mxu0 %v1427_v13  ;;  %3652 = vmatpush.msrb.mxu1 %v1444_v14  ;;  %v1496_v13 = vld [vmem:[#allocation5 + $0x2c28] sm:$0xff]  ;;  %v1513_v14 = vld [vmem:[#allocation5 + $0x2cb0] sm:$0xff]  ;;  %v1618_v60 = vld [vmem:[#allocation5 + $0x2ff8] sm:$0xff] }
 0x2f8   :  { %3673 = vmatpush.msrb.mxu2 %v1459_v15  ;;  %3692 = vmatpush.msrb.mxu3 %v1476_v16  ;;  %v1528_v15 = vld [vmem:[#allocation5 + $0x2d28] sm:$0xff]  ;;  %v1545_v16 = vld [vmem:[#allocation5 + $0x2db0] sm:$0xff]  ;;  %v2496_v20 = vadd.f32 %v2495_v12, %v2476_v9  ;;  %v1583_v9 = vld [vmem:[#allocation5 + $0x2ee0] sm:$0xff] }
 0x2f9   :  { %3634 = vmatmul.f32.vlgmr.msrb.gmra.mxu0 %v1819_v18  ;;  %3674 = vmatmul.f32.vlgmr.msrb.gmra.mxu2 %v1821_v19  ;;  %v1495_v18 = vld [vmem:[#allocation5 + $0x2c20] sm:$0xff]  ;;  %v1512_v19 = vld [vmem:[#allocation5 + $0x2ca8] sm:$0xff]  ;;  %v2535_v28 = vpop.f32.mrf.mxu1  ;;  %v1617_v1 = vld [vmem:[#allocation5 + $0x2ff0] sm:$0xff] }
 0x2fa   :  { %3698 = vmatpush.msra.mxu0 %v1506_v21  ;;  %3738 = vmatpush.msra.mxu2 %v1538_v22  ;;  %v1527_v21 = vld [vmem:[#allocation5 + $0x2d20] sm:$0xff]  ;;  %v1544_v22 = vld [vmem:[#allocation5 + $0x2da8] sm:$0xff]  ;;  %v2516_v25 = vadd.f32 %v2515_v17, %v2496_v20  ;;  %v1614_v17 = vld [vmem:[#allocation5 + $0x2fd8] sm:$0xff] }
 0x2fb   :  { %3653 = vmatpush.msrb.mxu1 %v1443_v23  ;;  %3693 = vmatpush.msrb.mxu3 %v1475_v24  ;;  %v1494_v23 = vld [vmem:[#allocation5 + $0x2c18] sm:$0xff]  ;;  %v1511_v24 = vld [vmem:[#allocation5 + $0x2ca0] sm:$0xff]  ;;  %v2555_v33 = vpop.f32.mrf.mxu2  ;;  %v1581_v20 = vld [vmem:[#allocation5 + $0x2ed0] sm:$0xff] }
 0x2fc   :  { %3654 = vmatmul.f32.vlgmr.msrb.gmra.mxu1 %v1820_v26  ;;  %3694 = vmatmul.f32.vlgmr.msrb.gmra.mxu3 %v1822_v27  ;;  %v1526_v26 = vld [vmem:[#allocation5 + $0x2d18] sm:$0xff]  ;;  %v1543_v27 = vld [vmem:[#allocation5 + $0x2da0] sm:$0xff] }
 0x2fd   :  { %3699 = vmatpush.msra.mxu0 %v1505_v29  ;;  %3718 = vmatpush.msra.mxu1 %v1522_v30  ;;  %v1493_v29 = vld [vmem:[#allocation5 + $0x2c10] sm:$0xff]  ;;  %v1510_v30 = vld [vmem:[#allocation5 + $0x2c98] sm:$0xff]  ;;  %v1615_v12 = vld [vmem:[#allocation5 + $0x2fe0] sm:$0xff] }
 0x2fe   :  { %3739 = vmatpush.msra.mxu2 %v1537_v31  ;;  %3758 = vmatpush.msra.mxu3 %v1554_v32  ;;  %v1525_v31 = vld [vmem:[#allocation5 + $0x2d10] sm:$0xff]  ;;  %v1542_v32 = vld [vmem:[#allocation5 + $0x2d98] sm:$0xff] }
 0x2ff   :  { %3700 = vmatpush.msra.mxu0 %v1504_v34  ;;  %3719 = vmatpush.msra.mxu1 %v1521_v35  ;;  %v1492_v34 = vld [vmem:[#allocation5 + $0x2c08] sm:$0xff]  ;;  %v1509_v35 = vld [vmem:[#allocation5 + $0x2c90] sm:$0xff] }
 0x300   :  { %3740 = vmatpush.msra.mxu2 %v1536_v37  ;;  %3759 = vmatpush.msra.mxu3 %v1553_v38  ;;  %v2536_v37 = vadd.f32 %v2535_v28, %v2516_v25  ;;  %v1524_v38 = vld [vmem:[#allocation5 + $0x2d08] sm:$0xff] }
 0x301   :  { %3701 = vmatpush.msra.mxu0 %v1503_v39  ;;  %3720 = vmatpush.msra.mxu1 %v1520_v40  ;;  %v1541_v39 = vld [vmem:[#allocation5 + $0x2d90] sm:$0xff]  ;;  %v1491_v40 = vld [vmem:[#allocation5 + $0x2c00] sm:$0xff]  ;;  %v1580_v25 = vld [vmem:[#allocation5 + $0x2ec8] sm:$0xff] }
 0x302   :  { %3741 = vmatpush.msra.mxu2 %v1535_v42  ;;  %3760 = vmatpush.msra.mxu3 %v1552_v43  ;;  %v2556_v42 = vadd.f32 %v2555_v33, %v2536_v37  ;;  %v1523_v43 = vld [vmem:[#allocation5 + $0x2d00] sm:$0xff]  ;;  %v1612_v28 = vld [vmem:[#allocation5 + $0x2fc8] sm:$0xff] }
 0x303   :  { %3702 = vmatpush.msra.mxu0 %v1502_v45  ;;  %3721 = vmatpush.msra.mxu1 %v1519_v46  ;;  %v2575_v45 = vpop.f32.mrf.mxu3  ;;  %v1825_v46 = vld.sshfl [vmem:[#allocation1] sm:$0xff pattern:$0x73625140]  ;;  %v1611_v33 = vld [vmem:[#allocation5 + $0x2fc0] sm:$0xff] }
 0x304   :  { %3742 = vmatpush.msra.mxu2 %v1534_v47  ;;  %3761 = vmatpush.msra.mxu3 %v1551_v48  ;;  %v1827_v47 = vld.sshfl [vmem:[#allocation1 + $0x10] sm:$0xff pattern:$0x73625140]  ;;  %v1570_v48 = vld [vmem:[#allocation5 + $0x2e78] sm:$0xff] }
 0x305   :  { %3703 = vmatpush.msra.mxu0 %v1501_v50  ;;  %3722 = vmatpush.msra.mxu1 %v1518_v51  ;;  %v2595_v50 = vpop.f32.mrf.mxu0  ;;  %v1507_v51 = vld [vmem:[#allocation5 + $0x2c80] sm:$0xff] }
 0x306   :  { %3743 = vmatpush.msra.mxu2 %v1533_v53  ;;  %3762 = vmatpush.msra.mxu3 %v1550_v54  ;;  %v2576_v53 = vadd.f32 %v2575_v45, %v2556_v42  ;;  %v1826_v54 = vld.sshfl [vmem:[#allocation1 + $0x8] sm:$0xff pattern:$0x73625140] }
 0x307   :  { %3704 = vmatpush.msra.mxu0 %v1500_v55  ;;  %3723 = vmatpush.msra.mxu1 %v1517_v56  ;;  %v1828_v55 = vld.sshfl [vmem:[#allocation1 + $0x18] sm:$0xff pattern:$0x73625140]  ;;  %v1569_v56 = vld [vmem:[#allocation5 + $0x2e70] sm:$0xff] }
 0x308   :  { %3744 = vmatpush.msra.mxu2 %v1532_v58  ;;  %3763 = vmatpush.msra.mxu3 %v1549_v59  ;;  %v2596_v58 = vadd.f32 %v2595_v50, %v2576_v53  ;;  %v1601_v59 = vld [vmem:[#allocation5 + $0x2f70] sm:$0xff] }
 0x309   :  { %3705 = vmatpush.msra.mxu0 %v1499_v61  ;;  %3724 = vmatpush.msra.mxu1 %v1516_v62  ;;  %v2615_v61 = vpop.f32.mrf.mxu1  ;;  %v1568_v62 = vld [vmem:[#allocation5 + $0x2e68] sm:$0xff] }
 0x30a   :  { %3745 = vmatpush.msra.mxu2 %v1531_v63  ;;  %3764 = vmatpush.msra.mxu3 %v1548_v0  ;;  %v1585_v63 = vld [vmem:[#allocation5 + $0x2ef0] sm:$0xff]  ;;  %v1600_v0 = vld [vmem:[#allocation5 + $0x2f68] sm:$0xff] }
 0x30b   :  { %3706 = vmatpush.msra.mxu0 %v1498_v2  ;;  %3725 = vmatpush.msra.mxu1 %v1515_v3  ;;  %v2635_v2 = vpop.f32.mrf.mxu2  ;;  %v1567_v3 = vld [vmem:[#allocation5 + $0x2e60] sm:$0xff] }
 0x30c   :  { %3746 = vmatpush.msra.mxu2 %v1530_v5  ;;  %3765 = vmatpush.msra.mxu3 %v1547_v6  ;;  %v2616_v5 = vadd.f32 %v2615_v61, %v2596_v58  ;;  %v1599_v6 = vld [vmem:[#allocation5 + $0x2f60] sm:$0xff] }
 0x30d   :  { %3707 = vmatpush.msra.mxu0 %v1497_v7  ;;  %3726 = vmatpush.msra.mxu1 %v1514_v8  ;;  %v1616_v7 = vld [vmem:[#allocation5 + $0x2fe8] sm:$0xff]  ;;  %v1566_v8 = vld [vmem:[#allocation5 + $0x2e58] sm:$0xff] }
 0x30e   :  { %3747 = vmatpush.msra.mxu2 %v1529_v10  ;;  %3766 = vmatpush.msra.mxu3 %v1546_v11  ;;  %v2636_v10 = vadd.f32 %v2635_v2, %v2616_v5  ;;  %v1598_v11 = vld [vmem:[#allocation5 + $0x2f58] sm:$0xff]  ;;  %v1605_v2 = vld [vmem:[#allocation5 + $0x2f90] sm:$0xff]  ;;  %v1572_v5 = vld [vmem:[#allocation5 + $0x2e88] sm:$0xff] }
 0x30f   :  { %3708 = vmatpush.msra.mxu0 %v1496_v13  ;;  %3727 = vmatpush.msra.mxu1 %v1513_v14  ;;  %v2655_v13 = vpop.f32.mrf.mxu3  ;;  %v1565_v14 = vld [vmem:[#allocation5 + $0x2e50] sm:$0xff] }
 0x310   :  { %3748 = vmatpush.msra.mxu2 %v1528_v15  ;;  %3767 = vmatpush.msra.mxu3 %v1545_v16  ;;  %v1582_v15 = vld [vmem:[#allocation5 + $0x2ed8] sm:$0xff]  ;;  %v1597_v16 = vld [vmem:[#allocation5 + $0x2f50] sm:$0xff] }
 0x311   :  { %3709 = vmatpush.msra.mxu0 %v1495_v18  ;;  %3728 = vmatpush.msra.mxu1 %v1512_v19  ;;  %v2675_v18 = vpop.f32.mrf.mxu0  ;;  %v1564_v19 = vld [vmem:[#allocation5 + $0x2e48] sm:$0xff] }
 0x312   :  { %3749 = vmatpush.msra.mxu2 %v1527_v21  ;;  %3768 = vmatpush.msra.mxu3 %v1544_v22  ;;  %v2656_v21 = vadd.f32 %v2655_v13, %v2636_v10  ;;  %v1596_v22 = vld [vmem:[#allocation5 + $0x2f48] sm:$0xff]  ;;  %v1831_v10 = vld.sshfl [vmem:[#allocation1 + $0x30] sm:$0xff pattern:$0x73625140]  ;;  %v1666_v13 = vld [vmem:[#allocation5 + $0x3178] sm:$0xff] }
 0x313   :  { %3710 = vmatpush.msra.mxu0 %v1494_v23  ;;  %3729 = vmatpush.msra.mxu1 %v1511_v24  ;;  %v1613_v23 = vld [vmem:[#allocation5 + $0x2fd0] sm:$0xff]  ;;  %v1563_v24 = vld [vmem:[#allocation5 + $0x2e40] sm:$0xff] }
 0x314   :  { %3750 = vmatpush.msra.mxu2 %v1526_v26  ;;  %3769 = vmatpush.msra.mxu3 %v1543_v27  ;;  %v2676_v26 = vadd.f32 %v2675_v18, %v2656_v21  ;;  %v1595_v27 = vld [vmem:[#allocation5 + $0x2f40] sm:$0xff]  ;;  %v1832_v18 = vld.sshfl [vmem:[#allocation1 + $0x38] sm:$0xff pattern:$0x73625140]  ;;  %v1650_v21 = vld [vmem:[#allocation5 + $0x30f8] sm:$0xff] }
 0x315   :  { %3711 = vmatpush.msra.mxu0 %v1493_v29  ;;  %3730 = vmatpush.msra.mxu1 %v1510_v30  ;;  %v2695_v29 = vpop.f32.mrf.mxu1  ;;  %v1562_v30 = vld [vmem:[#allocation5 + $0x2e38] sm:$0xff] }
 0x316   :  { %3751 = vmatpush.msra.mxu2 %v1525_v31  ;;  %3770 = vmatpush.msra.mxu3 %v1542_v32  ;;  %v1579_v31 = vld [vmem:[#allocation5 + $0x2ec0] sm:$0xff]  ;;  %v1594_v32 = vld [vmem:[#allocation5 + $0x2f38] sm:$0xff]  ;;  %v2696_v37 = vadd.f32 %v2695_v29, %v2676_v26  ;;  %v1649_v26 = vld [vmem:[#allocation5 + $0x30f0] sm:$0xff] }
 0x317   :  { %3712 = vmatpush.msra.mxu0 %v1492_v34  ;;  %3731 = vmatpush.msra.mxu1 %v1509_v35  ;;  %v2715_v34 = vpop.f32.mrf.mxu2  ;;  %v1561_v35 = vld [vmem:[#allocation5 + $0x2e30] sm:$0xff]  ;;  %v2735_v45 = vpop.f32.mrf.mxu3 }
 0x318   :  { %3752 = vmatpush.msra.mxu2 %v1524_v38  ;;  %3771 = vmatpush.msra.mxu3 %v1541_v39  ;;  %v1593_v38 = vld [vmem:[#allocation5 + $0x2f30] sm:$0xff]  ;;  %v1610_v39 = vld [vmem:[#allocation5 + $0x2fb8] sm:$0xff]  ;;  %v2716_v42 = vadd.f32 %v2715_v34, %v2696_v37  ;;  %v1680_v34 = vld [vmem:[#allocation5 + $0x31e8] sm:$0xff] }
 0x319   :  { %3713 = vmatpush.msra.mxu0 %v1491_v40  ;;  %3732 = vmatpush.msra.mxu1 %v1508_v41  ;;  %v1560_v40 = vld [vmem:[#allocation5 + $0x2e28] sm:$0xff]  ;;  %v1577_v41 = vld [vmem:[#allocation5 + $0x2eb0] sm:$0xff]  ;;  %v2755_v50 = vpop.f32.mrf.mxu0  ;;  %v1647_v37 = vld [vmem:[#allocation5 + $0x30e0] sm:$0xff] }
 0x31a   :  { %3753 = vmatpush.msra.mxu2 %v1523_v43  ;;  %3772 = vmatpush.msra.mxu3 %v1540_v44  ;;  %v1592_v43 = vld [vmem:[#allocation5 + $0x2f28] sm:$0xff]  ;;  %v1609_v44 = vld [vmem:[#allocation5 + $0x2fb0] sm:$0xff]  ;;  %v2736_v53 = vadd.f32 %v2735_v45, %v2716_v42  ;;  %v1646_v42 = vld [vmem:[#allocation5 + $0x30d8] sm:$0xff] }
 0x31b   :  { %3714 = vmatmul.f32.vlgmr.msra.gmra.mxu0 %v1825_v46  ;;  %3754 = vmatmul.f32.vlgmr.msra.gmra.mxu2 %v1827_v47  ;;  %v1559_v46 = vld [vmem:[#allocation5 + $0x2e20] sm:$0xff]  ;;  %v1576_v47 = vld [vmem:[#allocation5 + $0x2ea8] sm:$0xff]  ;;  %v1681_v29 = vld [vmem:[#allocation5 + $0x31f0] sm:$0xff] }
 0x31c   :  { %3778 = vmatpush.msrb.mxu0 %v1570_v48  ;;  %3818 = vmatpush.msrb.mxu2 %v1602_v49  ;;  %v1591_v48 = vld [vmem:[#allocation5 + $0x2f20] sm:$0xff]  ;;  %v1608_v49 = vld [vmem:[#allocation5 + $0x2fa8] sm:$0xff]  ;;  %v2756_v58 = vadd.f32 %v2755_v50, %v2736_v53  ;;  %v1678_v45 = vld [vmem:[#allocation5 + $0x31d8] sm:$0xff] }
 0x31d   :  { %3733 = vmatpush.msra.mxu1 %v1507_v51  ;;  %3773 = vmatpush.msra.mxu3 %v1539_v52  ;;  %v1558_v51 = vld [vmem:[#allocation5 + $0x2e18] sm:$0xff]  ;;  %v1575_v52 = vld [vmem:[#allocation5 + $0x2ea0] sm:$0xff]  ;;  %v2775_v61 = vpop.f32.mrf.mxu1  ;;  %v1677_v50 = vld [vmem:[#allocation5 + $0x31d0] sm:$0xff] }
 0x31e   :  { %3734 = vmatmul.f32.vlgmr.msra.gmra.mxu1 %v1826_v54  ;;  %3774 = vmatmul.f32.vlgmr.msra.gmra.mxu3 %v1828_v55  ;;  %v1590_v54 = vld [vmem:[#allocation5 + $0x2f18] sm:$0xff]  ;;  %v1607_v55 = vld [vmem:[#allocation5 + $0x2fa0] sm:$0xff]  ;;  %v1644_v53 = vld [vmem:[#allocation5 + $0x30c8] sm:$0xff] }
 0x31f   :  { %3779 = vmatpush.msrb.mxu0 %v1569_v56  ;;  %3798 = vmatpush.msrb.mxu1 %v1586_v57  ;;  %v1557_v56 = vld [vmem:[#allocation5 + $0x2e10] sm:$0xff]  ;;  %v1574_v57 = vld [vmem:[#allocation5 + $0x2e98] sm:$0xff] }
 0x320   :  { %3819 = vmatpush.msrb.mxu2 %v1601_v59  ;;  %3838 = vmatpush.msrb.mxu3 %v1618_v60  ;;  %v1589_v59 = vld [vmem:[#allocation5 + $0x2f10] sm:$0xff]  ;;  %v1606_v60 = vld [vmem:[#allocation5 + $0x2f98] sm:$0xff] }
 0x321   :  { %3780 = vmatpush.msrb.mxu0 %v1568_v62  ;;  %3799 = vmatpush.msrb.mxu1 %v1585_v63  ;;  %v1556_v62 = vld [vmem:[#allocation5 + $0x2e08] sm:$0xff]  ;;  %v1573_v63 = vld [vmem:[#allocation5 + $0x2e90] sm:$0xff] }
 0x322   :  { %3820 = vmatpush.msrb.mxu2 %v1600_v0  ;;  %3839 = vmatpush.msrb.mxu3 %v1617_v1  ;;  %v82_v0 = vld [vmem:[#allocation2 + $0xc0] sm:$0xff]  ;;  %v1588_v1 = vld [vmem:[#allocation5 + $0x2f08] sm:$0xff] }
 0x323   :  { %3781 = vmatpush.msrb.mxu0 %v1567_v3  ;;  %3800 = vmatpush.msrb.mxu1 %v1584_v4  ;;  %1833 = vst [vmem:[#allocation1] ss:$4 sm:$0xff] %v82_v0  ;;  %v2795_v3 = vpop.f32.mrf.mxu2  ;;  %v1555_v4 = vld [vmem:[#allocation5 + $0x2e00] sm:$0xff]  ;;  %v1642_v0 = vld [vmem:[#allocation5 + $0x30b8] sm:$0xff] }
 0x324   :  { %3821 = vmatpush.msrb.mxu2 %v1599_v6  ;;  %3840 = vmatpush.msrb.mxu3 %v1616_v7  ;;  %v2776_v6 = vadd.f32 %v2775_v61, %v2756_v58  ;;  %v1587_v7 = vld [vmem:[#allocation5 + $0x2f00] sm:$0xff] }
 0x325   :  { %3782 = vmatpush.msrb.mxu0 %v1566_v8  ;;  %3801 = vmatpush.msrb.mxu1 %v1583_v9  ;;  %v1604_v8 = vld [vmem:[#allocation5 + $0x2f88] sm:$0xff]  ;;  %v1829_v9 = vld.sshfl [vmem:[#allocation1 + $0x20] sm:$0xff pattern:$0x73625140]  ;;  %v1643_v58 = vld [vmem:[#allocation5 + $0x30c0] sm:$0xff] }
 0x326   :  { %3822 = vmatpush.msrb.mxu2 %v1598_v11  ;;  %3841 = vmatpush.msrb.mxu3 %v1615_v12  ;;  %v2796_v11 = vadd.f32 %v2795_v3, %v2776_v6  ;;  %v1634_v12 = vld [vmem:[#allocation5 + $0x3078] sm:$0xff]  ;;  %v1675_v61 = vld [vmem:[#allocation5 + $0x31c0] sm:$0xff] }
 0x327   :  { %3783 = vmatpush.msrb.mxu0 %v1565_v14  ;;  %3802 = vmatpush.msrb.mxu1 %v1582_v15  ;;  %v2815_v14 = vpop.f32.mrf.mxu3  ;;  %v1571_v15 = vld [vmem:[#allocation5 + $0x2e80] sm:$0xff] }
 0x328   :  { %3823 = vmatpush.msrb.mxu2 %v1597_v16  ;;  %3842 = vmatpush.msrb.mxu3 %v1614_v17  ;;  %v1603_v16 = vld [vmem:[#allocation5 + $0x2f80] sm:$0xff]  ;;  %v1830_v17 = vld.sshfl [vmem:[#allocation1 + $0x28] sm:$0xff pattern:$0x73625140] }
 0x329   :  { %3784 = vmatpush.msrb.mxu0 %v1564_v19  ;;  %3803 = vmatpush.msrb.mxu1 %v1581_v20  ;;  %v2835_v19 = vpop.f32.mrf.mxu0  ;;  %v1633_v20 = vld [vmem:[#allocation5 + $0x3070] sm:$0xff] }
 0x32a   :  { %3824 = vmatpush.msrb.mxu2 %v1596_v22  ;;  %3843 = vmatpush.msrb.mxu3 %v1613_v23  ;;  %v2816_v22 = vadd.f32 %v2815_v14, %v2796_v11  ;;  %v1665_v23 = vld [vmem:[#allocation5 + $0x3170] sm:$0xff] }
 0x32b   :  { %3785 = vmatpush.msrb.mxu0 %v1563_v24  ;;  %3804 = vmatpush.msrb.mxu1 %v1580_v25  ;;  %v1682_v24 = vld [vmem:[#allocation5 + $0x31f8] sm:$0xff]  ;;  %v1632_v25 = vld [vmem:[#allocation5 + $0x3068] sm:$0xff] }
 0x32c   :  { %3825 = vmatpush.msrb.mxu2 %v1595_v27  ;;  %3844 = vmatpush.msrb.mxu3 %v1612_v28  ;;  %v2836_v27 = vadd.f32 %v2835_v19, %v2816_v22  ;;  %v1664_v28 = vld [vmem:[#allocation5 + $0x3168] sm:$0xff] }
 0x32d   :  { %3786 = vmatpush.msrb.mxu0 %v1562_v30  ;;  %3805 = vmatpush.msrb.mxu1 %v1579_v31  ;;  %v2855_v30 = vpop.f32.mrf.mxu1  ;;  %v1631_v31 = vld [vmem:[#allocation5 + $0x3060] sm:$0xff] }
 0x32e   :  { %3826 = vmatpush.msrb.mxu2 %v1594_v32  ;;  %3845 = vmatpush.msrb.mxu3 %v1611_v33  ;;  %v1648_v32 = vld [vmem:[#allocation5 + $0x30e8] sm:$0xff]  ;;  %v1663_v33 = vld [vmem:[#allocation5 + $0x3160] sm:$0xff] }
 0x32f   :  { %3787 = vmatpush.msrb.mxu0 %v1561_v35  ;;  %3806 = vmatpush.msrb.mxu1 %v1578_v36  ;;  %v2875_v35 = vpop.f32.mrf.mxu2  ;;  %v1630_v36 = vld [vmem:[#allocation5 + $0x3058] sm:$0xff] }
 0x330   :  { %3827 = vmatpush.msrb.mxu2 %v1593_v38  ;;  %3846 = vmatpush.msrb.mxu3 %v1610_v39  ;;  %v2856_v38 = vadd.f32 %v2855_v30, %v2836_v27  ;;  %v1662_v39 = vld [vmem:[#allocation5 + $0x3158] sm:$0xff] }
 0x331   :  { %3788 = vmatpush.msrb.mxu0 %v1560_v40  ;;  %3807 = vmatpush.msrb.mxu1 %v1577_v41  ;;  %v1679_v40 = vld [vmem:[#allocation5 + $0x31e0] sm:$0xff]  ;;  %v1629_v41 = vld [vmem:[#allocation5 + $0x3050] sm:$0xff] }
 0x332   :  { %3828 = vmatpush.msrb.mxu2 %v1592_v43  ;;  %3847 = vmatpush.msrb.mxu3 %v1609_v44  ;;  %v2876_v43 = vadd.f32 %v2875_v35, %v2856_v38  ;;  %v1661_v44 = vld [vmem:[#allocation5 + $0x3150] sm:$0xff] }
 0x333   :  { %3789 = vmatpush.msrb.mxu0 %v1559_v46  ;;  %3808 = vmatpush.msrb.mxu1 %v1576_v47  ;;  %v2895_v46 = vpop.f32.mrf.mxu3  ;;  %v1628_v47 = vld [vmem:[#allocation5 + $0x3048] sm:$0xff] }
 0x334   :  { %3829 = vmatpush.msrb.mxu2 %v1591_v48  ;;  %3848 = vmatpush.msrb.mxu3 %v1608_v49  ;;  %v1645_v48 = vld [vmem:[#allocation5 + $0x30d0] sm:$0xff]  ;;  %v1660_v49 = vld [vmem:[#allocation5 + $0x3148] sm:$0xff] }
 0x335   :  { %3790 = vmatpush.msrb.mxu0 %v1558_v51  ;;  %3809 = vmatpush.msrb.mxu1 %v1575_v52  ;;  %v2915_v51 = vpop.f32.mrf.mxu0  ;;  %v1627_v52 = vld [vmem:[#allocation5 + $0x3040] sm:$0xff] }
 0x336   :  { %3830 = vmatpush.msrb.mxu2 %v1590_v54  ;;  %3849 = vmatpush.msrb.mxu3 %v1607_v55  ;;  %v2896_v54 = vadd.f32 %v2895_v46, %v2876_v43  ;;  %v1659_v55 = vld [vmem:[#allocation5 + $0x3140] sm:$0xff] }
 0x337   :  { %3791 = vmatpush.msrb.mxu0 %v1557_v56  ;;  %3810 = vmatpush.msrb.mxu1 %v1574_v57  ;;  %v1676_v56 = vld [vmem:[#allocation5 + $0x31c8] sm:$0xff]  ;;  %v1626_v57 = vld [vmem:[#allocation5 + $0x3038] sm:$0xff]  ;;  %v2955_v3 = vpop.f32.mrf.mxu2 }
 0x338   :  { %3831 = vmatpush.msrb.mxu2 %v1589_v59  ;;  %3850 = vmatpush.msrb.mxu3 %v1606_v60  ;;  %v2916_v59 = vadd.f32 %v2915_v51, %v2896_v54  ;;  %v1658_v60 = vld [vmem:[#allocation5 + $0x3138] sm:$0xff] }
 0x339   :  { %3792 = vmatpush.msrb.mxu0 %v1556_v62  ;;  %3811 = vmatpush.msrb.mxu1 %v1573_v63  ;;  %v2935_v62 = vpop.f32.mrf.mxu1  ;;  %v1625_v63 = vld [vmem:[#allocation5 + $0x3030] sm:$0xff] }
 0x33a   :  { %3832 = vmatpush.msrb.mxu2 %v1588_v1  ;;  %3851 = vmatpush.msrb.mxu3 %v1605_v2  ;;  %v1657_v1 = vld [vmem:[#allocation5 + $0x3130] sm:$0xff]  ;;  %v1674_v2 = vld [vmem:[#allocation5 + $0x31b8] sm:$0xff]  ;;  %v2936_v6 = vadd.f32 %v2935_v62, %v2916_v59 }
 0x33b   :  { %3793 = vmatpush.msrb.mxu0 %v1555_v4  ;;  %3812 = vmatpush.msrb.mxu1 %v1572_v5  ;;  %v1624_v4 = vld [vmem:[#allocation5 + $0x3028] sm:$0xff]  ;;  %v1641_v5 = vld [vmem:[#allocation5 + $0x30b0] sm:$0xff]  ;;  %v2975_v14 = vpop.f32.mrf.mxu3 }
 0x33c   :  { %3833 = vmatpush.msrb.mxu2 %v1587_v7  ;;  %3852 = vmatpush.msrb.mxu3 %v1604_v8  ;;  %v1656_v7 = vld [vmem:[#allocation5 + $0x3128] sm:$0xff]  ;;  %v1673_v8 = vld [vmem:[#allocation5 + $0x31b0] sm:$0xff]  ;;  %v2956_v11 = vadd.f32 %v2955_v3, %v2936_v6 }
 0x33d   :  { %3794 = vmatmul.f32.vlgmr.msrb.gmra.mxu0 %v1829_v9  ;;  %3834 = vmatmul.f32.vlgmr.msrb.gmra.mxu2 %v1831_v10  ;;  %v1623_v9 = vld [vmem:[#allocation5 + $0x3020] sm:$0xff]  ;;  %v1640_v10 = vld [vmem:[#allocation5 + $0x30a8] sm:$0xff]  ;;  %v2995_v19 = vpop.f32.mrf.mxu0 }
 0x33e   :  { %3858 = vmatpush.msra.mxu0 %v1634_v12  ;;  %3898 = vmatpush.msra.mxu2 %v1666_v13  ;;  %v1655_v12 = vld [vmem:[#allocation5 + $0x3120] sm:$0xff]  ;;  %v1672_v13 = vld [vmem:[#allocation5 + $0x31a8] sm:$0xff]  ;;  %v2976_v22 = vadd.f32 %v2975_v14, %v2956_v11 }
 0x33f   :  { %3813 = vmatpush.msrb.mxu1 %v1571_v15  ;;  %3853 = vmatpush.msrb.mxu3 %v1603_v16  ;;  %v1622_v15 = vld [vmem:[#allocation5 + $0x3018] sm:$0xff]  ;;  %v1639_v16 = vld [vmem:[#allocation5 + $0x30a0] sm:$0xff]  ;;  %v3035_v35 = vpop.f32.mrf.mxu2 }
 0x340   :  { %3814 = vmatmul.f32.vlgmr.msrb.gmra.mxu1 %v1830_v17  ;;  %3854 = vmatmul.f32.vlgmr.msrb.gmra.mxu3 %v1832_v18  ;;  %v1654_v17 = vld [vmem:[#allocation5 + $0x3118] sm:$0xff]  ;;  %v1671_v18 = vld [vmem:[#allocation5 + $0x31a0] sm:$0xff]  ;;  %v2996_v27 = vadd.f32 %v2995_v19, %v2976_v22 }
 0x341   :  { %3859 = vmatpush.msra.mxu0 %v1633_v20  ;;  %3878 = vmatpush.msra.mxu1 %v1650_v21  ;;  %v1621_v20 = vld [vmem:[#allocation5 + $0x3010] sm:$0xff]  ;;  %v1638_v21 = vld [vmem:[#allocation5 + $0x3098] sm:$0xff]  ;;  %v3015_v30 = vpop.f32.mrf.mxu1 }
 0x342   :  { %3899 = vmatpush.msra.mxu2 %v1665_v23  ;;  %3918 = vmatpush.msra.mxu3 %v1682_v24  ;;  %v1653_v23 = vld [vmem:[#allocation5 + $0x3110] sm:$0xff]  ;;  %v1670_v24 = vld [vmem:[#allocation5 + $0x3198] sm:$0xff]  ;;  %v3016_v38 = vadd.f32 %v3015_v30, %v2996_v27 }
 0x343   :  { %3860 = vmatpush.msra.mxu0 %v1632_v25  ;;  %3879 = vmatpush.msra.mxu1 %v1649_v26  ;;  %v1620_v25 = vld [vmem:[#allocation5 + $0x3008] sm:$0xff]  ;;  %v1637_v26 = vld [vmem:[#allocation5 + $0x3090] sm:$0xff] }
 0x344   :  { %3900 = vmatpush.msra.mxu2 %v1664_v28  ;;  %3919 = vmatpush.msra.mxu3 %v1681_v29  ;;  %v1652_v28 = vld [vmem:[#allocation5 + $0x3108] sm:$0xff]  ;;  %v1669_v29 = vld [vmem:[#allocation5 + $0x3190] sm:$0xff]  ;;  %v3036_v43 = vadd.f32 %v3035_v35, %v3016_v38 }
 0x345   :  { %3861 = vmatpush.msra.mxu0 %v1631_v31  ;;  %3880 = vmatpush.msra.mxu1 %v1648_v32  ;;  %v1619_v31 = vld [vmem:[#allocation5 + $0x3000] sm:$0xff]  ;;  %v1636_v32 = vld [vmem:[#allocation5 + $0x3088] sm:$0xff] }
 0x346   :  { %3901 = vmatpush.msra.mxu2 %v1663_v33  ;;  %3920 = vmatpush.msra.mxu3 %v1680_v34  ;;  %v1651_v33 = vld [vmem:[#allocation5 + $0x3100] sm:$0xff]  ;;  %v1668_v34 = vld [vmem:[#allocation5 + $0x3188] sm:$0xff] }
 0x347   :  { %3862 = vmatpush.msra.mxu0 %v1630_v36  ;;  %3881 = vmatpush.msra.mxu1 %v1647_v37  ;;  %v1834_v36 = vld.sshfl [vmem:[#allocation1] sm:$0xff pattern:$0x73625140]  ;;  %v1836_v37 = vld.sshfl [vmem:[#allocation1 + $0x10] sm:$0xff pattern:$0x73625140] }
 0x348   :  { %3902 = vmatpush.msra.mxu2 %v1662_v39  ;;  %3921 = vmatpush.msra.mxu3 %v1679_v40  ;;  %v1635_v39 = vld [vmem:[#allocation5 + $0x3080] sm:$0xff] }
 0x349   :  { %3863 = vmatpush.msra.mxu0 %v1629_v41  ;;  %3882 = vmatpush.msra.mxu1 %v1646_v42  ;;  %v1667_v40 = vld [vmem:[#allocation5 + $0x3180] sm:$0xff]  ;;  %v1835_v41 = vld.sshfl [vmem:[#allocation1 + $0x8] sm:$0xff pattern:$0x73625140] }
 0x34a   :  { %3903 = vmatpush.msra.mxu2 %v1661_v44  ;;  %3922 = vmatpush.msra.mxu3 %v1678_v45  ;;  %v1837_v42 = vld.sshfl [vmem:[#allocation1 + $0x18] sm:$0xff pattern:$0x73625140]  ;;  %v3055_v44 = vpop.f32.mrf.mxu3  ;;  %v3075_v45 = vpop.f32.mrf.mxu0 }
 0x34b   :  { %3864 = vmatpush.msra.mxu0 %v1628_v47  ;;  %3883 = vmatpush.msra.mxu1 %v1645_v48  ;;  %v3056_v46 = vadd.f32 %v3055_v44, %v3036_v43  ;;  %v3095_v48 = vpop.f32.mrf.mxu1 }
 0x34c   :  { %3904 = vmatpush.msra.mxu2 %v1660_v49  ;;  %3923 = vmatpush.msra.mxu3 %v1677_v50  ;;  %v3115_v49 = vpop.f32.mrf.mxu2 }
 0x34d   :  { %3865 = vmatpush.msra.mxu0 %v1627_v52  ;;  %3884 = vmatpush.msra.mxu1 %v1644_v53  ;;  %v3076_v47 = vadd.f32 %v3075_v45, %v3056_v46 }
 0x34e   :  { %3905 = vmatpush.msra.mxu2 %v1659_v55  ;;  %3924 = vmatpush.msra.mxu3 %v1676_v56 }
 0x34f   :  { %3866 = vmatpush.msra.mxu0 %v1626_v57  ;;  %3885 = vmatpush.msra.mxu1 %v1643_v58  ;;  %v3096_v50 = vadd.f32 %v3095_v48, %v3076_v47 }
 0x350   :  { %3906 = vmatpush.msra.mxu2 %v1658_v60  ;;  %3925 = vmatpush.msra.mxu3 %v1675_v61 }
 0x351   :  { %3867 = vmatpush.msra.mxu0 %v1625_v63  ;;  %3886 = vmatpush.msra.mxu1 %v1642_v0  ;;  %v3116_v51 = vadd.f32 %v3115_v49, %v3096_v50 }
 0x352   :  { %3907 = vmatpush.msra.mxu2 %v1657_v1  ;;  %3926 = vmatpush.msra.mxu3 %v1674_v2  ;;  %v3135_v52 = vpop.f32.mrf.mxu3  ;;  %v3155_v53 = vpop.f32.mrf.mxu0 }
 0x353   :  { %3868 = vmatpush.msra.mxu0 %v1624_v4  ;;  %3887 = vmatpush.msra.mxu1 %v1641_v5  ;;  %v3136_v54 = vadd.f32 %v3135_v52, %v3116_v51  ;;  %v3175_v56 = vpop.f32.mrf.mxu1 }
 0x354   :  { %3908 = vmatpush.msra.mxu2 %v1656_v7  ;;  %3927 = vmatpush.msra.mxu3 %v1673_v8  ;;  %v3195_v57 = vpop.f32.mrf.mxu2 }
 0x355   :  { %3869 = vmatpush.msra.mxu0 %v1623_v9  ;;  %3888 = vmatpush.msra.mxu1 %v1640_v10  ;;  %v3156_v55 = vadd.f32 %v3155_v53, %v3136_v54 }
 0x356   :  { %3909 = vmatpush.msra.mxu2 %v1655_v12  ;;  %3928 = vmatpush.msra.mxu3 %v1672_v13 }
 0x357   :  { %3870 = vmatpush.msra.mxu0 %v1622_v15  ;;  %3889 = vmatpush.msra.mxu1 %v1639_v16  ;;  %v3176_v58 = vadd.f32 %v3175_v56, %v3156_v55 }
 0x358   :  { %3910 = vmatpush.msra.mxu2 %v1654_v17  ;;  %3929 = vmatpush.msra.mxu3 %v1671_v18 }
 0x359   :  { %3871 = vmatpush.msra.mxu0 %v1621_v20  ;;  %3890 = vmatpush.msra.mxu1 %v1638_v21  ;;  %v3196_v59 = vadd.f32 %v3195_v57, %v3176_v58 }
 0x35a   :  { %3911 = vmatpush.msra.mxu2 %v1653_v23  ;;  %3930 = vmatpush.msra.mxu3 %v1670_v24  ;;  %v3215_v60 = vpop.f32.mrf.mxu3  ;;  %v3235_v61 = vpop.f32.mrf.mxu0 }
 0x35b   :  { %3872 = vmatpush.msra.mxu0 %v1620_v25  ;;  %3891 = vmatpush.msra.mxu1 %v1637_v26  ;;  %v3216_v62 = vadd.f32 %v3215_v60, %v3196_v59  ;;  %v3255_v0 = vpop.f32.mrf.mxu1 }
 0x35c   :  { %3912 = vmatpush.msra.mxu2 %v1652_v28  ;;  %3931 = vmatpush.msra.mxu3 %v1669_v29  ;;  %v3275_v1 = vpop.f32.mrf.mxu2 }
 0x35d   :  { %3873 = vmatpush.msra.mxu0 %v1619_v31  ;;  %3892 = vmatpush.msra.mxu1 %v1636_v32  ;;  %v3236_v63 = vadd.f32 %v3235_v61, %v3216_v62 }
 0x35e   :  { %3913 = vmatpush.msra.mxu2 %v1651_v33  ;;  %3932 = vmatpush.msra.mxu3 %v1668_v34 }
 0x35f   :  { %3874 = vmatmul.f32.vlgmr.msra.gmra.mxu0 %v1834_v36  ;;  %3914 = vmatmul.f32.vlgmr.msra.gmra.mxu2 %v1836_v37  ;;  %v3256_v2 = vadd.f32 %v3255_v0, %v3236_v63 }
 0x360   :  { %3893 = vmatpush.msra.mxu1 %v1635_v39  ;;  %3933 = vmatpush.msra.mxu3 %v1667_v40 }
 0x361   :  { %3894 = vmatmul.f32.vlgmr.msra.gmra.mxu1 %v1835_v41  ;;  %3934 = vmatmul.f32.vlgmr.msra.gmra.mxu3 %v1837_v42  ;;  %v3276_v3 = vadd.f32 %v3275_v1, %v3256_v2 }
 0x362   :  { %v3295_v4 = vpop.f32.mrf.mxu3  ;;  %v3315_v5 = vpop.f32.mrf.mxu0 }
 0x363   :  { %v3296_v6 = vadd.f32 %v3295_v4, %v3276_v3  ;;  %v3335_v8 = vpop.f32.mrf.mxu1 }
 0x364   :  { %v3355_v9 = vpop.f32.mrf.mxu2 }
 0x365   :  { %v3316_v7 = vadd.f32 %v3315_v5, %v3296_v6 }
 0x367   :  { %v3336_v10 = vadd.f32 %v3335_v8, %v3316_v7 }
 0x369   :  { %v3356_v11 = vadd.f32 %v3355_v9, %v3336_v10 }
 0x36a   :  { %v3375_v12 = vpop.f32.mrf.mxu3  ;;  %v3395_v13 = vpop.f32.mrf.mxu0 }
 0x36b   :  { %v3376_v14 = vadd.f32 %v3375_v12, %v3356_v11  ;;  %v3415_v16 = vpop.f32.mrf.mxu1 }
 0x36c   :  { %v3435_v17 = vpop.f32.mrf.mxu2 }
 0x36d   :  { %v3396_v15 = vadd.f32 %v3395_v13, %v3376_v14 }
 0x36f   :  { %v3416_v18 = vadd.f32 %v3415_v16, %v3396_v15 }
 0x371   :  { %v3436_v19 = vadd.f32 %v3435_v17, %v3416_v18 }
 0x372   :  { %v3455_v20 = vpop.f32.mrf.mxu3  ;;  %v3475_v21 = vpop.f32.mrf.mxu0 }
 0x373   :  { %v3456_v22 = vadd.f32 %v3455_v20, %v3436_v19  ;;  %v3495_v24 = vpop.f32.mrf.mxu1 }
 0x374   :  { %v3515_v25 = vpop.f32.mrf.mxu2 }
 0x375   :  { %v3476_v23 = vadd.f32 %v3475_v21, %v3456_v22 }
 0x377   :  { %v3496_v26 = vadd.f32 %v3495_v24, %v3476_v23 }
 0x379   :  { %v3516_v27 = vadd.f32 %v3515_v25, %v3496_v26 }
 0x37a   :  { %v3535_v28 = vpop.f32.mrf.mxu3  ;;  %v3555_v29 = vpop.f32.mrf.mxu0 }
 0x37b   :  { %v3536_v30 = vadd.f32 %v3535_v28, %v3516_v27  ;;  %v3575_v32 = vpop.f32.mrf.mxu1 }
 0x37c   :  { %v3595_v33 = vpop.f32.mrf.mxu2 }
 0x37d   :  { %v3556_v31 = vadd.f32 %v3555_v29, %v3536_v30 }
 0x37f   :  { %v3576_v34 = vadd.f32 %v3575_v32, %v3556_v31 }
 0x381   :  { %v3596_v35 = vadd.f32 %v3595_v33, %v3576_v34 }
 0x382   :  { %v3615_v36 = vpop.f32.mrf.mxu3  ;;  %v3635_v37 = vpop.f32.mrf.mxu0 }
 0x383   :  { %v3616_v38 = vadd.f32 %v3615_v36, %v3596_v35  ;;  %v3655_v40 = vpop.f32.mrf.mxu1 }
 0x384   :  { %v3675_v41 = vpop.f32.mrf.mxu2 }
 0x385   :  { %v3636_v39 = vadd.f32 %v3635_v37, %v3616_v38 }
 0x387   :  { %v3656_v42 = vadd.f32 %v3655_v40, %v3636_v39 }
 0x389   :  { %v3676_v43 = vadd.f32 %v3675_v41, %v3656_v42 }
 0x38a   :  { %v3695_v44 = vpop.f32.mrf.mxu3 }
 0x38b   :  { %v3696_v46 = vadd.f32 %v3695_v44, %v3676_v43 }
 0x398   :  { %v3715_v45 = vpop.f32.mrf.mxu0 }
 0x399   :  { %v3716_v47 = vadd.f32 %v3715_v45, %v3696_v46 }
 0x39b   :  { %v3735_v48 = vpop.f32.mrf.mxu1 }
 0x39c   :  { %v3736_v50 = vadd.f32 %v3735_v48, %v3716_v47 }
 0x39e   :  { %v3755_v49 = vpop.f32.mrf.mxu2 }
 0x39f   :  { %v3756_v51 = vadd.f32 %v3755_v49, %v3736_v50 }
 0x3a1   :  { %v3775_v52 = vpop.f32.mrf.mxu3 }
 0x3a2   :  { %v3776_v54 = vadd.f32 %v3775_v52, %v3756_v51 }
 0x3ba   :  { %v3795_v53 = vpop.f32.mrf.mxu0 }
 0x3bb   :  { %v3796_v55 = vadd.f32 %v3795_v53, %v3776_v54 }
 0x3bd   :  { %v3815_v56 = vpop.f32.mrf.mxu1 }
 0x3be   :  { %v3816_v58 = vadd.f32 %v3815_v56, %v3796_v55 }
 0x3c0   :  { %v3835_v57 = vpop.f32.mrf.mxu2 }
 0x3c1   :  { %v3836_v59 = vadd.f32 %v3835_v57, %v3816_v58 }
 0x3c3   :  { %v3855_v60 = vpop.f32.mrf.mxu3 }
 0x3c4   :  { %v3856_v61 = vadd.f32 %v3855_v60, %v3836_v59 }
 0x3dc   :  { %v3875_v62 = vpop.f32.mrf.mxu0 }
 0x3dd   :  { %v3876_v63 = vadd.f32 %v3875_v62, %v3856_v61 }
 0x3de   :  { %v3895_v0 = vpop.f32.mrf.mxu1 }
 0x3df   :  { %v3896_v1 = vadd.f32 %v3895_v0, %v3876_v63 }
 0x3e2   :  { %v3915_v2 = vpop.f32.mrf.mxu2 }
 0x3e3   :  { %v3916_v3 = vadd.f32 %v3915_v2, %v3896_v1 }
 0x3e4   :  { %v3935_v4 = vpop.f32.mrf.mxu3 }
 0x3e5   :  { %v3936_v5 = vadd.f32 %v3935_v4, %v3916_v3 }
 0x3e7   :  { %3938 = vst [vmem:[#allocation8] sm:$0x3] %v3936_v5 }
 0x3e8   :  { %3949 = dma.vmem_to_hbm [thread:$0]  %s3945_s2, 32, %s3947_s30, [#allocation4]  }
 0x3e9   :  { %4064 = dma.done.wait [#allocation4], 32  }
 0x3ea   :  { %4065 = vsyncadd [#allocation4], 4294967264 }
 0x3eb   :  { %3954 = vsyncpa [#allocation3], 1 }
 0x3ec   :  { %3955 = vsyncpa [#allocation6], 1 }
 0x3ed   :  { %3956 = vsyncpa [#allocation4], 1 }

</bundles_post_ra>
